<compile_context>
chip_gen: v7x
topology: tpu7x:2x2x1
jax: 0.10.0
libtpu: 0.0.40
codegen_flags: <defaults>
</compile_context>

<pallas_src>
import functools

import numpy as np
import jax
import jax.numpy as jnp
from jax.experimental import pallas as pl
from jax.experimental.pallas import tpu as pltpu


# ----------------------------------------------------------------------------
# Fused forward kernel (one batch tile per grid step, everything in VMEM)
# ----------------------------------------------------------------------------
def _mnist_fused_kernel(x_ref, t1_ref, b1_ref, t2_ref, b2_ref,
                        w1p_ref, bf1_ref, w2f_ref, bf2_ref,
                        probs_ref, rep_ref):
    """x_ref   : (4, 9, TB, 28)  mod-4 row-split zero-padded input,
                                 x_ref[m, p, b, w] == x[b, 4*p + m, w]
       t1_ref  : (2, 140, 120)   conv1 banded weights, one per pooling col offset dj
       b1_ref  : (1, 120)        conv1 bias tiled over the 12 output columns
       t2_ref  : (2, 600, 80)    conv2 banded weights
       b2_ref  : (1, 80)         conv2 bias tiled over the 4 output columns
       w1p_ref : (320, 50)       fc1 weight with rows permuted to (qh, qw, c') order
       bf1_ref : (1, 50), w2f_ref: (50, 2), bf2_ref: (1, 2)
       probs_ref: (TB, 2)        softmax output
       rep_ref  : (TB, 50)       ReLU(fc1) representation (rep=True path)
    """
    tb = probs_ref.shape[0]
    f32 = jnp.float32

    # ---- conv1 (1->10, k=5) + 2x2 max-pool + bias + ReLU --------------------
    # Matmul rows are (rp, di, hh, b) with pooled output row ph = 2*hh + rp;
    # columns of t1 are (pw, cout), so the column-direction conv + pooling
    # column offset dj are baked into the (lane-dense) weight.
    xcats = []
    for rp in range(2):                      # output-row parity
        for di in range(2):                  # pooling row offset
            pieces = []
            for ki in range(5):              # conv kernel row
                r = 2 * rp + di + ki         # input row offset, 0..7
                pieces.append(x_ref[r % 4, (r // 4):(r // 4) + 8, :, :])  # (8, TB, 28)
            xcats.append(jnp.concatenate(pieces, axis=-1))                # (8, TB, 140)
    x1 = jnp.concatenate(xcats, axis=0).reshape(32 * tb, 140)

    y1 = jnp.maximum(                        # max over pooling column offset dj
        jnp.dot(x1, t1_ref[0], preferred_element_type=f32),
        jnp.dot(x1, t1_ref[1], preferred_element_type=f32),
    ).reshape(4, 8 * tb, 120)                # leading dim enumerates (rp, di)

    zeros2 = jnp.zeros((2, tb, 120), f32)
    a1 = []                                  # a1[rp]: (10, TB, 120), rows (hh, b)
    for rp in range(2):
        a = jnp.maximum(y1[2 * rp], y1[2 * rp + 1])        # max over row offset di
        a = jnp.maximum(a + b1_ref[...], 0.0)              # bias + ReLU
        a1.append(jnp.concatenate([a.reshape(8, tb, 120), zeros2], axis=0))

    # ---- conv2 (10->20, k=5) + Dropout2d (eval: identity) + pool + ReLU -----
    # TODO(synk): training-mode dropout masks are not implemented (inference only).
    xc2 = []
    for di in range(2):
        pieces = []
        for ki in range(5):
            r = di + ki                                     # 0..5
            pieces.append(a1[r % 2][(r // 2):(r // 2) + 8])  # (8, TB, 120)
        xc2.append(jnp.concatenate(pieces, axis=-1))         # (8, TB, 600)
    x2 = jnp.concatenate(xc2, axis=0).reshape(16 * tb, 600)

    y2 = jnp.maximum(                        # max over pooling column offset dj
        jnp.dot(x2, t2_ref[0], preferred_element_type=f32),
        jnp.dot(x2, t2_ref[1], preferred_element_type=f32),
    ).reshape(2, 8 * tb, 80)                 # leading dim = di
    a2 = jnp.maximum(jnp.maximum(y2[0], y2[1]) + b2_ref[...], 0.0)
    a2 = a2.reshape(8, tb, 80)               # rows (qh, b); qh 0..3 valid

    # ---- flatten in (qh, qw, c') order + fc1 + ReLU (+ dropout identity) ----
    flat = jnp.concatenate([a2[0], a2[1], a2[2], a2[3]], axis=-1)   # (TB, 320)
    h = jnp.maximum(
        jnp.dot(flat, w1p_ref[...], preferred_element_type=f32) + bf1_ref[...],
        0.0)
    rep_ref[...] = h

    # ---- fc2 + softmax -------------------------------------------------------
    logits = jnp.dot(h, w2f_ref[...], preferred_element_type=f32) + bf2_ref[...]
    z = logits - jnp.max(logits, axis=-1, keepdims=True)
    e = jnp.exp(z)
    probs_ref[...] = e / jnp.sum(e, axis=-1, keepdims=True)


# ----------------------------------------------------------------------------
# One-time weight preparation (hoisted out of the forward pass)
# ----------------------------------------------------------------------------
def prepare_params(params):
    w1 = jnp.asarray(params["conv1_w"], jnp.float32)   # (10, 1, 5, 5)
    w2 = jnp.asarray(params["conv2_w"], jnp.float32)   # (20, 10, 5, 5)

    # conv1 banded weight: t1[dj, ki*28 + w, pw*10 + c] = w1[c, 0, ki, w - 2*pw - dj]
    e1 = np.zeros((2, 5, 28, 12), np.float32)
    for dj in range(2):
        for kj in range(5):
            for pw in range(12):
                e1[dj, kj, 2 * pw + dj + kj, pw] = 1.0
    t1 = jnp.einsum("djwp,cij->diwpc", jnp.asarray(e1), w1[:, 0]).reshape(2, 140, 120)

    # conv2 banded weight: t2[dj, ki*120 + pw*10 + c, qw*20 + u] = w2[u, c, ki, pw - 2*qw - dj]
    e2 = np.zeros((2, 5, 12, 4), np.float32)
    for dj in range(2):
        for kj in range(5):
            for qw in range(4):
                e2[dj, kj, 2 * qw + dj + kj, qw] = 1.0
    t2 = jnp.einsum("djpq,ucij->dipcqu", jnp.asarray(e2), w2).reshape(2, 600, 80)

    # fc1 rows permuted from the PyTorch NCHW flatten order (c', qh, qw)
    # to the kernel's (qh, qw, c') order -> no activation transpose needed.
    w1p = jnp.asarray(params["fc1_w"], jnp.float32).reshape(50, 20, 4, 4)
    w1p = jnp.transpose(w1p, (2, 3, 1, 0)).reshape(320, 50)

    return {
        "t1": t1,
        "b1": jnp.tile(jnp.asarray(params["conv1_b"], jnp.float32), 12)[None],  # (1, 120)
        "t2": t2,
        "b2": jnp.tile(jnp.asarray(params["conv2_b"], jnp.float32), 4)[None],   # (1, 80)
        "w1p": w1p,
        "bf1": jnp.asarray(params["fc1_b"], jnp.float32)[None],                 # (1, 50)
        "w2f": jnp.asarray(params["fc2_w"], jnp.float32).T,                     # (50, 2)
        "bf2": jnp.asarray(params["fc2_b"], jnp.float32)[None],                 # (1, 2)
    }


# ----------------------------------------------------------------------------
# Forward wrapper
# ----------------------------------------------------------------------------
def _round_up(n, m):
    return (n + m - 1) // m * m


@functools.partial(jax.jit, static_argnames=("rep", "batch_tile"))
def mnist_classifier_forward(x, prep, rep=False, batch_tile=64):
    x = jnp.asarray(x, jnp.float32)
    if x.ndim < 4:
        x = x.reshape(-1, 1, 28, 28)
    b = x.shape[0]
    x = x.reshape(b, 28, 28)

    tb = _round_up(min(batch_tile, _round_up(b, 8)), 8)
    b_pad = _round_up(b, tb)

    # Layout plumbing only (no im2col blowup): pad rows 28->36, split them mod 4
    # and move batch onto the sublane axis so every in-kernel access is a
    # contiguous static slice.
    xp = jnp.pad(x, ((0, b_pad - b), (0, 8), (0, 0)))                     # (b_pad, 36, 28)
    xh4 = jnp.transpose(xp.reshape(b_pad, 9, 4, 28), (2, 1, 0, 3))        # (4, 9, b_pad, 28)

    def const_spec(shape):
        return pl.BlockSpec(shape, lambda i, _s=shape: (0,) * len(_s))

    probs, rep_out = pl.pallas_call(
        _mnist_fused_kernel,
        out_shape=(jax.ShapeDtypeStruct((b_pad, 2), jnp.float32),
                   jax.ShapeDtypeStruct((b_pad, 50), jnp.float32)),
        grid_spec=pltpu.PrefetchScalarGridSpec(
            num_scalar_prefetch=0,
            grid=(b_pad // tb,),
            in_specs=[
                pl.BlockSpec((4, 9, tb, 28), lambda i: (0, 0, i, 0)),
                const_spec((2, 140, 120)),
                const_spec((1, 120)),
                const_spec((2, 600, 80)),
                const_spec((1, 80)),
                const_spec((320, 50)),
                const_spec((1, 50)),
                const_spec((50, 2)),
                const_spec((1, 2)),
            ],
            out_specs=(pl.BlockSpec((tb, 2), lambda i: (i, 0)),
                       pl.BlockSpec((tb, 50), lambda i: (i, 0))),
        ),
        compiler_params=pltpu.CompilerParams(
            dimension_semantics=("parallel",),
            vmem_limit_bytes=32 * 1024 * 1024,
        ),
    )(xh4, prep["t1"], prep["b1"], prep["t2"], prep["b2"],
      prep["w1p"], prep["bf1"], prep["w2f"], prep["bf2"])

    return rep_out[:b] if rep else probs[:b]


# ----------------------------------------------------------------------------
# Pure-JAX (XLA) reference of the same forward pass, for validation
# ----------------------------------------------------------------------------
def _reference_forward(x, params, rep=False):
    x = jnp.asarray(x, jnp.float32).reshape(-1, 1, 28, 28)

    def conv(v, w, bias):
        y = jax.lax.conv_general_dilated(
            v, w, window_strides=(1, 1), padding="VALID",
            dimension_numbers=("NCHW", "OIHW", "NCHW"))
        return y + bias[None, :, None, None]

    def pool(v):
        return jax.lax.reduce_window(v, -jnp.inf, jax.lax.max,
                                     (1, 1, 2, 2), (1, 1, 2, 2), "VALID")

    y = jnp.maximum(pool(conv(x, params["conv1_w"], params["conv1_b"])), 0.0)
    y = jnp.maximum(pool(conv(y, params["conv2_w"], params["conv2_b"])), 0.0)
    h = jnp.maximum(y.reshape(y.shape[0], 320) @ params["fc1_w"].T + params["fc1_b"], 0.0)
    if rep:
        return h
    logits = h @ params["fc2_w"].T + params["fc2_b"]
    return jax.nn.softmax(logits, axis=-1)


# ----------------------------------------------------------------------------
# Deterministic synthetic parameters (shapes from MnistClassifier.__init__)
# ----------------------------------------------------------------------------
def init_params(key):
    ks = jax.random.split(key, 8)
    n = lambda k, s, sc: (sc * jax.random.normal(k, s)).astype(jnp.float32)
    return {
        "conv1_w": n(ks[0], (10, 1, 5, 5), 0.10),
        "conv1_b": n(ks[1], (10,), 0.10),
        "conv2_w": n(ks[2], (20, 10, 5, 5), 0.05),
        "conv2_b": n(ks[3], (20,), 0.05),
        "fc1_w": n(ks[4], (50, 320), 0.05),
        "fc1_b": n(ks[5], (50,), 0.05),
        "fc2_w": n(ks[6], (2, 50), 0.10),
        "fc2_b": n(ks[7], (2,), 0.10),
    }


if __name__ == "__main__":
    key = jax.random.PRNGKey(0)
    pkey, xkey = jax.random.split(key)
    params = init_params(pkey)
    prep = prepare_params(params)            # one-time weight layout transform

    # batch=2 MNIST-shaped input (28x28 is required by the fc1=320 flatten)
    x = jax.random.normal(xkey, (2, 1, 28, 28), dtype=jnp.float32)

    probs = jax.block_until_ready(mnist_classifier_forward(x, prep, rep=False))
    rep_out = jax.block_until_ready(mnist_classifier_forward(x, prep, rep=True))

    assert probs.shape == (2, 2) and rep_out.shape == (2, 50)
    assert bool(jnp.all(jnp.isfinite(probs)))
    assert bool(jnp.allclose(jnp.sum(probs, axis=-1), 1.0, atol=1e-5))

    # Cross-check the fused kernel against the pure-XLA reference.
    ref_probs = _reference_forward(x, params, rep=False)
    ref_rep = _reference_forward(x, params, rep=True)
    assert bool(jnp.max(jnp.abs(probs - ref_probs)) < 1e-3)
    assert bool(jnp.max(jnp.abs(rep_out - ref_rep)) < 1e-3)

    print("KERNEL_OK")
</pallas_src>

<mosaic_0001>
module attributes {stable_mosaic.version = 11 : i64} {
  func.func @_mnist_fused_kernel(%arg0: i32, %arg1: memref<4x9x8x28xf32, #tpu.memory_space<vmem>>, %arg2: memref<2x140x120xf32, #tpu.memory_space<vmem>>, %arg3: memref<1x120xf32, #tpu.memory_space<vmem>>, %arg4: memref<2x600x80xf32, #tpu.memory_space<vmem>>, %arg5: memref<1x80xf32, #tpu.memory_space<vmem>>, %arg6: memref<320x50xf32, #tpu.memory_space<vmem>>, %arg7: memref<1x50xf32, #tpu.memory_space<vmem>>, %arg8: memref<50x2xf32, #tpu.memory_space<vmem>>, %arg9: memref<1x2xf32, #tpu.memory_space<vmem>>, %arg10: memref<8x2xf32, #tpu.memory_space<vmem>>, %arg11: memref<8x50xf32, #tpu.memory_space<vmem>>) attributes {dimension_semantics = [#tpu.dimension_semantics<parallel>], iteration_bounds = array<i64: 1>, scalar_prefetch = 0 : i64, scratch_operands = 0 : i64, tpu.core_type = #tpu.core_type<tc>, window_params = [{transform_indices = @transform_0, window_bounds = array<i64: 4, 9, 8, 28>}, {pipeline_mode = #tpu.pipeline_mode<synchronous>, transform_indices = @transform_1, window_bounds = array<i64: 2, 140, 120>}, {pipeline_mode = #tpu.pipeline_mode<synchronous>, transform_indices = @transform_2, window_bounds = array<i64: 1, 120>}, {pipeline_mode = #tpu.pipeline_mode<synchronous>, transform_indices = @transform_3, window_bounds = array<i64: 2, 600, 80>}, {pipeline_mode = #tpu.pipeline_mode<synchronous>, transform_indices = @transform_4, window_bounds = array<i64: 1, 80>}, {pipeline_mode = #tpu.pipeline_mode<synchronous>, transform_indices = @transform_5, window_bounds = array<i64: 320, 50>}, {pipeline_mode = #tpu.pipeline_mode<synchronous>, transform_indices = @transform_6, window_bounds = array<i64: 1, 50>}, {pipeline_mode = #tpu.pipeline_mode<synchronous>, transform_indices = @transform_7, window_bounds = array<i64: 50, 2>}, {pipeline_mode = #tpu.pipeline_mode<synchronous>, transform_indices = @transform_8, window_bounds = array<i64: 1, 2>}, {transform_indices = @transform_9, window_bounds = array<i64: 8, 2>}, {transform_indices = @transform_10, window_bounds = array<i64: 8, 50>}]} {
    %c0 = arith.constant 0 : index
    %c0_0 = arith.constant 0 : index
    %c0_1 = arith.constant 0 : index
    %c0_2 = arith.constant 0 : index
    %0 = vector.load %arg1[%c0, %c0_0, %c0_1, %c0_2] : memref<4x9x8x28xf32, #tpu.memory_space<vmem>>, vector<1x8x8x28xf32>
    %1 = vector.shape_cast %0 : vector<1x8x8x28xf32> to vector<8x8x28xf32>
    %c1 = arith.constant 1 : index
    %c0_3 = arith.constant 0 : index
    %c0_4 = arith.constant 0 : index
    %c0_5 = arith.constant 0 : index
    %2 = vector.load %arg1[%c1, %c0_3, %c0_4, %c0_5] : memref<4x9x8x28xf32, #tpu.memory_space<vmem>>, vector<1x8x8x28xf32>
    %3 = vector.shape_cast %2 : vector<1x8x8x28xf32> to vector<8x8x28xf32>
    %c2 = arith.constant 2 : index
    %c0_6 = arith.constant 0 : index
    %c0_7 = arith.constant 0 : index
    %c0_8 = arith.constant 0 : index
    %4 = vector.load %arg1[%c2, %c0_6, %c0_7, %c0_8] : memref<4x9x8x28xf32, #tpu.memory_space<vmem>>, vector<1x8x8x28xf32>
    %5 = vector.shape_cast %4 : vector<1x8x8x28xf32> to vector<8x8x28xf32>
    %c3 = arith.constant 3 : index
    %c0_9 = arith.constant 0 : index
    %c0_10 = arith.constant 0 : index
    %c0_11 = arith.constant 0 : index
    %6 = vector.load %arg1[%c3, %c0_9, %c0_10, %c0_11] : memref<4x9x8x28xf32, #tpu.memory_space<vmem>>, vector<1x8x8x28xf32>
    %7 = vector.shape_cast %6 : vector<1x8x8x28xf32> to vector<8x8x28xf32>
    %c0_12 = arith.constant 0 : index
    %c1_13 = arith.constant 1 : index
    %c0_14 = arith.constant 0 : index
    %c0_15 = arith.constant 0 : index
    %8 = vector.load %arg1[%c0_12, %c1_13, %c0_14, %c0_15] : memref<4x9x8x28xf32, #tpu.memory_space<vmem>>, vector<1x8x8x28xf32>
    %9 = vector.shape_cast %8 : vector<1x8x8x28xf32> to vector<8x8x28xf32>
    %10 = tpu.concatenate %1, %3, %5, %7, %9 in 2 : vector<8x8x28xf32>, vector<8x8x28xf32>, vector<8x8x28xf32>, vector<8x8x28xf32>, vector<8x8x28xf32> -> vector<8x8x140xf32>
    %c1_16 = arith.constant 1 : index
    %c0_17 = arith.constant 0 : index
    %c0_18 = arith.constant 0 : index
    %c0_19 = arith.constant 0 : index
    %11 = vector.load %arg1[%c1_16, %c0_17, %c0_18, %c0_19] : memref<4x9x8x28xf32, #tpu.memory_space<vmem>>, vector<1x8x8x28xf32>
    %12 = vector.shape_cast %11 : vector<1x8x8x28xf32> to vector<8x8x28xf32>
    %c2_20 = arith.constant 2 : index
    %c0_21 = arith.constant 0 : index
    %c0_22 = arith.constant 0 : index
    %c0_23 = arith.constant 0 : index
    %13 = vector.load %arg1[%c2_20, %c0_21, %c0_22, %c0_23] : memref<4x9x8x28xf32, #tpu.memory_space<vmem>>, vector<1x8x8x28xf32>
    %14 = vector.shape_cast %13 : vector<1x8x8x28xf32> to vector<8x8x28xf32>
    %c3_24 = arith.constant 3 : index
    %c0_25 = arith.constant 0 : index
    %c0_26 = arith.constant 0 : index
    %c0_27 = arith.constant 0 : index
    %15 = vector.load %arg1[%c3_24, %c0_25, %c0_26, %c0_27] : memref<4x9x8x28xf32, #tpu.memory_space<vmem>>, vector<1x8x8x28xf32>
    %16 = vector.shape_cast %15 : vector<1x8x8x28xf32> to vector<8x8x28xf32>
    %c0_28 = arith.constant 0 : index
    %c1_29 = arith.constant 1 : index
    %c0_30 = arith.constant 0 : index
    %c0_31 = arith.constant 0 : index
    %17 = vector.load %arg1[%c0_28, %c1_29, %c0_30, %c0_31] : memref<4x9x8x28xf32, #tpu.memory_space<vmem>>, vector<1x8x8x28xf32>
    %18 = vector.shape_cast %17 : vector<1x8x8x28xf32> to vector<8x8x28xf32>
    %c1_32 = arith.constant 1 : index
    %c1_33 = arith.constant 1 : index
    %c0_34 = arith.constant 0 : index
    %c0_35 = arith.constant 0 : index
    %19 = vector.load %arg1[%c1_32, %c1_33, %c0_34, %c0_35] : memref<4x9x8x28xf32, #tpu.memory_space<vmem>>, vector<1x8x8x28xf32>
    %20 = vector.shape_cast %19 : vector<1x8x8x28xf32> to vector<8x8x28xf32>
    %21 = tpu.concatenate %12, %14, %16, %18, %20 in 2 : vector<8x8x28xf32>, vector<8x8x28xf32>, vector<8x8x28xf32>, vector<8x8x28xf32>, vector<8x8x28xf32> -> vector<8x8x140xf32>
    %c2_36 = arith.constant 2 : index
    %c0_37 = arith.constant 0 : index
    %c0_38 = arith.constant 0 : index
    %c0_39 = arith.constant 0 : index
    %22 = vector.load %arg1[%c2_36, %c0_37, %c0_38, %c0_39] : memref<4x9x8x28xf32, #tpu.memory_space<vmem>>, vector<1x8x8x28xf32>
    %23 = vector.shape_cast %22 : vector<1x8x8x28xf32> to vector<8x8x28xf32>
    %c3_40 = arith.constant 3 : index
    %c0_41 = arith.constant 0 : index
    %c0_42 = arith.constant 0 : index
    %c0_43 = arith.constant 0 : index
    %24 = vector.load %arg1[%c3_40, %c0_41, %c0_42, %c0_43] : memref<4x9x8x28xf32, #tpu.memory_space<vmem>>, vector<1x8x8x28xf32>
    %25 = vector.shape_cast %24 : vector<1x8x8x28xf32> to vector<8x8x28xf32>
    %c0_44 = arith.constant 0 : index
    %c1_45 = arith.constant 1 : index
    %c0_46 = arith.constant 0 : index
    %c0_47 = arith.constant 0 : index
    %26 = vector.load %arg1[%c0_44, %c1_45, %c0_46, %c0_47] : memref<4x9x8x28xf32, #tpu.memory_space<vmem>>, vector<1x8x8x28xf32>
    %27 = vector.shape_cast %26 : vector<1x8x8x28xf32> to vector<8x8x28xf32>
    %c1_48 = arith.constant 1 : index
    %c1_49 = arith.constant 1 : index
    %c0_50 = arith.constant 0 : index
    %c0_51 = arith.constant 0 : index
    %28 = vector.load %arg1[%c1_48, %c1_49, %c0_50, %c0_51] : memref<4x9x8x28xf32, #tpu.memory_space<vmem>>, vector<1x8x8x28xf32>
    %29 = vector.shape_cast %28 : vector<1x8x8x28xf32> to vector<8x8x28xf32>
    %c2_52 = arith.constant 2 : index
    %c1_53 = arith.constant 1 : index
    %c0_54 = arith.constant 0 : index
    %c0_55 = arith.constant 0 : index
    %30 = vector.load %arg1[%c2_52, %c1_53, %c0_54, %c0_55] : memref<4x9x8x28xf32, #tpu.memory_space<vmem>>, vector<1x8x8x28xf32>
    %31 = vector.shape_cast %30 : vector<1x8x8x28xf32> to vector<8x8x28xf32>
    %32 = tpu.concatenate %23, %25, %27, %29, %31 in 2 : vector<8x8x28xf32>, vector<8x8x28xf32>, vector<8x8x28xf32>, vector<8x8x28xf32>, vector<8x8x28xf32> -> vector<8x8x140xf32>
    %c3_56 = arith.constant 3 : index
    %c0_57 = arith.constant 0 : index
    %c0_58 = arith.constant 0 : index
    %c0_59 = arith.constant 0 : index
    %33 = vector.load %arg1[%c3_56, %c0_57, %c0_58, %c0_59] : memref<4x9x8x28xf32, #tpu.memory_space<vmem>>, vector<1x8x8x28xf32>
    %34 = vector.shape_cast %33 : vector<1x8x8x28xf32> to vector<8x8x28xf32>
    %c0_60 = arith.constant 0 : index
    %c1_61 = arith.constant 1 : index
    %c0_62 = arith.constant 0 : index
    %c0_63 = arith.constant 0 : index
    %35 = vector.load %arg1[%c0_60, %c1_61, %c0_62, %c0_63] : memref<4x9x8x28xf32, #tpu.memory_space<vmem>>, vector<1x8x8x28xf32>
    %36 = vector.shape_cast %35 : vector<1x8x8x28xf32> to vector<8x8x28xf32>
    %c1_64 = arith.constant 1 : index
    %c1_65 = arith.constant 1 : index
    %c0_66 = arith.constant 0 : index
    %c0_67 = arith.constant 0 : index
    %37 = vector.load %arg1[%c1_64, %c1_65, %c0_66, %c0_67] : memref<4x9x8x28xf32, #tpu.memory_space<vmem>>, vector<1x8x8x28xf32>
    %38 = vector.shape_cast %37 : vector<1x8x8x28xf32> to vector<8x8x28xf32>
    %c2_68 = arith.constant 2 : index
    %c1_69 = arith.constant 1 : index
    %c0_70 = arith.constant 0 : index
    %c0_71 = arith.constant 0 : index
    %39 = vector.load %arg1[%c2_68, %c1_69, %c0_70, %c0_71] : memref<4x9x8x28xf32, #tpu.memory_space<vmem>>, vector<1x8x8x28xf32>
    %40 = vector.shape_cast %39 : vector<1x8x8x28xf32> to vector<8x8x28xf32>
    %c3_72 = arith.constant 3 : index
    %c1_73 = arith.constant 1 : index
    %c0_74 = arith.constant 0 : index
    %c0_75 = arith.constant 0 : index
    %41 = vector.load %arg1[%c3_72, %c1_73, %c0_74, %c0_75] : memref<4x9x8x28xf32, #tpu.memory_space<vmem>>, vector<1x8x8x28xf32>
    %42 = vector.shape_cast %41 : vector<1x8x8x28xf32> to vector<8x8x28xf32>
    %43 = tpu.concatenate %34, %36, %38, %40, %42 in 2 : vector<8x8x28xf32>, vector<8x8x28xf32>, vector<8x8x28xf32>, vector<8x8x28xf32>, vector<8x8x28xf32> -> vector<8x8x140xf32>
    %44 = tpu.concatenate %10, %21, %32, %43 in 0 : vector<8x8x140xf32>, vector<8x8x140xf32>, vector<8x8x140xf32>, vector<8x8x140xf32> -> vector<32x8x140xf32>
    %45 = vector.shape_cast %44 : vector<32x8x140xf32> to vector<256x140xf32>
    %c0_76 = arith.constant 0 : index
    %c0_77 = arith.constant 0 : index
    %c0_78 = arith.constant 0 : index
    %46 = vector.load %arg2[%c0_76, %c0_77, %c0_78] : memref<2x140x120xf32, #tpu.memory_space<vmem>>, vector<1x140x120xf32>
    %47 = vector.shape_cast %46 : vector<1x140x120xf32> to vector<140x120xf32>
    %cst = arith.constant dense<0.000000e+00> : vector<256x120xf32>
    %48 = tpu.matmul %45, %47, %cst {dimension_numbers = #tpu.dot_dimension_numbers<[1], [0], [0], [1], [0, 0, 1, 1], [], []>} : vector<256x140xf32>, vector<140x120xf32>, vector<256x120xf32> -> vector<256x120xf32>
    %c1_79 = arith.constant 1 : index
    %c0_80 = arith.constant 0 : index
    %c0_81 = arith.constant 0 : index
    %49 = vector.load %arg2[%c1_79, %c0_80, %c0_81] : memref<2x140x120xf32, #tpu.memory_space<vmem>>, vector<1x140x120xf32>
    %50 = vector.shape_cast %49 : vector<1x140x120xf32> to vector<140x120xf32>
    %cst_82 = arith.constant dense<0.000000e+00> : vector<256x120xf32>
    %51 = tpu.matmul %45, %50, %cst_82 {dimension_numbers = #tpu.dot_dimension_numbers<[1], [0], [0], [1], [0, 0, 1, 1], [], []>} : vector<256x140xf32>, vector<140x120xf32>, vector<256x120xf32> -> vector<256x120xf32>
    %52 = arith.maximumf %48, %51 : vector<256x120xf32>
    %53 = vector.shape_cast %52 : vector<256x120xf32> to vector<4x64x120xf32>
    %cst_83 = arith.constant 0.000000e+00 : f32
    %54 = vector.broadcast %cst_83 : f32 to vector<2x8x120xf32>
    %55 = vector.extract_strided_slice %53 {offsets = [0, 0, 0], sizes = [1, 64, 120], strides = [1, 1, 1]} : vector<4x64x120xf32> to vector<1x64x120xf32>
    %56 = vector.shape_cast %55 : vector<1x64x120xf32> to vector<64x120xf32>
    %57 = vector.extract_strided_slice %53 {offsets = [1, 0, 0], sizes = [1, 64, 120], strides = [1, 1, 1]} : vector<4x64x120xf32> to vector<1x64x120xf32>
    %58 = vector.shape_cast %57 : vector<1x64x120xf32> to vector<64x120xf32>
    %59 = arith.maximumf %56, %58 : vector<64x120xf32>
    %c0_84 = arith.constant 0 : index
    %c0_85 = arith.constant 0 : index
    %60 = vector.load %arg3[%c0_84, %c0_85] : memref<1x120xf32, #tpu.memory_space<vmem>>, vector<1x120xf32>
    %61 = vector.broadcast %60 : vector<1x120xf32> to vector<64x120xf32>
    %62 = arith.addf %59, %61 : vector<64x120xf32>
    %cst_86 = arith.constant 0.000000e+00 : f32
    %63 = vector.broadcast %cst_86 : f32 to vector<64x120xf32>
    %64 = arith.maximumf %62, %63 : vector<64x120xf32>
    %65 = vector.shape_cast %64 : vector<64x120xf32> to vector<8x8x120xf32>
    %66 = tpu.concatenate %65, %54 in 0 : vector<8x8x120xf32>, vector<2x8x120xf32> -> vector<10x8x120xf32>
    %67 = vector.extract_strided_slice %53 {offsets = [2, 0, 0], sizes = [1, 64, 120], strides = [1, 1, 1]} : vector<4x64x120xf32> to vector<1x64x120xf32>
    %68 = vector.shape_cast %67 : vector<1x64x120xf32> to vector<64x120xf32>
    %69 = vector.extract_strided_slice %53 {offsets = [3, 0, 0], sizes = [1, 64, 120], strides = [1, 1, 1]} : vector<4x64x120xf32> to vector<1x64x120xf32>
    %70 = vector.shape_cast %69 : vector<1x64x120xf32> to vector<64x120xf32>
    %71 = arith.maximumf %68, %70 : vector<64x120xf32>
    %c0_87 = arith.constant 0 : index
    %c0_88 = arith.constant 0 : index
    %72 = vector.load %arg3[%c0_87, %c0_88] : memref<1x120xf32, #tpu.memory_space<vmem>>, vector<1x120xf32>
    %73 = vector.broadcast %72 : vector<1x120xf32> to vector<64x120xf32>
    %74 = arith.addf %71, %73 : vector<64x120xf32>
    %cst_89 = arith.constant 0.000000e+00 : f32
    %75 = vector.broadcast %cst_89 : f32 to vector<64x120xf32>
    %76 = arith.maximumf %74, %75 : vector<64x120xf32>
    %77 = vector.shape_cast %76 : vector<64x120xf32> to vector<8x8x120xf32>
    %78 = tpu.concatenate %77, %54 in 0 : vector<8x8x120xf32>, vector<2x8x120xf32> -> vector<10x8x120xf32>
    %79 = vector.extract_strided_slice %66 {offsets = [0, 0, 0], sizes = [8, 8, 120], strides = [1, 1, 1]} : vector<10x8x120xf32> to vector<8x8x120xf32>
    %80 = vector.extract_strided_slice %78 {offsets = [0, 0, 0], sizes = [8, 8, 120], strides = [1, 1, 1]} : vector<10x8x120xf32> to vector<8x8x120xf32>
    %81 = vector.extract_strided_slice %66 {offsets = [1, 0, 0], sizes = [8, 8, 120], strides = [1, 1, 1]} : vector<10x8x120xf32> to vector<8x8x120xf32>
    %82 = vector.extract_strided_slice %78 {offsets = [1, 0, 0], sizes = [8, 8, 120], strides = [1, 1, 1]} : vector<10x8x120xf32> to vector<8x8x120xf32>
    %83 = vector.extract_strided_slice %66 {offsets = [2, 0, 0], sizes = [8, 8, 120], strides = [1, 1, 1]} : vector<10x8x120xf32> to vector<8x8x120xf32>
    %84 = tpu.concatenate %79, %80, %81, %82, %83 in 2 : vector<8x8x120xf32>, vector<8x8x120xf32>, vector<8x8x120xf32>, vector<8x8x120xf32>, vector<8x8x120xf32> -> vector<8x8x600xf32>
    %85 = vector.extract_strided_slice %78 {offsets = [0, 0, 0], sizes = [8, 8, 120], strides = [1, 1, 1]} : vector<10x8x120xf32> to vector<8x8x120xf32>
    %86 = vector.extract_strided_slice %66 {offsets = [1, 0, 0], sizes = [8, 8, 120], strides = [1, 1, 1]} : vector<10x8x120xf32> to vector<8x8x120xf32>
    %87 = vector.extract_strided_slice %78 {offsets = [1, 0, 0], sizes = [8, 8, 120], strides = [1, 1, 1]} : vector<10x8x120xf32> to vector<8x8x120xf32>
    %88 = vector.extract_strided_slice %66 {offsets = [2, 0, 0], sizes = [8, 8, 120], strides = [1, 1, 1]} : vector<10x8x120xf32> to vector<8x8x120xf32>
    %89 = vector.extract_strided_slice %78 {offsets = [2, 0, 0], sizes = [8, 8, 120], strides = [1, 1, 1]} : vector<10x8x120xf32> to vector<8x8x120xf32>
    %90 = tpu.concatenate %85, %86, %87, %88, %89 in 2 : vector<8x8x120xf32>, vector<8x8x120xf32>, vector<8x8x120xf32>, vector<8x8x120xf32>, vector<8x8x120xf32> -> vector<8x8x600xf32>
    %91 = tpu.concatenate %84, %90 in 0 : vector<8x8x600xf32>, vector<8x8x600xf32> -> vector<16x8x600xf32>
    %92 = vector.shape_cast %91 : vector<16x8x600xf32> to vector<128x600xf32>
    %c0_90 = arith.constant 0 : index
    %c0_91 = arith.constant 0 : index
    %c0_92 = arith.constant 0 : index
    %93 = vector.load %arg4[%c0_90, %c0_91, %c0_92] : memref<2x600x80xf32, #tpu.memory_space<vmem>>, vector<1x600x80xf32>
    %94 = vector.shape_cast %93 : vector<1x600x80xf32> to vector<600x80xf32>
    %cst_93 = arith.constant dense<0.000000e+00> : vector<128x80xf32>
    %95 = tpu.matmul %92, %94, %cst_93 {dimension_numbers = #tpu.dot_dimension_numbers<[1], [0], [0], [1], [0, 0, 1, 1], [], []>} : vector<128x600xf32>, vector<600x80xf32>, vector<128x80xf32> -> vector<128x80xf32>
    %c1_94 = arith.constant 1 : index
    %c0_95 = arith.constant 0 : index
    %c0_96 = arith.constant 0 : index
    %96 = vector.load %arg4[%c1_94, %c0_95, %c0_96] : memref<2x600x80xf32, #tpu.memory_space<vmem>>, vector<1x600x80xf32>
    %97 = vector.shape_cast %96 : vector<1x600x80xf32> to vector<600x80xf32>
    %cst_97 = arith.constant dense<0.000000e+00> : vector<128x80xf32>
    %98 = tpu.matmul %92, %97, %cst_97 {dimension_numbers = #tpu.dot_dimension_numbers<[1], [0], [0], [1], [0, 0, 1, 1], [], []>} : vector<128x600xf32>, vector<600x80xf32>, vector<128x80xf32> -> vector<128x80xf32>
    %99 = arith.maximumf %95, %98 : vector<128x80xf32>
    %100 = vector.shape_cast %99 : vector<128x80xf32> to vector<2x64x80xf32>
    %101 = vector.extract_strided_slice %100 {offsets = [0, 0, 0], sizes = [1, 64, 80], strides = [1, 1, 1]} : vector<2x64x80xf32> to vector<1x64x80xf32>
    %102 = vector.shape_cast %101 : vector<1x64x80xf32> to vector<64x80xf32>
    %103 = vector.extract_strided_slice %100 {offsets = [1, 0, 0], sizes = [1, 64, 80], strides = [1, 1, 1]} : vector<2x64x80xf32> to vector<1x64x80xf32>
    %104 = vector.shape_cast %103 : vector<1x64x80xf32> to vector<64x80xf32>
    %105 = arith.maximumf %102, %104 : vector<64x80xf32>
    %c0_98 = arith.constant 0 : index
    %c0_99 = arith.constant 0 : index
    %106 = vector.load %arg5[%c0_98, %c0_99] : memref<1x80xf32, #tpu.memory_space<vmem>>, vector<1x80xf32>
    %107 = vector.broadcast %106 : vector<1x80xf32> to vector<64x80xf32>
    %108 = arith.addf %105, %107 : vector<64x80xf32>
    %cst_100 = arith.constant 0.000000e+00 : f32
    %109 = vector.broadcast %cst_100 : f32 to vector<64x80xf32>
    %110 = arith.maximumf %108, %109 : vector<64x80xf32>
    %111 = vector.shape_cast %110 : vector<64x80xf32> to vector<8x8x80xf32>
    %112 = vector.extract_strided_slice %111 {offsets = [0, 0, 0], sizes = [1, 8, 80], strides = [1, 1, 1]} : vector<8x8x80xf32> to vector<1x8x80xf32>
    %113 = vector.shape_cast %112 : vector<1x8x80xf32> to vector<8x80xf32>
    %114 = vector.extract_strided_slice %111 {offsets = [1, 0, 0], sizes = [1, 8, 80], strides = [1, 1, 1]} : vector<8x8x80xf32> to vector<1x8x80xf32>
    %115 = vector.shape_cast %114 : vector<1x8x80xf32> to vector<8x80xf32>
    %116 = vector.extract_strided_slice %111 {offsets = [2, 0, 0], sizes = [1, 8, 80], strides = [1, 1, 1]} : vector<8x8x80xf32> to vector<1x8x80xf32>
    %117 = vector.shape_cast %116 : vector<1x8x80xf32> to vector<8x80xf32>
    %118 = vector.extract_strided_slice %111 {offsets = [3, 0, 0], sizes = [1, 8, 80], strides = [1, 1, 1]} : vector<8x8x80xf32> to vector<1x8x80xf32>
    %119 = vector.shape_cast %118 : vector<1x8x80xf32> to vector<8x80xf32>
    %120 = tpu.concatenate %113, %115, %117, %119 in 1 : vector<8x80xf32>, vector<8x80xf32>, vector<8x80xf32>, vector<8x80xf32> -> vector<8x320xf32>
    %c0_101 = arith.constant 0 : index
    %c0_102 = arith.constant 0 : index
    %121 = vector.load %arg6[%c0_101, %c0_102] : memref<320x50xf32, #tpu.memory_space<vmem>>, vector<320x50xf32>
    %cst_103 = arith.constant dense<0.000000e+00> : vector<8x50xf32>
    %122 = tpu.matmul %120, %121, %cst_103 {dimension_numbers = #tpu.dot_dimension_numbers<[1], [0], [0], [1], [0, 0, 1, 1], [], []>} : vector<8x320xf32>, vector<320x50xf32>, vector<8x50xf32> -> vector<8x50xf32>
    %c0_104 = arith.constant 0 : index
    %c0_105 = arith.constant 0 : index
    %123 = vector.load %arg7[%c0_104, %c0_105] : memref<1x50xf32, #tpu.memory_space<vmem>>, vector<1x50xf32>
    %124 = vector.broadcast %123 : vector<1x50xf32> to vector<8x50xf32>
    %125 = arith.addf %122, %124 : vector<8x50xf32>
    %cst_106 = arith.constant 0.000000e+00 : f32
    %126 = vector.broadcast %cst_106 : f32 to vector<8x50xf32>
    %127 = arith.maximumf %125, %126 : vector<8x50xf32>
    %c0_107 = arith.constant 0 : index
    %c0_108 = arith.constant 0 : index
    %128 = vector.load %arg11[%c0_107, %c0_108] : memref<8x50xf32, #tpu.memory_space<vmem>>, vector<8x50xf32>
    tpu.vector_store %arg11[%c0_107, %c0_108], %127 {strides = array<i32>} : memref<8x50xf32, #tpu.memory_space<vmem>>, vector<8x50xf32>,
    %c0_109 = arith.constant 0 : index
    %c0_110 = arith.constant 0 : index
    %129 = vector.load %arg8[%c0_109, %c0_110] : memref<50x2xf32, #tpu.memory_space<vmem>>, vector<50x2xf32>
    %cst_111 = arith.constant dense<0.000000e+00> : vector<8x2xf32>
    %130 = tpu.matmul %127, %129, %cst_111 {dimension_numbers = #tpu.dot_dimension_numbers<[1], [0], [0], [1], [0, 0, 1, 1], [], []>} : vector<8x50xf32>, vector<50x2xf32>, vector<8x2xf32> -> vector<8x2xf32>
    %c0_112 = arith.constant 0 : index
    %c0_113 = arith.constant 0 : index
    %131 = vector.load %arg9[%c0_112, %c0_113] : memref<1x2xf32, #tpu.memory_space<vmem>>, vector<1x2xf32>
    %132 = vector.broadcast %131 : vector<1x2xf32> to vector<8x2xf32>
    %133 = arith.addf %130, %132 : vector<8x2xf32>
    %cst_114 = arith.constant dense<0xFF800000> : vector<8xf32>
    %134 = vector.multi_reduction <maximumf>, %133, %cst_114 [1] : vector<8x2xf32> to vector<8xf32>
    %135 = vector.shape_cast %134 : vector<8xf32> to vector<8x1xf32>
    %136 = vector.broadcast %135 : vector<8x1xf32> to vector<8x2xf32>
    %137 = arith.subf %133, %136 : vector<8x2xf32>
    %138 = math.exp %137 : vector<8x2xf32>
    %cst_115 = arith.constant dense<0.000000e+00> : vector<8xf32>
    %139 = vector.multi_reduction <add>, %138, %cst_115 [1] : vector<8x2xf32> to vector<8xf32>
    %140 = vector.shape_cast %139 : vector<8xf32> to vector<8x1xf32>
    %141 = vector.broadcast %140 : vector<8x1xf32> to vector<8x2xf32>
    %142 = arith.divf %138, %141 : vector<8x2xf32>
    %c0_116 = arith.constant 0 : index
    %c0_117 = arith.constant 0 : index
    %143 = vector.load %arg10[%c0_116, %c0_117] : memref<8x2xf32, #tpu.memory_space<vmem>>, vector<8x2xf32>
    tpu.vector_store %arg10[%c0_116, %c0_117], %142 {strides = array<i32>} : memref<8x2xf32, #tpu.memory_space<vmem>>, vector<8x2xf32>,
    return
  }
  func.func @transform_0(%arg0: i32) -> (i32, i32, i32, i32) {
    %c0_i32 = arith.constant 0 : i32
    %c0_i32_0 = arith.constant 0 : i32
    %c0_i32_1 = arith.constant 0 : i32
    %c0_i32_2 = arith.constant 0 : i32
    return %c0_i32, %c0_i32_0, %arg0, %c0_i32_1 : i32, i32, i32, i32
  }
  func.func @transform_1(%arg0: i32) -> (i32, i32, i32) {
    %c0_i32 = arith.constant 0 : i32
    %c0_i32_0 = arith.constant 0 : i32
    %c0_i32_1 = arith.constant 0 : i32
    %c0_i32_2 = arith.constant 0 : i32
    return %c0_i32, %c0_i32_0, %c0_i32_1 : i32, i32, i32
  }
  func.func @transform_2(%arg0: i32) -> (i32, i32) {
    %c0_i32 = arith.constant 0 : i32
    %c0_i32_0 = arith.constant 0 : i32
    %c0_i32_1 = arith.constant 0 : i32
    return %c0_i32, %c0_i32_0 : i32, i32
  }
  func.func @transform_3(%arg0: i32) -> (i32, i32, i32) {
    %c0_i32 = arith.constant 0 : i32
    %c0_i32_0 = arith.constant 0 : i32
    %c0_i32_1 = arith.constant 0 : i32
    %c0_i32_2 = arith.constant 0 : i32
    return %c0_i32, %c0_i32_0, %c0_i32_1 : i32, i32, i32
  }
  func.func @transform_4(%arg0: i32) -> (i32, i32) {
    %c0_i32 = arith.constant 0 : i32
    %c0_i32_0 = arith.constant 0 : i32
    %c0_i32_1 = arith.constant 0 : i32
    return %c0_i32, %c0_i32_0 : i32, i32
  }
  func.func @transform_5(%arg0: i32) -> (i32, i32) {
    %c0_i32 = arith.constant 0 : i32
    %c0_i32_0 = arith.constant 0 : i32
    %c0_i32_1 = arith.constant 0 : i32
    return %c0_i32, %c0_i32_0 : i32, i32
  }
  func.func @transform_6(%arg0: i32) -> (i32, i32) {
    %c0_i32 = arith.constant 0 : i32
    %c0_i32_0 = arith.constant 0 : i32
    %c0_i32_1 = arith.constant 0 : i32
    return %c0_i32, %c0_i32_0 : i32, i32
  }
  func.func @transform_7(%arg0: i32) -> (i32, i32) {
    %c0_i32 = arith.constant 0 : i32
    %c0_i32_0 = arith.constant 0 : i32
    %c0_i32_1 = arith.constant 0 : i32
    return %c0_i32, %c0_i32_0 : i32, i32
  }
  func.func @transform_8(%arg0: i32) -> (i32, i32) {
    %c0_i32 = arith.constant 0 : i32
    %c0_i32_0 = arith.constant 0 : i32
    %c0_i32_1 = arith.constant 0 : i32
    return %c0_i32, %c0_i32_0 : i32, i32
  }
  func.func @transform_9(%arg0: i32) -> (i32, i32) {
    %c0_i32 = arith.constant 0 : i32
    %c0_i32_0 = arith.constant 0 : i32
    return %arg0, %c0_i32 : i32, i32
  }
  func.func @transform_10(%arg0: i32) -> (i32, i32) {
    %c0_i32 = arith.constant 0 : i32
    %c0_i32_0 = arith.constant 0 : i32
    return %arg0, %c0_i32 : i32, i32
  }
}

</mosaic_0001>

<bundles_post_ra>
// kernel: mnist_classifier_forward.1
= control target key start
LH: loop header
LB: loop body
LE: loop exit
PB: predicated region body
PF: predicated region fallthrough
CT: control target
= control target key end

     0   :  { %v6703_v6 = vmov 0.0|0.0   ;;  %s4398_s25 = smov 84   ;;  %s4399_s26 = smov 28   ;;  %s6690_s0 = inlined_call_operand.vmem [shape: f32[4,9,8,28], index: 0, kind: input, shape index: {}]   ;;  %s6691_s1 = inlined_call_operand.vmem [shape: f32[2,140,120], index: 1, kind: input, shape index: {}]   ;;  %s6692_s2 = inlined_call_operand.vmem [shape: f32[1,120], index: 2, kind: input, shape index: {}]   ;;  %s6693_s3 = inlined_call_operand.vmem [shape: f32[2,600,80], index: 3, kind: input, shape index: {}]   ;;  %s6694_s4 = inlined_call_operand.vmem [shape: f32[1,80], index: 4, kind: input, shape index: {}]   ;;  %s6695_s5 = inlined_call_operand.vmem [shape: f32[320,50], index: 5, kind: input, shape index: {}]   ;;  %s6696_s6 = inlined_call_operand.vmem [shape: f32[1,50], index: 6, kind: input, shape index: {}]   ;;  %s6697_s7 = inlined_call_operand.vmem [shape: f32[50,2], index: 7, kind: input, shape index: {}]   ;;  %s6698_s8 = inlined_call_operand.vmem [shape: f32[1,2], index: 8, kind: input, shape index: {}]   ;;  %s6699_s9 = inlined_call_operand.vmem [shape: f32[8,2], index: 9, kind: output, shape index: {0}]   ;;  %s6700_s10 = inlined_call_operand.hbm [shape: f32[8,50], index: 10, kind: output, shape index: {1}]  }
   0x1   :  { %v2953_v0 = vld [vmem:[%s6690_s0 + $0xd8] sm:$0xff]  ;;  %v4472_v1 = vld [vmem:[%s6690_s0 + $0xe0] sm:$0xff]  ;;  %v4477_v2 = vld [vmem:[%s6690_s0 + $0x48] sm:$0xff]  ;;  %3745 = vmatprep.subr.bf16.mxu0 %v6703_v6  ;;  %3773 = vmatprep.subr.bf16.mxu1 %v6703_v6  ;;  %s4400_s13 = smov 112   ;;  %s4401_s14 = smov 56  }
   0x2   :  { %v4480_v3 = vpack.i.bf16 %v4472_v1, %v2953_v0  ;;  %v4485_v4 = vld [vmem:[%s6690_s0 + $0x50] sm:$0xff]  ;;  %v4499_v8 = vld [vmem:[%s6690_s0 + $0x98] sm:$0xff]  ;;  %v4507_v9 = vld [vmem:[%s6690_s0 + $0x8] sm:$0xff] }
   0x3   :  { %v4490_v5 = vld [vmem:[%s6690_s0 + $0x90] sm:$0xff]  ;;  %v4036_v7 = vpack.i.bf16 %v4485_v4, %v4477_v2  ;;  %v4516_v11 = vld [vmem:[%s6690_s0 + $0x58] sm:$0xff]  ;;  %v4521_v12 = vld [vmem:[%s6690_s0 + $0x60] sm:$0xff] }
   0x4   :  { %4047 = vrot.lane.b32.xlu1 %v4480_v3, %s4398_s25  ;;  %v4511_v10 = vpack.i.bf16 %v4499_v8, %v4490_v5  ;;  %v4051_v13 = vpack.i.bf16 %v4521_v12, %v4516_v11  ;;  %v4532_v14 = vld [vmem:[%s6690_s0 + $0xe8] sm:$0xff]  ;;  %v4537_v15 = vld [vmem:[%s6690_s0 + $0xf0] sm:$0xff]  ;;  %v4547_v17 = vld [vmem:[%s6690_s0 + $0xa0] sm:$0xff] }
   0x5   :  { %4037 = vrot.lane.b32.xlu0 %v4036_v7, %s4399_s26  ;;  %v4542_v16 = vld [vmem:[%s6690_s0 + $0x10] sm:$0xff]  ;;  %v4552_v18 = vld [vmem:[%s6690_s0 + $0xa8] sm:$0xff]  ;;  %v4557_v19 = vpack.i.bf16 %v4537_v15, %v4532_v14  ;;  %v678_v20 = vld [vmem:[%s6691_s1] sm:$0xff] }
   0x6   :  { %v679_v21 = vld [vmem:[%s6691_s1 + $0x8] sm:$0xff]  ;;  %v3026_v22 = vld [vmem:[%s6691_s1 + $0x90] sm:$0xff]  ;;  %v4572_v23 = vpack.i.bf16 %v4552_v18, %v4547_v17  ;;  %v3027_v25 = vld [vmem:[%s6691_s1 + $0x98] sm:$0xff] }
   0x7   :  { %v3746_v24 = vpack.c.bf16 %v679_v21, %v678_v20  ;;  %v680_v26 = vld [vmem:[%s6691_s1 + $0x10] sm:$0xff]  ;;  %v681_v27 = vld [vmem:[%s6691_s1 + $0x18] sm:$0xff]  ;;  %v3774_v28 = vpack.c.bf16 %v3027_v25, %v3026_v22  ;;  %v3028_v29 = vld [vmem:[%s6691_s1 + $0xa0] sm:$0xff] }
   0x8   :  { %183 = vrot.lane.b32.xlu1 %v4507_v9, %s4400_s13  ;;  %v3029_v30 = vld [vmem:[%s6691_s1 + $0xa8] sm:$0xff]  ;;  %v4592_v31 = vld [vmem:[%s6690_s0 + $0x20] sm:$0xff]  ;;  %v3749_v32 = vpack.c.bf16 %v681_v27, %v680_v26  ;;  %v4599_v33 = vld [vmem:[%s6690_s0 + $0xb0] sm:$0xff] }
   0x9   :  { %4042 = vrot.lane.b32.xlu0 %v4511_v10, %s4401_s14  ;;  %3747 = vmatpush1.bf16.msra.mxu0 %v3746_v24  ;;  %v3777_v34 = vpack.c.bf16 %v3029_v30, %v3028_v29  ;;  %v682_v35 = vld [vmem:[%s6691_s1 + $0x20] sm:$0xff]  ;;  %v683_v36 = vld [vmem:[%s6691_s1 + $0x28] sm:$0xff]  ;;  %v4612_v37 = vld [vmem:[%s6690_s0 + $0xb8] sm:$0xff] }
   0xa   :  { %3775 = vmatpush1.bf16.msra.mxu1 %v3774_v28  ;;  %3748 = vmatprep.subr.bf16.mxu0 %v6703_v6  ;;  %v3030_v38 = vld [vmem:[%s6691_s1 + $0xb0] sm:$0xff]  ;;  %v3031_v39 = vld [vmem:[%s6691_s1 + $0xb8] sm:$0xff]  ;;  %v4629_v41 = vld [vmem:[%s6690_s0 + $0x68] sm:$0xff]  ;;  %v3752_v43 = vpack.c.bf16 %v683_v36, %v682_v35  ;;  %v4641_v44 = vpack.i.bf16 %v4612_v37, %v4599_v33 }
   0xb   :  { %v4624_v40 = vld [vmem:[%s6690_s0 + $0x18] sm:$0xff]  ;;  %v4634_v42 = vld [vmem:[%s6690_s0 + $0x70] sm:$0xff]  ;;  %3776 = vmatprep.subr.bf16.mxu1 %v6703_v6  ;;  %v3780_v45 = vpack.c.bf16 %v3031_v39, %v3030_v38  ;;  %v3032_v49 = vld [vmem:[%s6691_s1 + $0xc0] sm:$0xff] }
   0xc   :  { %4052 = vrot.lane.b32.xlu1 %v4051_v13, %s4399_s26  ;;  %v684_v46 = vld [vmem:[%s6691_s1 + $0x30] sm:$0xff]  ;;  %v685_v47 = vld [vmem:[%s6691_s1 + $0x38] sm:$0xff]  ;;  %v4066_v48 = vpack.i.bf16 %v4634_v42, %v4629_v41  ;;  %v3033_v50 = vld [vmem:[%s6691_s1 + $0xc8] sm:$0xff] }
   0xd   :  { %185 = vrot.lane.b32.xlu0 %v4542_v16, %s4400_s13  ;;  %3750 = vmatpush1.bf16.msra.mxu0 %v3749_v32  ;;  %v4663_v51 = vld [vmem:[%s6690_s0 + $0xf8] sm:$0xff]  ;;  %v4668_v52 = vld [vmem:[%s6690_s0 + $0x100] sm:$0xff]  ;;  %v4674_v53 = vld [vmem:[%s6690_s0 + $0x28] sm:$0xff]  ;;  %v3755_v55 = vpack.c.bf16 %v685_v47, %v684_v46  ;;  %v3783_v57 = vpack.c.bf16 %v3033_v50, %v3032_v49 }
   0xe   :  { %3778 = vmatpush1.bf16.msra.mxu1 %v3777_v34  ;;  %3751 = vmatprep.subr.bf16.mxu0 %v6703_v6  ;;  %v4679_v54 = vld [vmem:[%s6690_s0 + $0x78] sm:$0xff]  ;;  %v4686_v56 = vld [vmem:[%s6690_s0 + $0x80] sm:$0xff]  ;;  %v687_v59 = vld [vmem:[%s6691_s1 + $0x48] sm:$0xff]  ;;  %v4697_v60 = vpack.i.bf16 %v4668_v52, %v4663_v51 }
   0xf   :  { %3779 = vmatprep.subr.bf16.mxu1 %v6703_v6  ;;  %v686_v58 = vld [vmem:[%s6691_s1 + $0x40] sm:$0xff]  ;;  %v3034_v61 = vld [vmem:[%s6691_s1 + $0xd0] sm:$0xff]  ;;  %v3035_v62 = vld [vmem:[%s6691_s1 + $0xd8] sm:$0xff] }
  0x10   :  { %4062 = vrot.lane.b32.xlu1 %v4557_v19, %s4398_s25 }
  0x11   :  { %4057 = vrot.lane.b32.xlu0 %v4572_v23, %s4401_s14  ;;  %3753 = vmatpush1.bf16.msra.mxu0 %v3752_v43 }
  0x12   :  { %3781 = vmatpush1.bf16.msra.mxu1 %v3780_v45  ;;  %3754 = vmatprep.subr.bf16.mxu0 %v6703_v6 }
  0x14   :  { %189 = vrot.lane.b32.xlu1 %v4592_v31, %s4400_s13 }
  0x15   :  { %187 = vrot.lane.b32.xlu0 %v4624_v40, %s4400_s13 }
  0x18   :  { %4072 = vrot.lane.b32.xlu1 %v4641_v44, %s4401_s14 }
  0x19   :  { %4067 = vrot.lane.b32.xlu0 %v4066_v48, %s4399_s26 }
  0x1a   :  { %16 = vsyncpa [#allocation3], 0  ;;  %3782 = vmatprep.subr.bf16.mxu1 %v6703_v6  ;;  %3756 = vmatpush1.bf16.msra.mxu0 %v3755_v55  ;;  %v3758_v63 = vpack.c.bf16 %v687_v59, %v686_v58  ;;  %v4081_v0 = vpack.i.bf16 %v4686_v56, %v4679_v54  ;;  %v4714_v7 = vld [vmem:[%s6690_s0 + $0x108] sm:$0xff]  ;;  %v3786_v13 = vpack.c.bf16 %v3035_v62, %v3034_v61  ;;  %v688_v20 = vld [vmem:[%s6691_s1 + $0x50] sm:$0xff]  ;;  %vm761_vm0 = vcmask 1043456   ;;  %s4403_s15 = smov 96  }
  0x1b   :  { %3784 = vmatpush1.bf16.msra.mxu1 %v3783_v57  ;;  %v689_v21 = vld [vmem:[%s6691_s1 + $0x58] sm:$0xff]  ;;  %v4727_v22 = vld [vmem:[%s6690_s0 + $0x110] sm:$0xff]  ;;  %3757 = vmatprep.subr.bf16.mxu0 %v6703_v6  ;;  %v3036_v24 = vld [vmem:[%s6691_s1 + $0xe0] sm:$0xff]  ;;  %vm4402_vm1 = vmmov 1   ;;  %vm696_vm3 = vcmask 97280   ;;  %vm207_vm4 = vcmask 228352  }
  0x1c   :  { %191 = vrot.lane.b32.xlu1 %v4674_v53, %s4400_s13  ;;  %v3037_v25 = vld [vmem:[%s6691_s1 + $0xe8] sm:$0xff]  ;;  %v4739_v26 = vld [vmem:[%s6690_s0 + $0x30] sm:$0xff]  ;;  %v4744_v27 = vld [vmem:[%s6690_s0 + $0xc0] sm:$0xff]  ;;  %3785 = vmatprep.subr.bf16.mxu1 %v6703_v6  ;;  %v3761_v29 = vpack.c.bf16 %v689_v21, %v688_v20  ;;  %v4755_v30 = vpack.i.bf16 %v4727_v22, %v4714_v7  ;;  %v4823_v20 = vpack.i.bf16 %v4542_v16, %v4507_v9  ;;  %vm216_vm5 = vcmask 457728   ;;  %s4404_s28 = smov 120   ;;  %s4405_s30 = smov 104  }
  0x1d   :  { %4077 = vrot.lane.b32.xlu0 %v4697_v60, %s4398_s25  ;;  %v4749_v28 = vld [vmem:[%s6690_s0 + $0xc8] sm:$0xff]  ;;  %v3789_v32 = vpack.c.bf16 %v3037_v25, %v3036_v24  ;;  %v690_v34 = vld [vmem:[%s6691_s1 + $0x60] sm:$0xff]  ;;  %v3038_v38 = vld [vmem:[%s6691_s1 + $0xf0] sm:$0xff]  ;;  %v4166_v24 = vpack.i.bf16 %v4516_v11, %v4485_v4  ;;  %v4891_v25 = vpack.i.bf16 %v4629_v41, %v4521_v12  ;;  %vm225_vm6 = vcmask 687104  }
  0x1e   :  { %3759 = vmatpush1.bf16.msra.mxu0 %v3758_v63  ;;  %v691_v35 = vld [vmem:[%s6691_s1 + $0x68] sm:$0xff]  ;;  %v4086_v36 = vpack.i.bf16 %v4749_v28, %v4744_v27  ;;  %v3039_v39 = vld [vmem:[%s6691_s1 + $0xf8] sm:$0xff]  ;;  %v692_v46 = vld [vmem:[%s6691_s1 + $0x70] sm:$0xff]  ;;  %vm234_vm7 = vcmask 916480   ;;  %vm1433_vm8 = vcmask 982016   ;;  %vm1459_vm9 = vcmask 785408  }
  0x1f   :  { %3787 = vmatpush1.bf16.msra.mxu1 %v3786_v13  ;;  %3760 = vmatprep.subr.bf16.mxu0 %v6703_v6  ;;  %v3764_v43 = vpack.c.bf16 %v691_v35, %v690_v34  ;;  %v3792_v45 = vpack.c.bf16 %v3039_v39, %v3038_v38  ;;  %v693_v47 = vld [vmem:[%s6691_s1 + $0x78] sm:$0xff]  ;;  %v2968_v48 = vld [vmem:[%s6690_s0 + $0x40] sm:$0xff]  ;;  %v3041_v50 = vld [vmem:[%s6691_s1 + $0x108] sm:$0xff]  ;;  %vm1450_vm10 = vcmask 850944   ;;  %vm1653_vm11 = vcmask 719872  }
  0x20   :  { %4082 = vrot.lane.b32.xlu1 %v4081_v0, %s4399_s26  ;;  %3788 = vmatprep.subr.bf16.mxu1 %v6703_v6  ;;  %v3040_v49 = vld [vmem:[%s6691_s1 + $0x100] sm:$0xff]  ;;  %v4797_v55 = vld [vmem:[%s6690_s0 + $0x38] sm:$0xff]  ;;  %v3767_v57 = vpack.c.bf16 %v693_v47, %v692_v46  ;;  %v695_v61 = vld [vmem:[%s6691_s1 + $0x88] sm:$0xf]  ;;  %vm4407_vm12 = vmmov 0   ;;  %vm2619_vm13 = vcmask 261120  }
  0x21   :  { %193 = vrot.lane.b32.xlu0 %v4739_v26, %s4400_s13  ;;  %v3795_v58 = vpack.c.bf16 %v3041_v50, %v3040_v49  ;;  %v694_v59 = vld [vmem:[%s6691_s1 + $0x80] sm:$0xff]  ;;  %v3042_v62 = vld [vmem:[%s6691_s1 + $0x110] sm:$0xff]  ;;  %v3043_v63 = vld [vmem:[%s6691_s1 + $0x118] sm:$0xf]  ;;  %v4861_v21 = vpack.i.bf16 %v2968_v48, %v4797_v55  ;;  %vm2669_vm14 = vcmask 523264   ;;  %vm2617_vm15 = vcmask 654336  }
  0x22   :  { %3762 = vmatpush1.bf16.msra.mxu0 %v3761_v29  ;;  %v3770_v0 = vpack.c.bf16 %v695_v61, %v694_v59  ;;  %vm3771_vm2 = vmpackc.low %vm761_vm0, %vm4402_vm1  ;;  %v3798_v13 = vpack.c.bf16 %v3043_v63, %v3042_v62  ;;  %v35_v35 = vld [vmem:[%s6690_s0] sm:$0xff]  ;;  %vm2832_vm0 = vcmask 1041408   ;;  %vm2813_vm1 = vcmask 408576  }
  0x23   :  { %3790 = vmatpush1.bf16.msra.mxu1 %v3789_v32  ;;  %3763 = vmatprep.subr.bf16.mxu0 %v6703_v6 }
  0x24   :  { %4092 = vrot.lane.b32.xlu1 %v4755_v30, %s4398_s25  ;;  %3791 = vmatprep.subr.bf16.mxu1 %v6703_v6 }
  0x25   :  { %4087 = vrot.lane.b32.xlu0 %v4086_v36, %s4401_s14 }
  0x26   :  { %3765 = vmatpush1.bf16.msra.mxu0 %v3764_v43 }
  0x27   :  { %3793 = vmatpush1.bf16.msra.mxu1 %v3792_v45  ;;  %3766 = vmatprep.subr.bf16.mxu0 %v6703_v6  ;;  %v4226_v45 = vpack.i.bf16 %v4547_v17, %v4499_v8 }
  0x28   :  { %197 = vrot.lane.b32.xlu1 %v2968_v48, %s4400_s13  ;;  %3794 = vmatprep.subr.bf16.mxu1 %v6703_v6 }
  0x29   :  { %195 = vrot.lane.b32.xlu0 %v4797_v55, %s4400_s13 }
  0x2a   :  { %3768 = vmatpush1.bf16.msra.mxu0 %v3767_v57 }
  0x2b   :  { %3796 = vmatpush1.bf16.msra.mxu1 %v3795_v58  ;;  %3769 = vmatprep.subr.bf16.mxu0 %v6703_v6 }
  0x2c   :  { %4102 = vrot.lane.b32.xlu1 %v4480_v3, %s4401_s14  ;;  %3797 = vmatprep.subr.bf16.mxu1 %v6703_v6 }
  0x2d   :  { %4097 = vrot.lane.b32.xlu0 %v4511_v10, %s4399_s26  ;;  %v4835_v10 = vpack.i.bf16 %v4592_v31, %v4624_v40 }
  0x2e   :  { %3772 = vmatpush1.bf16.msk.msra.mxu0 %vm3771_vm2, %v3770_v0 }
  0x2f   :  { %3800 = vmatpush1.bf16.msk.msra.mxu1 %vm3771_vm2, %v3798_v13  ;;  %vm2906_vm2 = vcmask 15360  }
  0x30   :  { %332 = vrot.lane.b32.xlu1 %v4485_v4, %s4400_s13 }
  0x31   :  { %4107 = vrot.lane.b32.xlu0 %v4823_v20, %s4398_s25 }
  0x34   :  { %4112 = vrot.lane.b32.xlu1 %v4572_v23, %s4399_s26  ;;  %v4853_v23 = vpack.i.bf16 %v4739_v26, %v4674_v53 }
  0x35   :  { %334 = vrot.lane.b32.xlu0 %v4516_v11, %s4400_s13 }
  0x38   :  { %4122 = vrot.lane.b32.xlu1 %v4835_v10, %s4398_s25 }
  0x39   :  { %4117 = vrot.lane.b32.xlu0 %v4557_v19, %s4401_s14 }
  0x3c   :  { %338 = vrot.lane.b32.xlu1 %v4629_v41, %s4400_s13 }
  0x3d   :  { %336 = vrot.lane.b32.xlu0 %v4521_v12, %s4400_s13 }
  0x40   :  { %4132 = vrot.lane.b32.xlu1 %v4697_v60, %s4401_s14 }
  0x41   :  { %4127 = vrot.lane.b32.xlu0 %v4641_v44, %s4399_s26  ;;  %v4872_v44 = vld [vmem:[%s6690_s0 + $0x88] sm:$0xff] }
  0x44   :  { %340 = vrot.lane.b32.xlu1 %v4634_v42, %s4400_s13 }
  0x45   :  { %4137 = vrot.lane.b32.xlu0 %v4853_v23, %s4398_s25 }
  0x48   :  { %4142 = vrot.lane.b32.xlu1 %v4086_v36, %s4399_s26 }
  0x49   :  { %342 = vrot.lane.b32.xlu0 %v4679_v54, %s4400_s13 }
  0x4c   :  { %4152 = vrot.lane.b32.xlu1 %v4861_v21, %s4398_s25 }
  0x4d   :  { %4147 = vrot.lane.b32.xlu0 %v4755_v30, %s4401_s14 }
  0x50   :  { %346 = vrot.lane.b32.xlu1 %v4872_v44, %s4400_s13 }
  0x51   :  { %344 = vrot.lane.b32.xlu0 %v4686_v56, %s4400_s13 }
  0x54   :  { %4162 = vrot.lane.b32.xlu1 %v4823_v20, %s4401_s14 }
  0x55   :  { %4157 = vrot.lane.b32.xlu0 %v4480_v3, %s4399_s26  ;;  %v4909_v3 = vpack.i.bf16 %v4679_v54, %v4634_v42 }
  0x58   :  { %477 = vrot.lane.b32.xlu1 %v4499_v8, %s4400_s13 }
  0x59   :  { %4167 = vrot.lane.b32.xlu0 %v4166_v24, %s4398_s25 }
  0x5c   :  { %4172 = vrot.lane.b32.xlu1 %v4557_v19, %s4399_s26  ;;  %v4211_v19 = vpack.i.bf16 %v4872_v44, %v4686_v56 }
  0x5d   :  { %479 = vrot.lane.b32.xlu0 %v4547_v17, %s4400_s13 }
  0x60   :  { %4182 = vrot.lane.b32.xlu1 %v4891_v25, %s4398_s25 }
  0x61   :  { %4177 = vrot.lane.b32.xlu0 %v4835_v10, %s4401_s14 }
  0x64   :  { %483 = vrot.lane.b32.xlu1 %v4599_v33, %s4400_s13 }
  0x65   :  { %481 = vrot.lane.b32.xlu0 %v4552_v18, %s4400_s13 }
  0x68   :  { %4192 = vrot.lane.b32.xlu1 %v4853_v23, %s4401_s14 }
  0x69   :  { %4187 = vrot.lane.b32.xlu0 %v4697_v60, %s4399_s26  ;;  %v4927_v60 = vld [vmem:[%s6690_s0 + $0xd0] sm:$0xff] }
  0x6c   :  { %485 = vrot.lane.b32.xlu1 %v4612_v37, %s4400_s13 }
  0x6d   :  { %4197 = vrot.lane.b32.xlu0 %v4909_v3, %s4398_s25 }
  0x70   :  { %4202 = vrot.lane.b32.xlu1 %v4755_v30, %s4399_s26 }
  0x71   :  { %487 = vrot.lane.b32.xlu0 %v4744_v27, %s4400_s13 }
  0x74   :  { %4212 = vrot.lane.b32.xlu1 %v4211_v19, %s4398_s25 }
  0x75   :  { %4207 = vrot.lane.b32.xlu0 %v4861_v21, %s4401_s14 }
  0x76   :  { %v4048_v29 = vpop.permute.xlu1 %4047 }
  0x77   :  { %v4038_v32 = vpop.permute.xlu0 %4037  ;;  %v4049_v46 = vunpack.i.l.bf16 %v4048_v29  ;;  %v4050_v58 = vunpack.i.h.bf16 %v4048_v29 }
  0x78   :  { %491 = vrot.lane.b32.xlu1 %v4927_v60, %s4400_s13  ;;  %v4040_v30 = vunpack.i.h.bf16 %v4038_v32  ;;  %v4039_v34 = vunpack.i.l.bf16 %v4038_v32 }
  0x79   :  { %489 = vrot.lane.b32.xlu0 %v4749_v28, %s4400_s13 }
  0x7a   :  { %v184_v36 = vpop.permute.xlu1 %183  ;;  %v208_v47 = vsel %vm207_vm4, %v35_v35, %v4039_v34  ;;  %v209_v48 = vsel %vm207_vm4, %v4507_v9, %v4040_v30  ;;  %v4241_v34 = vpack.i.bf16 %v4599_v33, %v4552_v18 }
  0x7b   :  { %v4043_v38 = vpop.permute.xlu0 %4042  ;;  %2994 = vmatprep.mubr.msk.f32.mxu0 %vm696_vm3, %v184_v36  ;;  %3045 = vmatprep.mubr.msk.f32.mxu1 %vm696_vm3, %v184_v36 }
  0x7c   :  { %v4045_v39 = vunpack.i.h.bf16 %v4043_v38  ;;  %v4044_v43 = vunpack.i.l.bf16 %v4043_v38  ;;  %4222 = vrot.lane.b32.xlu1 %v4166_v24, %s4401_s14 }
  0x7d   :  { %4217 = vrot.lane.b32.xlu0 %v4823_v20, %s4399_s26 }
  0x7e   :  { %v4053_v49 = vpop.permute.xlu1 %4052  ;;  %v217_v50 = vsel %vm216_vm5, %v208_v47, %v4044_v43  ;;  %v218_v57 = vsel %vm216_vm5, %v209_v48, %v4045_v39 }
  0x7f   :  { %v4054_v59 = vunpack.i.l.bf16 %v4053_v49  ;;  %v186_v61 = vpop.permute.xlu0 %185  ;;  %v226_v62 = vsel %vm225_vm6, %v217_v50, %v4049_v46  ;;  %v4055_v63 = vunpack.i.h.bf16 %v4053_v49  ;;  %v227_v9 = vsel %vm225_vm6, %v218_v57, %v4050_v58 }
  0x80   :  { %622 = vrot.lane.b32.xlu1 %v4472_v1, %s4400_s13  ;;  %v235_v0 = vsel %vm234_vm7, %v226_v62, %v184_v36  ;;  %v236_v30 = vsel %vm234_vm7, %v227_v9, %v186_v61 }
  0x81   :  { %4227 = vrot.lane.b32.xlu0 %v4226_v45, %s4398_s25  ;;  %830 = vmatmul.mubr.f32.vlgmr.msra.gmra.mrb[0].mxu0 %v235_v0  ;;  %v210_v20 = vsel %vm207_vm4, %v4542_v16, %v4054_v59  ;;  %v211_v1 = vsel %vm207_vm4, %v4624_v40, %v4055_v63 }
  0x82   :  { %1077 = vmatmul.mubr.f32.vlgmr.msra.gmra.mrb[0].mxu1 %v235_v0  ;;  %2995 = vmatprep.mubr.msk.f32.mxu0 %vm696_vm3, %v186_v61  ;;  %v4063_v13 = vpop.permute.xlu1 %4062 }
  0x83   :  { %3046 = vmatprep.mubr.msk.f32.mxu1 %vm696_vm3, %v186_v61  ;;  %v4064_v24 = vunpack.i.l.bf16 %v4063_v13  ;;  %v4058_v19 = vpop.permute.xlu0 %4057  ;;  %v4065_v16 = vunpack.i.h.bf16 %v4063_v13 }
  0x84   :  { %v4060_v29 = vunpack.i.h.bf16 %v4058_v19  ;;  %v4059_v32 = vunpack.i.l.bf16 %v4058_v19  ;;  %4232 = vrot.lane.b32.xlu1 %v4835_v10, %s4399_s26 }
  0x85   :  { %624 = vrot.lane.b32.xlu0 %v4532_v14, %s4400_s13  ;;  %835 = vmatmul.mubr.f32.gmra.mrb[2].mxu0 %v236_v30 }
  0x86   :  { %1082 = vmatmul.mubr.f32.gmra.mrb[2].mxu1 %v236_v30  ;;  %v190_v35 = vpop.permute.xlu1 %189  ;;  %v219_v36 = vsel %vm216_vm5, %v210_v20, %v4059_v32  ;;  %v220_v39 = vsel %vm216_vm5, %v211_v1, %v4060_v29 }
  0x87   :  { %v188_v40 = vpop.permute.xlu0 %187  ;;  %v228_v38 = vsel %vm225_vm6, %v219_v36, %v4064_v24  ;;  %v229_v43 = vsel %vm225_vm6, %v220_v39, %v4065_v16 }
  0x88   :  { %2996 = vmatprep.mubr.msk.f32.mxu0 %vm696_vm3, %v188_v40  ;;  %3047 = vmatprep.mubr.msk.f32.mxu1 %vm696_vm3, %v188_v40  ;;  %v237_v10 = vsel %vm234_vm7, %v228_v38, %v188_v40 }
  0x89   :  { %4242 = vrot.lane.b32.xlu1 %v4241_v34, %s4398_s25  ;;  %4237 = vrot.lane.b32.xlu0 %v4891_v25, %s4401_s14  ;;  %v238_v25 = vsel %vm234_vm7, %v229_v43, %v190_v35 }
  0x8a   :  { %840 = vmatmul.mubr.f32.gmra.mrb[4].mxu0 %v237_v10  ;;  %1087 = vmatmul.mubr.f32.gmra.mrb[4].mxu1 %v237_v10  ;;  %v4073_v14 = vpop.permute.xlu1 %4072 }
  0x8b   :  { %v4068_v45 = vpop.permute.xlu0 %4067  ;;  %2997 = vmatprep.mubr.msk.f32.mxu0 %vm696_vm3, %v190_v35  ;;  %3048 = vmatprep.mubr.msk.f32.mxu1 %vm696_vm3, %v190_v35  ;;  %v4074_v48 = vunpack.i.l.bf16 %v4073_v14  ;;  %v4075_v57 = vunpack.i.h.bf16 %v4073_v14 }
  0x8c   :  { %v4070_v46 = vunpack.i.h.bf16 %v4068_v45  ;;  %v4069_v47 = vunpack.i.l.bf16 %v4068_v45 }
  0x8d   :  { %628 = vrot.lane.b32.xlu1 %v4663_v51, %s4400_s13  ;;  %626 = vrot.lane.b32.xlu0 %v4537_v15, %s4400_s13  ;;  %v4256_v15 = vpack.i.bf16 %v4744_v27, %v4612_v37 }
  0x8e   :  { %v212_v49 = vsel %vm207_vm4, %v4592_v31, %v4069_v47  ;;  %845 = vmatmul.mubr.f32.gmra.mrb[6].mxu0 %v238_v25  ;;  %1092 = vmatmul.mubr.f32.gmra.mrb[6].mxu1 %v238_v25  ;;  %v192_v50 = vpop.permute.xlu1 %191  ;;  %v213_v51 = vsel %vm207_vm4, %v4674_v53, %v4070_v46  ;;  %v2992_v47 = vld [vmem:[%s6690_s0 + $0x118] sm:$0xff] }
  0x8f   :  { %v4078_v58 = vpop.permute.xlu0 %4077  ;;  %2998 = vmatprep.mubr.msk.f32.mxu0 %vm696_vm3, %v192_v50  ;;  %3049 = vmatprep.mubr.msk.f32.mxu1 %vm696_vm3, %v192_v50  ;;  %v221_v31 = vsel %vm216_vm5, %v212_v49, %v4074_v48  ;;  %v222_v13 = vsel %vm216_vm5, %v213_v51, %v4075_v57 }
  0x90   :  { %v4080_v59 = vunpack.i.h.bf16 %v4078_v58  ;;  %v4079_v61 = vunpack.i.l.bf16 %v4078_v58 }
  0x91   :  { %4252 = vrot.lane.b32.xlu1 %v4909_v3, %s4401_s14  ;;  %4247 = vrot.lane.b32.xlu0 %v4853_v23, %s4399_s26 }
  0x92   :  { %v4083_v62 = vpop.permute.xlu1 %4082  ;;  %v230_v63 = vsel %vm225_vm6, %v221_v31, %v4079_v61  ;;  %v231_v24 = vsel %vm225_vm6, %v222_v13, %v4080_v59 }
  0x93   :  { %v4084_v0 = vunpack.i.l.bf16 %v4083_v62  ;;  %v194_v9 = vpop.permute.xlu0 %193  ;;  %v239_v53 = vsel %vm234_vm7, %v230_v63, %v192_v50  ;;  %v4085_v20 = vunpack.i.h.bf16 %v4083_v62 }
  0x94   :  { %850 = vmatmul.mubr.f32.gmra.mrb[8].mxu0 %v239_v53  ;;  %1097 = vmatmul.mubr.f32.gmra.mrb[8].mxu1 %v239_v53  ;;  %v240_v29 = vsel %vm234_vm7, %v231_v24, %v194_v9 }
  0x95   :  { %630 = vrot.lane.b32.xlu1 %v4668_v52, %s4400_s13  ;;  %4257 = vrot.lane.b32.xlu0 %v4256_v15, %s4398_s25  ;;  %v214_v3 = vsel %vm207_vm4, %v4739_v26, %v4084_v0  ;;  %v215_v32 = vsel %vm207_vm4, %v4797_v55, %v4085_v20 }
  0x96   :  { %2999 = vmatprep.mubr.msk.f32.mxu0 %vm696_vm3, %v194_v9  ;;  %3050 = vmatprep.mubr.msk.f32.mxu1 %vm696_vm3, %v194_v9  ;;  %v4093_v23 = vpop.permute.xlu1 %4092 }
  0x97   :  { %v4094_v19 = vunpack.i.l.bf16 %v4093_v23  ;;  %v4088_v1 = vpop.permute.xlu0 %4087  ;;  %v4095_v52 = vunpack.i.h.bf16 %v4093_v23 }
  0x98   :  { %v4090_v30 = vunpack.i.h.bf16 %v4088_v1  ;;  %v4089_v34 = vunpack.i.l.bf16 %v4088_v1  ;;  %855 = vmatmul.mubr.f32.gmra.mrb[10].mxu0 %v240_v29  ;;  %1102 = vmatmul.mubr.f32.gmra.mrb[10].mxu1 %v240_v29 }
  0x99   :  { %4262 = vrot.lane.b32.xlu1 %v4861_v21, %s4399_s26  ;;  %632 = vrot.lane.b32.xlu0 %v4714_v7, %s4400_s13 }
  0x9a   :  { %v198_v16 = vpop.permute.xlu1 %197  ;;  %v223_v26 = vsel %vm216_vm5, %v214_v3, %v4089_v34  ;;  %v224_v40 = vsel %vm216_vm5, %v215_v32, %v4090_v30 }
  0x9b   :  { %v196_v35 = vpop.permute.xlu0 %195  ;;  %v232_v36 = vsel %vm225_vm6, %v223_v26, %v4094_v19  ;;  %v233_v21 = vsel %vm225_vm6, %v224_v40, %v4095_v52 }
  0x9c   :  { %3000 = vmatprep.mubr.msk.f32.mxu0 %vm696_vm3, %v196_v35  ;;  %3051 = vmatprep.mubr.msk.f32.mxu1 %vm696_vm3, %v196_v35  ;;  %v241_v55 = vsel %vm234_vm7, %v232_v36, %v196_v35  ;;  %v242_v43 = vsel %vm234_vm7, %v233_v21, %v198_v16 }
  0x9d   :  { %602 = vrot.lane.b32.xlu1 %v4749_v28, %s4398_s25  ;;  %578 = vrot.lane.b32.xlu0 %v4686_v56, %s4401_s14 }
  0x9e   :  { %860 = vmatmul.mubr.f32.gmra.mrb[12].mxu0 %v241_v55  ;;  %1107 = vmatmul.mubr.f32.gmra.mrb[12].mxu1 %v241_v55  ;;  %v4103_v7 = vpop.permute.xlu1 %4102 }
  0x9f   :  { %v4098_v38 = vpop.permute.xlu0 %4097  ;;  %3001 = vmatprep.mubr.msk.f32.mxu0 %vm696_vm3, %v198_v16  ;;  %3052 = vmatprep.mubr.msk.f32.mxu1 %vm696_vm3, %v198_v16  ;;  %v4104_v14 = vunpack.i.l.bf16 %v4103_v7  ;;  %v4105_v48 = vunpack.i.h.bf16 %v4103_v7 }
  0xa0   :  { %v4100_v39 = vunpack.i.h.bf16 %v4098_v38  ;;  %v4099_v10 = vunpack.i.l.bf16 %v4098_v38 }
  0xa1   :  { %580 = vrot.lane.b32.xlu1 %v4872_v44, %s4401_s14  ;;  %634 = vrot.lane.b32.xlu0 %v4727_v22, %s4400_s13 }
  0xa2   :  { %v356_v45 = vsel %vm207_vm4, %v4477_v2, %v4099_v10  ;;  %865 = vmatmul.mubr.f32.gmra.mrb[14].mxu0 %v242_v43  ;;  %1112 = vmatmul.mubr.f32.gmra.mrb[14].mxu1 %v242_v43  ;;  %v333_v46 = vpop.permute.xlu1 %332  ;;  %v357_v22 = vsel %vm207_vm4, %v4485_v4, %v4100_v39 }
  0xa3   :  { %v4108_v25 = vpop.permute.xlu0 %4107  ;;  %3002 = vmatprep.mubr.msk.f32.mxu0 %vm696_vm3, %v333_v46  ;;  %3053 = vmatprep.mubr.msk.f32.mxu1 %vm696_vm3, %v333_v46  ;;  %v364_v2 = vsel %vm216_vm5, %v356_v45, %v4104_v14  ;;  %v365_v15 = vsel %vm216_vm5, %v357_v22, %v4105_v48 }
  0xa4   :  { %v4110_v44 = vunpack.i.h.bf16 %v4108_v25  ;;  %v4109_v49 = vunpack.i.l.bf16 %v4108_v25 }
  0xa5   :  { %604 = vrot.lane.b32.xlu0 %v4927_v60, %s4398_s25  ;;  %636 = vrot.lane.b32.xlu1 %v2992_v47, %s4400_s13 }
  0xa6   :  { %v4113_v50 = vpop.permute.xlu1 %4112  ;;  %v372_v57 = vsel %vm225_vm6, %v364_v2, %v4109_v49  ;;  %v373_v4 = vsel %vm225_vm6, %v365_v15, %v4110_v44 }
  0xa7   :  { %v4115_v58 = vunpack.i.h.bf16 %v4113_v50  ;;  %v4114_v51 = vunpack.i.l.bf16 %v4113_v50  ;;  %v335_v59 = vpop.permute.xlu0 %334  ;;  %v380_v61 = vsel %vm234_vm7, %v372_v57, %v333_v46 }
  0xa8   :  { %870 = vmatmul.mubr.f32.gmra.mrb[16].mxu0 %v380_v61  ;;  %1117 = vmatmul.mubr.f32.gmra.mrb[16].mxu1 %v380_v61  ;;  %v381_v9 = vsel %vm234_vm7, %v373_v4, %v335_v59 }
  0xa9   :  { %3003 = vmatprep.mubr.msk.f32.mxu0 %vm696_vm3, %v335_v59  ;;  %3054 = vmatprep.mubr.msk.f32.mxu1 %vm696_vm3, %v335_v59  ;;  %v359_v31 = vsel %vm207_vm4, %v4521_v12, %v4115_v58  ;;  %v358_v62 = vsel %vm207_vm4, %v4516_v11, %v4114_v51 }
  0xaa   :  { %v4123_v60 = vpop.permute.xlu1 %4122 }
  0xab   :  { %v4124_v63 = vunpack.i.l.bf16 %v4123_v60  ;;  %v4118_v0 = vpop.permute.xlu0 %4117  ;;  %v4125_v20 = vunpack.i.h.bf16 %v4123_v60 }
  0xac   :  { %v4120_v53 = vunpack.i.h.bf16 %v4118_v0  ;;  %v4119_v13 = vunpack.i.l.bf16 %v4118_v0  ;;  %875 = vmatmul.mubr.f32.gmra.mrb[18].mxu0 %v381_v9  ;;  %1122 = vmatmul.mubr.f32.gmra.mrb[18].mxu1 %v381_v9 }
  0xae   :  { %v339_v24 = vpop.permute.xlu1 %338  ;;  %v366_v23 = vsel %vm216_vm5, %v358_v62, %v4119_v13  ;;  %v367_v3 = vsel %vm216_vm5, %v359_v31, %v4120_v53 }
  0xaf   :  { %v337_v19 = vpop.permute.xlu0 %336  ;;  %v374_v12 = vsel %vm225_vm6, %v366_v23, %v4124_v63  ;;  %v375_v1 = vsel %vm225_vm6, %v367_v3, %v4125_v20 }
  0xb0   :  { %3004 = vmatprep.mubr.msk.f32.mxu0 %vm696_vm3, %v337_v19  ;;  %3055 = vmatprep.mubr.msk.f32.mxu1 %vm696_vm3, %v337_v19  ;;  %v382_v11 = vsel %vm234_vm7, %v374_v12, %v337_v19  ;;  %v383_v52 = vsel %vm234_vm7, %v375_v1, %v339_v24 }
  0xb1   :  { %880 = vmatmul.mubr.f32.gmra.mrb[20].mxu0 %v382_v11  ;;  %1127 = vmatmul.mubr.f32.gmra.mrb[20].mxu1 %v382_v11 }
  0xb2   :  { %v4133_v29 = vpop.permute.xlu1 %4132  ;;  %3005 = vmatprep.mubr.msk.f32.mxu0 %vm696_vm3, %v339_v24  ;;  %3056 = vmatprep.mubr.msk.f32.mxu1 %vm696_vm3, %v339_v24 }
  0xb3   :  { %v4128_v32 = vpop.permute.xlu0 %4127  ;;  %v4134_v16 = vunpack.i.l.bf16 %v4133_v29  ;;  %v4135_v36 = vunpack.i.h.bf16 %v4133_v29 }
  0xb4   :  { %v4130_v30 = vunpack.i.h.bf16 %v4128_v32  ;;  %v4129_v34 = vunpack.i.l.bf16 %v4128_v32 }
  0xb5   :  { %885 = vmatmul.mubr.f32.gmra.mrb[22].mxu0 %v383_v52  ;;  %1132 = vmatmul.mubr.f32.gmra.mrb[22].mxu1 %v383_v52 }
  0xb6   :  { %v360_v26 = vsel %vm207_vm4, %v4629_v41, %v4129_v34  ;;  %v341_v35 = vpop.permute.xlu1 %340  ;;  %v361_v55 = vsel %vm207_vm4, %v4634_v42, %v4130_v30 }
  0xb7   :  { %v4138_v40 = vpop.permute.xlu0 %4137  ;;  %3006 = vmatprep.mubr.msk.f32.mxu0 %vm696_vm3, %v341_v35  ;;  %3057 = vmatprep.mubr.msk.f32.mxu1 %vm696_vm3, %v341_v35  ;;  %v368_v38 = vsel %vm216_vm5, %v360_v26, %v4134_v16  ;;  %v369_v46 = vsel %vm216_vm5, %v361_v55, %v4135_v36 }
  0xb8   :  { %v4140_v7 = vunpack.i.h.bf16 %v4138_v40  ;;  %v4139_v21 = vunpack.i.l.bf16 %v4138_v40 }
  0xba   :  { %v4143_v39 = vpop.permute.xlu1 %4142  ;;  %v376_v10 = vsel %vm225_vm6, %v368_v38, %v4139_v21  ;;  %v377_v47 = vsel %vm225_vm6, %v369_v46, %v4140_v7 }
  0xbb   :  { %v4145_v14 = vunpack.i.h.bf16 %v4143_v39  ;;  %v4144_v43 = vunpack.i.l.bf16 %v4143_v39  ;;  %v343_v41 = vpop.permute.xlu0 %342  ;;  %v384_v45 = vsel %vm234_vm7, %v376_v10, %v341_v35 }
  0xbc   :  { %890 = vmatmul.mubr.f32.gmra.mrb[24].mxu0 %v384_v45  ;;  %1137 = vmatmul.mubr.f32.gmra.mrb[24].mxu1 %v384_v45  ;;  %v385_v49 = vsel %vm234_vm7, %v377_v47, %v343_v41 }
  0xbd   :  { %3007 = vmatprep.mubr.msk.f32.mxu0 %vm696_vm3, %v343_v41  ;;  %3058 = vmatprep.mubr.msk.f32.mxu1 %vm696_vm3, %v343_v41  ;;  %v363_v48 = vsel %vm207_vm4, %v4686_v56, %v4145_v14  ;;  %v362_v25 = vsel %vm207_vm4, %v4679_v54, %v4144_v43 }
  0xbe   :  { %v4153_v42 = vpop.permute.xlu1 %4152 }
  0xbf   :  { %v4154_v22 = vunpack.i.l.bf16 %v4153_v42  ;;  %v4148_v44 = vpop.permute.xlu0 %4147  ;;  %v4155_v57 = vunpack.i.h.bf16 %v4153_v42 }
  0xc0   :  { %v4150_v2 = vunpack.i.h.bf16 %v4148_v44  ;;  %v4149_v50 = vunpack.i.l.bf16 %v4148_v44  ;;  %895 = vmatmul.mubr.f32.gmra.mrb[26].mxu0 %v385_v49  ;;  %1142 = vmatmul.mubr.f32.gmra.mrb[26].mxu1 %v385_v49 }
  0xc2   :  { %v347_v58 = vpop.permute.xlu1 %346  ;;  %v370_v51 = vsel %vm216_vm5, %v362_v25, %v4149_v50  ;;  %v371_v59 = vsel %vm216_vm5, %v363_v48, %v4150_v2 }
  0xc3   :  { %v345_v61 = vpop.permute.xlu0 %344  ;;  %v378_v56 = vsel %vm225_vm6, %v370_v51, %v4154_v22  ;;  %v379_v15 = vsel %vm225_vm6, %v371_v59, %v4155_v57 }
  0xc4   :  { %3008 = vmatprep.mubr.msk.f32.mxu0 %vm696_vm3, %v345_v61  ;;  %3059 = vmatprep.mubr.msk.f32.mxu1 %vm696_vm3, %v345_v61  ;;  %v386_v54 = vsel %vm234_vm7, %v378_v56, %v345_v61  ;;  %v387_v63 = vsel %vm234_vm7, %v379_v15, %v347_v58 }
  0xc5   :  { %900 = vmatmul.mubr.f32.gmra.mrb[28].mxu0 %v386_v54  ;;  %1147 = vmatmul.mubr.f32.gmra.mrb[28].mxu1 %v386_v54 }
  0xc6   :  { %v4163_v4 = vpop.permute.xlu1 %4162  ;;  %3009 = vmatprep.mubr.msk.f32.mxu0 %vm696_vm3, %v347_v58  ;;  %3060 = vmatprep.mubr.msk.f32.mxu1 %vm696_vm3, %v347_v58 }
  0xc7   :  { %v4158_v60 = vpop.permute.xlu0 %4157  ;;  %v4164_v0 = vunpack.i.l.bf16 %v4163_v4  ;;  %v4165_v13 = vunpack.i.h.bf16 %v4163_v4 }
  0xc8   :  { %v4160_v31 = vunpack.i.h.bf16 %v4158_v60  ;;  %v4159_v62 = vunpack.i.l.bf16 %v4158_v60 }
  0xc9   :  { %905 = vmatmul.mubr.f32.gmra.mrb[30].mxu0 %v387_v63  ;;  %1152 = vmatmul.mubr.f32.gmra.mrb[30].mxu1 %v387_v63 }
  0xca   :  { %v501_v9 = vsel %vm207_vm4, %v4490_v5, %v4159_v62  ;;  %v478_v53 = vpop.permute.xlu1 %477  ;;  %v502_v24 = vsel %vm207_vm4, %v4499_v8, %v4160_v31 }
  0xcb   :  { %v4168_v20 = vpop.permute.xlu0 %4167  ;;  %3010 = vmatprep.mubr.msk.f32.mxu0 %vm696_vm3, %v478_v53  ;;  %3061 = vmatprep.mubr.msk.f32.mxu1 %vm696_vm3, %v478_v53  ;;  %v509_v19 = vsel %vm216_vm5, %v501_v9, %v4164_v0  ;;  %v510_v30 = vsel %vm216_vm5, %v502_v24, %v4165_v13 }
  0xcc   :  { %v4170_v23 = vunpack.i.h.bf16 %v4168_v20  ;;  %v4169_v3 = vunpack.i.l.bf16 %v4168_v20 }
  0xce   :  { %v4173_v12 = vpop.permute.xlu1 %4172  ;;  %v517_v11 = vsel %vm225_vm6, %v509_v19, %v4169_v3  ;;  %v518_v34 = vsel %vm225_vm6, %v510_v30, %v4170_v23 }
  0xcf   :  { %v4175_v1 = vunpack.i.h.bf16 %v4173_v12  ;;  %v4174_v29 = vunpack.i.l.bf16 %v4173_v12  ;;  %v480_v5 = vpop.permute.xlu0 %479  ;;  %v525_v32 = vsel %vm234_vm7, %v517_v11, %v478_v53 }
  0xd0   :  { %910 = vmatmul.mubr.f32.gmra.mrb[32].mxu0 %v525_v32  ;;  %1157 = vmatmul.mubr.f32.gmra.mrb[32].mxu1 %v525_v32  ;;  %v526_v36 = vsel %vm234_vm7, %v518_v34, %v480_v5  ;;  %v4365_v32 = vld [vmem:[%s6690_s0 + $0xd8] sm:$0xff] }
  0xd1   :  { %3011 = vmatprep.mubr.msk.f32.mxu0 %vm696_vm3, %v480_v5  ;;  %3062 = vmatprep.mubr.msk.f32.mxu1 %vm696_vm3, %v480_v5  ;;  %v504_v52 = vsel %vm207_vm4, %v4552_v18, %v4175_v1  ;;  %v503_v16 = vsel %vm207_vm4, %v4547_v17, %v4174_v29 }
  0xd2   :  { %v4183_v8 = vpop.permute.xlu1 %4182 }
  0xd3   :  { %v4184_v26 = vunpack.i.l.bf16 %v4183_v8  ;;  %v4178_v35 = vpop.permute.xlu0 %4177  ;;  %v4185_v7 = vunpack.i.h.bf16 %v4183_v8 }
  0xd4   :  { %v4180_v40 = vunpack.i.h.bf16 %v4178_v35  ;;  %v4179_v55 = vunpack.i.l.bf16 %v4178_v35  ;;  %915 = vmatmul.mubr.f32.gmra.mrb[34].mxu0 %v526_v36  ;;  %1162 = vmatmul.mubr.f32.gmra.mrb[34].mxu1 %v526_v36 }
  0xd6   :  { %v484_v21 = vpop.permute.xlu1 %483  ;;  %v511_v38 = vsel %vm216_vm5, %v503_v16, %v4179_v55  ;;  %v512_v39 = vsel %vm216_vm5, %v504_v52, %v4180_v40  ;;  %v4366_v16 = vld [vmem:[%s6690_s0 + $0xe0] sm:$0xff] }
  0xd7   :  { %v482_v10 = vpop.permute.xlu0 %481  ;;  %v519_v18 = vsel %vm225_vm6, %v511_v38, %v4184_v26  ;;  %v520_v14 = vsel %vm225_vm6, %v512_v39, %v4185_v7 }
  0xd8   :  { %3012 = vmatprep.mubr.msk.f32.mxu0 %vm696_vm3, %v482_v10  ;;  %3063 = vmatprep.mubr.msk.f32.mxu1 %vm696_vm3, %v482_v10  ;;  %v527_v17 = vsel %vm234_vm7, %v519_v18, %v482_v10  ;;  %v528_v47 = vsel %vm234_vm7, %v520_v14, %v484_v21  ;;  %v4367_v14 = vld [vmem:[%s6690_s0 + $0xf0] sm:$0xff] }
  0xd9   :  { %920 = vmatmul.mubr.f32.gmra.mrb[36].mxu0 %v527_v17  ;;  %1167 = vmatmul.mubr.f32.gmra.mrb[36].mxu1 %v527_v17 }
  0xda   :  { %v4193_v43 = vpop.permute.xlu1 %4192  ;;  %3013 = vmatprep.mubr.msk.f32.mxu0 %vm696_vm3, %v484_v21  ;;  %3064 = vmatprep.mubr.msk.f32.mxu1 %vm696_vm3, %v484_v21 }
  0xdb   :  { %v4188_v41 = vpop.permute.xlu0 %4187  ;;  %v4194_v42 = vunpack.i.l.bf16 %v4193_v43  ;;  %v4195_v22 = vunpack.i.h.bf16 %v4193_v43 }
  0xdc   :  { %v4190_v45 = vunpack.i.h.bf16 %v4188_v41  ;;  %v4189_v46 = vunpack.i.l.bf16 %v4188_v41  ;;  %v4368_v41 = vld [vmem:[%s6690_s0 + $0xe8] sm:$0xff] }
  0xdd   :  { %925 = vmatmul.mubr.f32.gmra.mrb[38].mxu0 %v528_v47  ;;  %1172 = vmatmul.mubr.f32.gmra.mrb[38].mxu1 %v528_v47 }
  0xde   :  { %v505_v48 = vsel %vm207_vm4, %v4599_v33, %v4189_v46  ;;  %v486_v25 = vpop.permute.xlu1 %485  ;;  %v506_v49 = vsel %vm207_vm4, %v4612_v37, %v4190_v45 }
  0xdf   :  { %v4198_v44 = vpop.permute.xlu0 %4197  ;;  %3014 = vmatprep.mubr.msk.f32.mxu0 %vm696_vm3, %v486_v25  ;;  %3065 = vmatprep.mubr.msk.f32.mxu1 %vm696_vm3, %v486_v25  ;;  %v513_v57 = vsel %vm216_vm5, %v505_v48, %v4194_v42  ;;  %v514_v54 = vsel %vm216_vm5, %v506_v49, %v4195_v22 }
  0xe0   :  { %v4200_v2 = vunpack.i.h.bf16 %v4198_v44  ;;  %v4199_v50 = vunpack.i.l.bf16 %v4198_v44 }
  0xe2   :  { %v4203_v58 = vpop.permute.xlu1 %4202  ;;  %v521_v51 = vsel %vm225_vm6, %v513_v57, %v4199_v50  ;;  %v522_v15 = vsel %vm225_vm6, %v514_v54, %v4200_v2 }
  0xe3   :  { %v4205_v59 = vunpack.i.h.bf16 %v4203_v58  ;;  %v4204_v61 = vunpack.i.l.bf16 %v4203_v58  ;;  %v488_v33 = vpop.permute.xlu0 %487  ;;  %v529_v56 = vsel %vm234_vm7, %v521_v51, %v486_v25 }
  0xe4   :  { %930 = vmatmul.mubr.f32.gmra.mrb[40].mxu0 %v529_v56  ;;  %1177 = vmatmul.mubr.f32.gmra.mrb[40].mxu1 %v529_v56  ;;  %v530_v63 = vsel %vm234_vm7, %v522_v15, %v488_v33 }
  0xe5   :  { %3015 = vmatprep.mubr.msk.f32.mxu0 %vm696_vm3, %v488_v33  ;;  %3066 = vmatprep.mubr.msk.f32.mxu1 %vm696_vm3, %v488_v33  ;;  %v508_v4 = vsel %vm207_vm4, %v4749_v28, %v4205_v59  ;;  %v507_v60 = vsel %vm207_vm4, %v4744_v27, %v4204_v61 }
  0xe6   :  { %v4213_v37 = vpop.permute.xlu1 %4212 }
  0xe7   :  { %v4214_v31 = vunpack.i.l.bf16 %v4213_v37  ;;  %v4208_v62 = vpop.permute.xlu0 %4207  ;;  %v4215_v53 = vunpack.i.h.bf16 %v4213_v37 }
  0xe8   :  { %v4210_v0 = vunpack.i.h.bf16 %v4208_v62  ;;  %v4209_v9 = vunpack.i.l.bf16 %v4208_v62  ;;  %935 = vmatmul.mubr.f32.gmra.mrb[42].mxu0 %v530_v63  ;;  %1182 = vmatmul.mubr.f32.gmra.mrb[42].mxu1 %v530_v63 }
  0xea   :  { %v492_v13 = vpop.permute.xlu1 %491  ;;  %v515_v20 = vsel %vm216_vm5, %v507_v60, %v4209_v9  ;;  %v516_v24 = vsel %vm216_vm5, %v508_v4, %v4210_v0  ;;  %v4369_v4 = vld [vmem:[%s6690_s0 + $0xf8] sm:$0xff]  ;;  %v4370_v0 = vld [vmem:[%s6690_s0 + $0x100] sm:$0xff] }
  0xeb   :  { %v490_v23 = vpop.permute.xlu0 %489  ;;  %v523_v28 = vsel %vm225_vm6, %v515_v20, %v4214_v31  ;;  %v524_v3 = vsel %vm225_vm6, %v516_v24, %v4215_v53 }
  0xec   :  { %3016 = vmatprep.mubr.msk.f32.mxu0 %vm696_vm3, %v490_v23  ;;  %3067 = vmatprep.mubr.msk.f32.mxu1 %vm696_vm3, %v490_v23  ;;  %v531_v27 = vsel %vm234_vm7, %v523_v28, %v490_v23  ;;  %v532_v29 = vsel %vm234_vm7, %v524_v3, %v492_v13 }
  0xed   :  { %940 = vmatmul.mubr.f32.gmra.mrb[44].mxu0 %v531_v27  ;;  %1187 = vmatmul.mubr.f32.gmra.mrb[44].mxu1 %v531_v27 }
  0xee   :  { %v4223_v19 = vpop.permute.xlu1 %4222  ;;  %3017 = vmatprep.mubr.msk.f32.mxu0 %vm696_vm3, %v492_v13  ;;  %3068 = vmatprep.mubr.msk.f32.mxu1 %vm696_vm3, %v492_v13 }
  0xef   :  { %v4218_v12 = vpop.permute.xlu0 %4217  ;;  %v4224_v5 = vunpack.i.l.bf16 %v4223_v19  ;;  %v4225_v8 = vunpack.i.h.bf16 %v4223_v19 }
  0xf0   :  { %v4220_v11 = vunpack.i.h.bf16 %v4218_v12  ;;  %v4219_v1 = vunpack.i.l.bf16 %v4218_v12 }
  0xf1   :  { %945 = vmatmul.mubr.f32.gmra.mrb[46].mxu0 %v532_v29  ;;  %1192 = vmatmul.mubr.f32.gmra.mrb[46].mxu1 %v532_v29 }
  0xf2   :  { %v646_v30 = vsel %vm207_vm4, %v4365_v32, %v4219_v1  ;;  %v623_v34 = vpop.permute.xlu1 %622  ;;  %v647_v26 = vsel %vm207_vm4, %v4366_v16, %v4220_v11  ;;  %v4371_v11 = vld [vmem:[%s6690_s0 + $0x108] sm:$0xff] }
  0xf3   :  { %v4228_v52 = vpop.permute.xlu0 %4227  ;;  %3018 = vmatprep.mubr.msk.f32.mxu0 %vm696_vm3, %v623_v34  ;;  %3069 = vmatprep.mubr.msk.f32.mxu1 %vm696_vm3, %v623_v34  ;;  %v654_v40 = vsel %vm216_vm5, %v646_v30, %v4224_v5  ;;  %v655_v18 = vsel %vm216_vm5, %v647_v26, %v4225_v8 }
  0xf4   :  { %v4230_v35 = vunpack.i.h.bf16 %v4228_v52  ;;  %v4229_v36 = vunpack.i.l.bf16 %v4228_v52 }
  0xf6   :  { %v4233_v55 = vpop.permute.xlu1 %4232  ;;  %v662_v7 = vsel %vm225_vm6, %v654_v40, %v4229_v36  ;;  %v663_v17 = vsel %vm225_vm6, %v655_v18, %v4230_v35  ;;  %v4372_v35 = vld [vmem:[%s6690_s0 + $0x110] sm:$0xff] }
  0xf7   :  { %v4235_v21 = vunpack.i.h.bf16 %v4233_v55  ;;  %v4234_v38 = vunpack.i.l.bf16 %v4233_v55  ;;  %v625_v39 = vpop.permute.xlu0 %624  ;;  %v670_v10 = vsel %vm234_vm7, %v662_v7, %v623_v34 }
  0xf8   :  { %950 = vmatmul.mubr.f32.gmra.mrb[48].mxu0 %v670_v10  ;;  %1197 = vmatmul.mubr.f32.gmra.mrb[48].mxu1 %v670_v10  ;;  %v671_v42 = vsel %vm234_vm7, %v663_v17, %v625_v39 }
  0xf9   :  { %3019 = vmatprep.mubr.msk.f32.mxu0 %vm696_vm3, %v625_v39  ;;  %3070 = vmatprep.mubr.msk.f32.mxu1 %vm696_vm3, %v625_v39  ;;  %v649_v43 = vsel %vm207_vm4, %v4367_v14, %v4235_v21  ;;  %v648_v45 = vsel %vm207_vm4, %v4368_v41, %v4234_v38 }
  0xfb   :  { %v4243_v46 = vpop.permute.xlu1 %4242  ;;  %v4238_v47 = vpop.permute.xlu0 %4237 }
  0xfc   :  { %v4244_v48 = vunpack.i.l.bf16 %v4243_v46  ;;  %v4240_v25 = vunpack.i.h.bf16 %v4238_v47  ;;  %v4239_v22 = vunpack.i.l.bf16 %v4238_v47  ;;  %955 = vmatmul.mubr.f32.gmra.mrb[50].mxu0 %v671_v42  ;;  %1202 = vmatmul.mubr.f32.gmra.mrb[50].mxu1 %v671_v42  ;;  %v4245_v44 = vunpack.i.h.bf16 %v4243_v46 }
  0xfe   :  { %v656_v49 = vsel %vm216_vm5, %v648_v45, %v4239_v22  ;;  %v657_v2 = vsel %vm216_vm5, %v649_v43, %v4240_v25 }
  0xff   :  { %v629_v50 = vpop.permute.xlu1 %628  ;;  %v627_v57 = vpop.permute.xlu0 %626  ;;  %v664_v58 = vsel %vm225_vm6, %v656_v49, %v4244_v48  ;;  %v665_v59 = vsel %vm225_vm6, %v657_v2, %v4245_v44  ;;  %v1626_v49 = vld [vmem:[%s6693_s3 + $0x180] sm:$0xff]  ;;  %v1627_v2 = vld [vmem:[%s6693_s3 + $0x188] sm:$0xff] }
 0x100   :  { %3020 = vmatprep.mubr.msk.f32.mxu0 %vm696_vm3, %v627_v57  ;;  %3071 = vmatprep.mubr.msk.f32.mxu1 %vm696_vm3, %v627_v57  ;;  %v672_v51 = vsel %vm234_vm7, %v664_v58, %v627_v57  ;;  %v673_v15 = vsel %vm234_vm7, %v665_v59, %v629_v50  ;;  %v3833_v57 = vpack.c.bf16 %v1627_v2, %v1626_v49  ;;  %v1611_v58 = vld [vmem:[%s6693_s3 + $0x108] sm:$0xff] }
 0x101   :  { %960 = vmatmul.mubr.f32.gmra.mrb[52].mxu0 %v672_v51  ;;  %1207 = vmatmul.mubr.f32.gmra.mrb[52].mxu1 %v672_v51 }
 0x102   :  { %3021 = vmatprep.mubr.msk.f32.mxu0 %vm696_vm3, %v629_v50  ;;  %3072 = vmatprep.mubr.msk.f32.mxu1 %vm696_vm3, %v629_v50  ;;  %v1610_v50 = vld [vmem:[%s6693_s3 + $0x100] sm:$0xff] }
 0x103   :  { %v4253_v61 = vpop.permute.xlu1 %4252  ;;  %v4248_v33 = vpop.permute.xlu0 %4247  ;;  %3834 = vmatprep.subr.bf16.mxu1 %v3833_v57 }
 0x104   :  { %v4250_v56 = vunpack.i.h.bf16 %v4248_v33  ;;  %v4249_v54 = vunpack.i.l.bf16 %v4248_v33  ;;  %v4254_v37 = vunpack.i.l.bf16 %v4253_v61  ;;  %v4255_v31 = vunpack.i.h.bf16 %v4253_v61 }
 0x105   :  { %965 = vmatmul.mubr.f32.gmra.mrb[54].mxu0 %v673_v15  ;;  %1212 = vmatmul.mubr.f32.gmra.mrb[54].mxu1 %v673_v15  ;;  %v3835_v61 = vpack.c.bf16 %v1611_v58, %v1610_v50  ;;  %v1594_v15 = vld [vmem:[%s6693_s3 + $0x80] sm:$0xff]  ;;  %v1615_v58 = vld [vmem:[%s6693_s3 + $0x128] sm:$0xff] }
 0x106   :  { %v650_v60 = vsel %vm207_vm4, %v4369_v4, %v4249_v54  ;;  %v651_v9 = vsel %vm207_vm4, %v4370_v0, %v4250_v56  ;;  %v1578_v4 = vld [vmem:[%s6693_s3] sm:$0xff] }
 0x107   :  { %v631_v62 = vpop.permute.xlu1 %630  ;;  %v4258_v63 = vpop.permute.xlu0 %4257  ;;  %v658_v20 = vsel %vm216_vm5, %v650_v60, %v4254_v37  ;;  %v659_v3 = vsel %vm216_vm5, %v651_v9, %v4255_v31  ;;  %3836 = vmatpush3.bf16.msra.mxu1 %v3835_v61  ;;  %v1595_v37 = vld [vmem:[%s6693_s3 + $0x88] sm:$0xff] }
 0x108   :  { %v4260_v53 = vunpack.i.h.bf16 %v4258_v63  ;;  %v4259_v13 = vunpack.i.l.bf16 %v4258_v63  ;;  %3022 = vmatprep.mubr.msk.f32.mxu0 %vm696_vm3, %v631_v62  ;;  %3073 = vmatprep.mubr.msk.f32.mxu1 %vm696_vm3, %v631_v62  ;;  %v1579_v63 = vld [vmem:[%s6693_s3 + $0x8] sm:$0xff] }
 0x10a   :  { %v666_v24 = vsel %vm225_vm6, %v658_v20, %v4259_v13  ;;  %v667_v12 = vsel %vm225_vm6, %v659_v3, %v4260_v53  ;;  %v3803_v13 = vpack.c.bf16 %v1579_v63, %v1578_v4  ;;  %v1628_v3 = vld [vmem:[%s6693_s3 + $0x190] sm:$0xff]  ;;  %v1599_v4 = vld [vmem:[%s6693_s3 + $0xa8] sm:$0xff] }
 0x10b   :  { %v4263_v23 = vpop.permute.xlu1 %4262  ;;  %v633_v28 = vpop.permute.xlu0 %632  ;;  %v674_v27 = vsel %vm234_vm7, %v666_v24, %v631_v62  ;;  %v3801_v62 = vpack.c.bf16 %v1595_v37, %v1594_v15  ;;  %v1598_v37 = vld [vmem:[%s6693_s3 + $0xa0] sm:$0xff] }
 0x10c   :  { %v4264_v19 = vunpack.i.l.bf16 %v4263_v23  ;;  %970 = vmatmul.mubr.f32.gmra.mrb[56].mxu0 %v674_v27  ;;  %1217 = vmatmul.mubr.f32.gmra.mrb[56].mxu1 %v674_v27  ;;  %v675_v32 = vsel %vm234_vm7, %v667_v12, %v633_v28  ;;  %v4265_v34 = vunpack.i.h.bf16 %v4263_v23 }
 0x10d   :  { %3023 = vmatprep.mubr.msk.f32.mxu0 %vm696_vm3, %v633_v28  ;;  %3074 = vmatprep.mubr.msk.f32.mxu1 %vm696_vm3, %v633_v28 }
 0x10e   :  { %v652_v1 = vsel %vm207_vm4, %v4371_v11, %v4264_v19  ;;  %v653_v36 = vsel %vm207_vm4, %v4372_v35, %v4265_v34  ;;  %3802 = vmatprep.subr.bf16.mxu0 %v3801_v62  ;;  %v1629_v19 = vld [vmem:[%s6693_s3 + $0x198] sm:$0xff] }
 0x10f   :  { %v603_v29 = vpop.permute.xlu1 %602  ;;  %v579_v5 = vpop.permute.xlu0 %578  ;;  %3804 = vmatpush3.bf16.msra.mxu0 %v3803_v13  ;;  %v3837_v12 = vpack.c.bf16 %v1629_v19, %v1628_v3  ;;  %v1613_v34 = vld [vmem:[%s6693_s3 + $0x118] sm:$0xff] }
 0x110   :  { %v660_v30 = vsel %vm216_vm5, %v652_v1, %v579_v5  ;;  %975 = vmatmul.mubr.f32.gmra.mrb[58].mxu0 %v675_v32  ;;  %1222 = vmatmul.mubr.f32.gmra.mrb[58].mxu1 %v675_v32  ;;  %v1597_v35 = vld [vmem:[%s6693_s3 + $0x98] sm:$0xff] }
 0x111   :  { %v668_v16 = vsel %vm225_vm6, %v660_v30, %v603_v29  ;;  %3838 = vmatprep.subr.bf16.mxu1 %v3837_v12  ;;  %v1612_v30 = vld [vmem:[%s6693_s3 + $0x110] sm:$0xff] }
 0x113   :  { %v581_v8 = vpop.permute.xlu1 %580  ;;  %v635_v52 = vpop.permute.xlu0 %634 }
 0x114   :  { %3024 = vmatprep.mubr.msk.f32.mxu0 %vm696_vm3, %v635_v52  ;;  %3075 = vmatprep.mubr.msk.f32.mxu1 %vm696_vm3, %v635_v52  ;;  %v676_v26 = vsel %vm234_vm7, %v668_v16, %v635_v52  ;;  %v661_v40 = vsel %vm216_vm5, %v653_v36, %v581_v8  ;;  %v1596_v8 = vld [vmem:[%s6693_s3 + $0x90] sm:$0xff] }
 0x115   :  { %980 = vmatmul.mubr.f32.gmra.mrb[60].mxu0 %v676_v26  ;;  %1227 = vmatmul.mubr.f32.gmra.mrb[60].mxu1 %v676_v26  ;;  %v3839_v26 = vpack.c.bf16 %v1613_v34, %v1612_v30  ;;  %v1580_v36 = vld [vmem:[%s6693_s3 + $0x10] sm:$0xff] }
 0x117   :  { %v605_v55 = vpop.permute.xlu0 %604  ;;  %v637_v7 = vpop.permute.xlu1 %636  ;;  %3840 = vmatpush3.bf16.msra.mxu1 %v3839_v26 }
 0x118   :  { %v669_v21 = vsel %vm225_vm6, %v661_v40, %v605_v55  ;;  %3025 = vmatprep.mubr.msk.f32.mxu0 %vm696_vm3, %v637_v7  ;;  %3076 = vmatprep.mubr.msk.f32.mxu1 %vm696_vm3, %v637_v7  ;;  %v1581_v40 = vld [vmem:[%s6693_s3 + $0x18] sm:$0xff] }
 0x119   :  { %v677_v38 = vsel %vm234_vm7, %v669_v21, %v637_v7 }
 0x11a   :  { %985 = vmatmul.mubr.f32.gmra.mrb[62].mxu0 %v677_v38  ;;  %1232 = vmatmul.mubr.f32.gmra.mrb[62].mxu1 %v677_v38  ;;  %v3805_v38 = vpack.c.bf16 %v1597_v35, %v1596_v8 }
 0x11c   :  { %3806 = vmatprep.subr.bf16.mxu0 %v3805_v38 }
 0x154   :  { %v5223_v39 = vpop.f32.mrb[0].mxu0 }
 0x155   :  { %v5225_v10 = vpop.f32.mrb[0].mxu1  ;;  %v833_v18 = vpop.f32.mrb[1].mxu0 }
 0x156   :  { %v1237_v17 = vmax.f32 %v5223_v39, %v5225_v10  ;;  %v1080_v14 = vpop.f32.mrb[1].mxu1  ;;  %v3807_v18 = vpack.c.bf16 %v1581_v40, %v1580_v36  ;;  %v1582_v10 = vld [vmem:[%s6693_s3 + $0x20] sm:$0xff] }
 0x158   :  { %v5229_v43 = vpop.f32.mrb[2].mxu0  ;;  %3808 = vmatpush3.bf16.msra.mxu0 %v3807_v18 }
 0x159   :  { %v5231_v41 = vpop.f32.mrb[2].mxu1  ;;  %v838_v45 = vpop.f32.mrb[3].mxu0 }
 0x15a   :  { %v1238_v46 = vmax.f32 %v5229_v43, %v5231_v41  ;;  %v1085_v47 = vpop.f32.mrb[3].mxu1  ;;  %v5354_v43 = vld [vmem:[%s6692_s2] ss:$0 sm:$0xff] }
 0x15b   :  { %v1630_v47 = vld [vmem:[%s6693_s3 + $0x1a0] sm:$0xff] }
 0x15d   :  { %v5235_v42 = vpop.f32.mrb[4].mxu0  ;;  %v5237_v48 = vpop.f32.mrb[4].mxu1 }
 0x15e   :  { %v1239_v25 = vmax.f32 %v5235_v42, %v5237_v48  ;;  %v843_v22 = vpop.f32.mrb[5].mxu0  ;;  %v1090_v44 = vpop.f32.mrb[5].mxu1  ;;  %v1632_v42 = vld [vmem:[%s6693_s3 + $0x1b0] sm:$0xff]  ;;  %v1633_v48 = vld [vmem:[%s6693_s3 + $0x1b8] sm:$0xff] }
 0x15f   :  { %v1631_v22 = vld [vmem:[%s6693_s3 + $0x1a8] sm:$0xff]  ;;  %v1614_v44 = vld [vmem:[%s6693_s3 + $0x120] sm:$0xff] }
 0x160   :  { %v3841_v57 = vpack.c.bf16 %v1631_v22, %v1630_v47  ;;  %v3843_v61 = vpack.c.bf16 %v1615_v58, %v1614_v44  ;;  %v1601_v47 = vld [vmem:[%s6693_s3 + $0xb8] sm:$0xff]  ;;  %v1584_v22 = vld [vmem:[%s6693_s3 + $0x30] sm:$0xff] }
 0x161   :  { %v5253_v51 = vpop.f32.mrb[6].mxu0  ;;  %v5255_v59 = vpop.f32.mrb[6].mxu1 }
 0x162   :  { %v1240_v33 = vmax.f32 %v5253_v51, %v5255_v59  ;;  %v848_v56 = vpop.f32.mrb[7].mxu0  ;;  %v1095_v54 = vpop.f32.mrb[7].mxu1  ;;  %3842 = vmatprep.subr.bf16.mxu1 %v3841_v57  ;;  %v1616_v59 = vld [vmem:[%s6693_s3 + $0x130] sm:$0xff]  ;;  %v1585_v57 = vld [vmem:[%s6693_s3 + $0x38] sm:$0xff] }
 0x163   :  { %3844 = vmatpush3.bf16.msra.mxu1 %v3843_v61  ;;  %v3815_v58 = vpack.c.bf16 %v1585_v57, %v1584_v22  ;;  %v1589_v22 = vld [vmem:[%s6693_s3 + $0x58] sm:$0xff]  ;;  %v1623_v57 = vld [vmem:[%s6693_s3 + $0x168] sm:$0xff] }
 0x167   :  { %v5268_v60 = vpop.f32.mrb[8].mxu0  ;;  %v5270_v31 = vpop.f32.mrb[8].mxu1 }
 0x168   :  { %v1241_v0 = vmax.f32 %v5268_v60, %v5270_v31  ;;  %v853_v9 = vpop.f32.mrb[9].mxu0  ;;  %v1100_v53 = vpop.f32.mrb[9].mxu1 }
 0x169   :  { %v3809_v53 = vpack.c.bf16 %v1599_v4, %v1598_v37 }
 0x16b   :  { %v5277_v20 = vpop.f32.mrb[10].mxu0  ;;  %v5279_v24 = vpop.f32.mrb[10].mxu1  ;;  %3810 = vmatprep.subr.bf16.mxu0 %v3809_v53 }
 0x16c   :  { %v1242_v23 = vmax.f32 %v5277_v20, %v5279_v24  ;;  %v858_v28 = vpop.f32.mrb[11].mxu0  ;;  %v1105_v27 = vpop.f32.mrb[11].mxu1  ;;  %v1634_v24 = vld [vmem:[%s6693_s3 + $0x1c0] sm:$0xff] }
 0x171   :  { %v5289_v11 = vpop.f32.mrb[12].mxu0  ;;  %v5291_v1 = vpop.f32.mrb[12].mxu1 }
 0x172   :  { %v1243_v29 = vmax.f32 %v5289_v11, %v5291_v1  ;;  %v863_v5 = vpop.f32.mrb[13].mxu0  ;;  %v1110_v32 = vpop.f32.mrb[13].mxu1  ;;  %v1619_v11 = vld [vmem:[%s6693_s3 + $0x148] sm:$0xff] }
 0x175   :  { %v5304_v52 = vpop.f32.mrb[14].mxu0  ;;  %v5306_v16 = vpop.f32.mrb[14].mxu1 }
 0x176   :  { %v1244_v55 = vmax.f32 %v5304_v52, %v5306_v16  ;;  %v868_v7 = vpop.f32.mrb[15].mxu0  ;;  %v1115_v21 = vpop.f32.mrb[15].mxu1  ;;  %v1587_v52 = vld [vmem:[%s6693_s3 + $0x48] sm:$0xff] }
 0x17b   :  { %v871_v14 = vpop.f32.mrb[16].mxu0  ;;  %v1118_v45 = vpop.f32.mrb[16].mxu1 }
 0x17c   :  { %v1245_v49 = vmax.f32 %v871_v14, %v1118_v45  ;;  %v873_v2 = vpop.f32.mrb[17].mxu0  ;;  %v1120_v50 = vpop.f32.mrb[17].mxu1  ;;  %v1600_v45 = vld [vmem:[%s6693_s3 + $0xb0] sm:$0xff] }
 0x17d   :  { %v3813_v50 = vpack.c.bf16 %v1601_v47, %v1600_v45  ;;  %v1588_v47 = vld [vmem:[%s6693_s3 + $0x50] sm:$0xff] }
 0x17e   :  { %v5334_v56 = vmax.f32 %v1237_v17, %v1245_v49  ;;  %v1583_v17 = vld [vmem:[%s6693_s3 + $0x28] sm:$0xff] }
 0x17f   :  { %v876_v54 = vpop.f32.mrb[18].mxu0  ;;  %v1123_v15 = vpop.f32.mrb[18].mxu1  ;;  %v3811_v13 = vpack.c.bf16 %v1583_v17, %v1582_v10 }
 0x180   :  { %v1246_v62 = vmax.f32 %v876_v54, %v1123_v15  ;;  %v878_v63 = vpop.f32.mrb[19].mxu0  ;;  %v1125_v9 = vpop.f32.mrb[19].mxu1 }
 0x181   :  { %3812 = vmatpush3.bf16.msra.mxu0 %v3811_v13  ;;  %v1618_v13 = vld [vmem:[%s6693_s3 + $0x140] sm:$0xff] }
 0x182   :  { %v1270_v39 = vmax.f32 %v1238_v46, %v1246_v62  ;;  %3814 = vmatprep.subr.bf16.mxu0 %v3813_v50  ;;  %v1622_v50 = vld [vmem:[%s6693_s3 + $0x160] sm:$0xff] }
 0x184   :  { %v881_v28 = vpop.f32.mrb[20].mxu0  ;;  %v1128_v27 = vpop.f32.mrb[20].mxu1  ;;  %v5357_v41 = vadd.f32 %v5354_v43, %v1270_v39 }
 0x185   :  { %v1247_v3 = vmax.f32 %v881_v28, %v1128_v27  ;;  %v883_v19 = vpop.f32.mrb[21].mxu0  ;;  %v1130_v12 = vpop.f32.mrb[21].mxu1  ;;  %3816 = vmatpush3.bf16.msra.mxu0 %v3815_v58 }
 0x186   :  { %v1293_v35 = vmax.f32 %v5357_v41, 0.0  ;;  %v3851_v12 = vpack.c.bf16 %v1619_v11, %v1618_v13 }
 0x187   :  { %v1271_v46 = vmax.f32 %v1239_v25, %v1247_v3  ;;  %v3845_v25 = vpack.c.bf16 %v1633_v48, %v1632_v42  ;;  %v1620_v42 = vld [vmem:[%s6693_s3 + $0x150] sm:$0xff] }
 0x188   :  { %v886_v5 = vpop.f32.mrb[22].mxu0  ;;  %v1133_v32 = vpop.f32.mrb[22].mxu1 }
 0x189   :  { %v1286_v30 = vadd.f32 %v5354_v43, %v1271_v46  ;;  %v1248_v34 = vmax.f32 %v886_v5, %v1133_v32  ;;  %v888_v8 = vpop.f32.mrb[23].mxu0  ;;  %v1135_v26 = vpop.f32.mrb[23].mxu1  ;;  %3846 = vmatprep.subr.bf16.mxu1 %v3845_v25  ;;  %v1602_v5 = vld [vmem:[%s6693_s3 + $0xc0] sm:$0xff]  ;;  %v1603_v32 = vld [vmem:[%s6693_s3 + $0xc8] sm:$0xff] }
 0x18a   :  { %v1636_v26 = vld [vmem:[%s6693_s3 + $0x1d0] sm:$0xff] }
 0x18b   :  { %v5364_v36 = vmax.f32 %v1286_v30, 0.0  ;;  %v1272_v40 = vmax.f32 %v1240_v33, %v1248_v34  ;;  %v1617_v33 = vld [vmem:[%s6693_s3 + $0x138] sm:$0xff]  ;;  %v1586_v30 = vld [vmem:[%s6693_s3 + $0x40] sm:$0xff]  ;;  %v3817_v34 = vpack.c.bf16 %v1603_v32, %v1602_v5 }
 0x18c   :  { %v3847_v21 = vpack.c.bf16 %v1617_v33, %v1616_v59  ;;  %v3819_v16 = vpack.c.bf16 %v1587_v52, %v1586_v30  ;;  %v1621_v33 = vld [vmem:[%s6693_s3 + $0x158] sm:$0xff] }
 0x18d   :  { %v1287_v7 = vadd.f32 %v5354_v43, %v1272_v40  ;;  %1412 = vrot.lane.b32.xlu1 %v5364_v36, %s4403_s15  ;;  %v5381_v51 = vpack.i.bf16 %v5364_v36, %v1293_v35  ;;  %3818 = vmatprep.subr.bf16.mxu0 %v3817_v34  ;;  %v1637_v40 = vld [vmem:[%s6693_s3 + $0x1d8] sm:$0xff] }
 0x18e   :  { %3848 = vmatpush3.bf16.msra.mxu1 %v3847_v21  ;;  %3820 = vmatpush3.bf16.msra.mxu0 %v3819_v16  ;;  %v3853_v59 = vpack.c.bf16 %v1637_v40, %v1636_v26  ;;  %v1604_v21 = vld [vmem:[%s6693_s3 + $0xd0] sm:$0xff] }
 0x18f   :  { %v5389_v38 = vmax.f32 %v1287_v7, 0.0  ;;  %v1138_v18 = vpop.f32.mrb[24].mxu1  ;;  %4267 = vrot.lane.b32.xlu0 %v5381_v51, %s4400_s13  ;;  %v891_v14 = vpop.f32.mrb[24].mxu0 }
 0x190   :  { %v1249_v44 = vmax.f32 %v891_v14, %v1138_v18  ;;  %v893_v49 = vpop.f32.mrb[25].mxu0  ;;  %v1140_v2 = vpop.f32.mrb[25].mxu1  ;;  %v1605_v18 = vld [vmem:[%s6693_s3 + $0xd8] sm:$0xff]  ;;  %v3855_v14 = vpack.c.bf16 %v1621_v33, %v1620_v42 }
 0x191   :  { %1414 = vrot.lane.b32.xlu1 %v5389_v38, %s4403_s15  ;;  %v3821_v45 = vpack.c.bf16 %v1605_v18, %v1604_v21  ;;  %v3823_v49 = vpack.c.bf16 %v1589_v22, %v1588_v47  ;;  %v1639_v2 = vld [vmem:[%s6693_s3 + $0x1e8] sm:$0xff] }
 0x192   :  { %v1273_v61 = vmax.f32 %v1241_v0, %v1249_v44  ;;  %v1638_v44 = vld [vmem:[%s6693_s3 + $0x1e0] sm:$0xff] }
 0x193   :  { %v896_v54 = vpop.f32.mrb[26].mxu0  ;;  %v1143_v15 = vpop.f32.mrb[26].mxu1  ;;  %3822 = vmatprep.subr.bf16.mxu0 %v3821_v45 }
 0x194   :  { %v1288_v37 = vadd.f32 %v5354_v43, %v1273_v61  ;;  %v1250_v4 = vmax.f32 %v896_v54, %v1143_v15  ;;  %v898_v62 = vpop.f32.mrb[27].mxu0  ;;  %v1145_v63 = vpop.f32.mrb[27].mxu1  ;;  %v3857_v54 = vpack.c.bf16 %v1639_v2, %v1638_v44  ;;  %v3859_v15 = vpack.c.bf16 %v1623_v57, %v1622_v50  ;;  %3824 = vmatpush3.bf16.msra.mxu0 %v3823_v49 }
 0x195   :  { %v1590_v62 = vld [vmem:[%s6693_s3 + $0x60] sm:$0xff] }
 0x196   :  { %v5411_v9 = vmax.f32 %v1288_v37, 0.0  ;;  %v5416_v53 = vmax.f32 %v1242_v23, %v1250_v4  ;;  %v1635_v23 = vld [vmem:[%s6693_s3 + $0x1c8] sm:$0xff]  ;;  %v1606_v37 = vld [vmem:[%s6693_s3 + $0xe0] sm:$0xff] }
 0x197   :  { %v3849_v3 = vpack.c.bf16 %v1635_v23, %v1634_v24  ;;  %v1607_v4 = vld [vmem:[%s6693_s3 + $0xe8] sm:$0xff]  ;;  %v1641_v24 = vld [vmem:[%s6693_s3 + $0x1f8] sm:$0xff] }
 0x198   :  { %v1148_v39 = vpop.f32.mrb[28].mxu1  ;;  %1416 = vrot.lane.b32.xlu0 %v5411_v9, %s4403_s15  ;;  %v901_v60 = vpop.f32.mrb[28].mxu0  ;;  %v5422_v31 = vpack.i.bf16 %v5411_v9, %v5389_v38 }
 0x199   :  { %v1251_v0 = vmax.f32 %v901_v60, %v1148_v39  ;;  %v903_v10 = vpop.f32.mrb[29].mxu0  ;;  %v1150_v17 = vpop.f32.mrb[29].mxu1  ;;  %3850 = vmatprep.subr.bf16.mxu1 %v3849_v3 }
 0x19a   :  { %4272 = vrot.lane.b32.xlu1 %v5422_v31, %s4400_s13  ;;  %3852 = vmatpush3.bf16.msra.mxu1 %v3851_v12  ;;  %v1591_v10 = vld [vmem:[%s6693_s3 + $0x68] sm:$0xff]  ;;  %v1640_v17 = vld [vmem:[%s6693_s3 + $0x1f0] sm:$0xff] }
 0x19b   :  { %v5429_v20 = vmax.f32 %v1243_v29, %v1251_v0  ;;  %3854 = vmatprep.subr.bf16.mxu1 %v3853_v59  ;;  %v3825_v0 = vpack.c.bf16 %v1607_v4, %v1606_v37  ;;  %v3827_v23 = vpack.c.bf16 %v1591_v10, %v1590_v62  ;;  %v3861_v13 = vpack.c.bf16 %v1641_v24, %v1640_v17  ;;  %v1624_v10 = vld [vmem:[%s6693_s3 + $0x170] sm:$0xff]  ;;  %v1625_v17 = vld [vmem:[%s6693_s3 + $0x178] sm:$0xff] }
 0x19c   :  { %v906_v28 = vpop.f32.mrb[30].mxu0  ;;  %v1153_v27 = vpop.f32.mrb[30].mxu1 }
 0x19d   :  { %v1252_v1 = vmax.f32 %v906_v28, %v1153_v27  ;;  %v908_v29 = vpop.f32.mrb[31].mxu0  ;;  %v1155_v19 = vpop.f32.mrb[31].mxu1  ;;  %3826 = vmatprep.subr.bf16.mxu0 %v3825_v0  ;;  %v1593_v0 = vld [vmem:[%s6693_s3 + $0x78] sm:$0xff] }
 0x19e   :  { %3856 = vmatpush3.bf16.msra.mxu1 %v3855_v14  ;;  %3828 = vmatpush3.bf16.msra.mxu0 %v3827_v23 }
 0x19f   :  { %v5446_v46 = vmax.f32 %v1244_v55, %v1252_v1  ;;  %3858 = vmatprep.subr.bf16.mxu1 %v3857_v54  ;;  %v1608_v54 = vld [vmem:[%s6693_s3 + $0xf0] sm:$0xff] }
 0x1a2   :  { %3860 = vmatpush3.bf16.msra.mxu1 %v3859_v15  ;;  %v1609_v15 = vld [vmem:[%s6693_s3 + $0xf8] sm:$0xff] }
 0x1a3   :  { %v5460_v55 = vpop.f32.mrb[32].mxu0  ;;  %v5462_v8 = vpop.f32.mrb[32].mxu1  ;;  %3862 = vmatprep.subr.bf16.mxu1 %v3861_v13  ;;  %v3863_v13 = vpack.c.bf16 %v1625_v17, %v1624_v10 }
 0x1a4   :  { %v1253_v48 = vmax.f32 %v5460_v55, %v5462_v8  ;;  %v913_v25 = vpop.f32.mrb[33].mxu0  ;;  %v1160_v7 = vpop.f32.mrb[33].mxu1 }
 0x1a6   :  { %3864 = vmatpush3.bf16.msra.mxu1 %v3863_v13 }
 0x1a7   :  { %v5502_v58 = vpop.f32.mrb[34].mxu0  ;;  %v5504_v61 = vpop.f32.mrb[34].mxu1 }
 0x1a8   :  { %v1254_v63 = vmax.f32 %v5502_v58, %v5504_v61  ;;  %v918_v39 = vpop.f32.mrb[35].mxu0  ;;  %v1165_v60 = vpop.f32.mrb[35].mxu1 }
 0x1a9   :  { %v3829_v39 = vpack.c.bf16 %v1609_v15, %v1608_v54  ;;  %v1592_v60 = vld [vmem:[%s6693_s3 + $0x70] sm:$0xff] }
 0x1aa   :  { %v3831_v24 = vpack.c.bf16 %v1593_v0, %v1592_v60  ;;  %v1290_v60 = vadd.f32 %v5354_v43, %v5429_v20 }
 0x1ab   :  { %3830 = vmatprep.subr.bf16.mxu0 %v3829_v39  ;;  %v1289_v39 = vadd.f32 %v5354_v43, %v5416_v53 }
 0x1ac   :  { %v5526_v28 = vpop.f32.mrb[36].mxu0  ;;  %v5528_v27 = vpop.f32.mrb[36].mxu1  ;;  %3832 = vmatpush3.bf16.msra.mxu0 %v3831_v24  ;;  %v5624_v20 = vmax.f32 %v1290_v60, 0.0 }
 0x1ad   :  { %v1255_v3 = vmax.f32 %v5526_v28, %v5528_v27  ;;  %v923_v11 = vpop.f32.mrb[37].mxu0  ;;  %v1170_v1 = vpop.f32.mrb[37].mxu1 }
 0x1b0   :  { %v5532_v29 = vpop.f32.mrb[38].mxu0  ;;  %v5534_v19 = vpop.f32.mrb[38].mxu1 }
 0x1b1   :  { %v1256_v12 = vmax.f32 %v5532_v29, %v5534_v19  ;;  %v928_v5 = vpop.f32.mrb[39].mxu0  ;;  %v1175_v32 = vpop.f32.mrb[39].mxu1 }
 0x1b7   :  { %v5538_v30 = vpop.f32.mrb[40].mxu0  ;;  %v5540_v34 = vpop.f32.mrb[40].mxu1 }
 0x1b8   :  { %v1257_v52 = vmax.f32 %v5538_v30, %v5540_v34  ;;  %v933_v16 = vpop.f32.mrb[41].mxu0  ;;  %v1180_v26 = vpop.f32.mrb[41].mxu1 }
 0x1bb   :  { %v5544_v40 = vpop.f32.mrb[42].mxu0  ;;  %v5546_v42 = vpop.f32.mrb[42].mxu1 }
 0x1bc   :  { %v1258_v25 = vmax.f32 %v5544_v40, %v5546_v42  ;;  %v938_v7 = vpop.f32.mrb[43].mxu0  ;;  %v1185_v59 = vpop.f32.mrb[43].mxu1  ;;  %v1291_v42 = vadd.f32 %v5354_v43, %v5446_v46 }
 0x1c0   :  { %v5550_v33 = vpop.f32.mrb[44].mxu0  ;;  %v5552_v21 = vpop.f32.mrb[44].mxu1 }
 0x1c1   :  { %v1259_v18 = vmax.f32 %v5550_v33, %v5552_v21  ;;  %v943_v14 = vpop.f32.mrb[45].mxu0  ;;  %v1190_v45 = vpop.f32.mrb[45].mxu1  ;;  %v5671_v21 = vmax.f32 %v1291_v42, 0.0 }
 0x1c4   :  { %v5556_v47 = vpop.f32.mrb[46].mxu0  ;;  %v5558_v22 = vpop.f32.mrb[46].mxu1 }
 0x1c5   :  { %v1260_v44 = vmax.f32 %v5556_v47, %v5558_v22  ;;  %v948_v49 = vpop.f32.mrb[47].mxu0  ;;  %v1195_v2 = vpop.f32.mrb[47].mxu1  ;;  %v4321_v22 = vpack.i.bf16 %v5389_v38, %v5364_v36 }
 0x1cb   :  { %v951_v50 = vpop.f32.mrb[48].mxu0  ;;  %v1198_v57 = vpop.f32.mrb[48].mxu1 }
 0x1cc   :  { %v1261_v37 = vmax.f32 %v951_v50, %v1198_v57  ;;  %v953_v4 = vpop.f32.mrb[49].mxu0  ;;  %v1200_v62 = vpop.f32.mrb[49].mxu1 }
 0x1cd   :  { %v3111_v4 = vld [vmem:[%s6693_s3 + $0x2e0] sm:$0xff] }
 0x1ce   :  { %v1300_v23 = vmax.f32 %v1253_v48, %v1261_v37  ;;  %v3110_v37 = vld [vmem:[%s6693_s3 + $0x2d8] sm:$0xff] }
 0x1cf   :  { %v956_v28 = vpop.f32.mrb[50].mxu0  ;;  %v1203_v27 = vpop.f32.mrb[50].mxu1  ;;  %v3885_v62 = vpack.c.bf16 %v3111_v4, %v3110_v37 }
 0x1d0   :  { %v1262_v11 = vmax.f32 %v956_v28, %v1203_v27  ;;  %v958_v1 = vpop.f32.mrb[51].mxu0  ;;  %v1205_v5 = vpop.f32.mrb[51].mxu1  ;;  %v5584_v32 = vadd.f32 %v5354_v43, %v1300_v23  ;;  %v5622_v23 = vmax.f32 %v1289_v39, 0.0  ;;  %v1642_v28 = vld [vmem:[%s6693_s3 + $0x200] sm:$0xff]  ;;  %v1643_v27 = vld [vmem:[%s6693_s3 + $0x208] sm:$0xff] }
 0x1d1   :  { %3886 = vmatprep.subr.bf16.mxu1 %v3885_v62  ;;  %v5637_v1 = vpack.c.bf16 %v1643_v27, %v1642_v28  ;;  %v1645_v28 = vld [vmem:[%s6693_s3 + $0x218] sm:$0xff] }
 0x1d2   :  { %v1301_v16 = vmax.f32 %v1254_v63, %v1262_v11  ;;  %v6705_v14 = vmax.f32 %v5584_v32, 0.0  ;;  %v4296_v30 = vpack.i.bf16 %v5624_v20, %v5622_v23 }
 0x1d3   :  { %3866 = vmatprep.subr.bf16.mxu0 %v5637_v1 }
 0x1d4   :  { %v1309_v26 = vadd.f32 %v5354_v43, %v1301_v16  ;;  %v961_v55 = vpop.f32.mrb[52].mxu0  ;;  %v1208_v8 = vpop.f32.mrb[52].mxu1 }
 0x1d5   :  { %v1263_v48 = vmax.f32 %v961_v55, %v1208_v8  ;;  %v963_v7 = vpop.f32.mrb[53].mxu0  ;;  %v1210_v59 = vpop.f32.mrb[53].mxu1 }
 0x1d6   :  { %v5591_v45 = vmax.f32 %v1309_v26, 0.0 }
 0x1d7   :  { %v1302_v49 = vmax.f32 %v1255_v3, %v1263_v48 }
 0x1d8   :  { %v966_v2 = vpop.f32.mrb[54].mxu0  ;;  %v1213_v50 = vpop.f32.mrb[54].mxu1  ;;  %v4276_v57 = vpack.i.bf16 %v5591_v45, %v6705_v14 }
 0x1d9   :  { %v1310_v58 = vadd.f32 %v5354_v43, %v1302_v49  ;;  %v1264_v61 = vmax.f32 %v966_v2, %v1213_v50  ;;  %v968_v63 = vpop.f32.mrb[55].mxu0  ;;  %v1215_v54 = vpop.f32.mrb[55].mxu1 }
 0x1da   :  { %4277 = vrot.lane.b32.xlu0 %v4276_v57, %s4404_s28 }
 0x1db   :  { %v5598_v15 = vmax.f32 %v1310_v58, 0.0  ;;  %v1303_v3 = vmax.f32 %v1256_v12, %v1264_v61 }
 0x1dd   :  { %v1311_v0 = vadd.f32 %v5354_v43, %v1303_v3  ;;  %v5616_v29 = vpack.i.bf16 %v5598_v15, %v5591_v45 }
 0x1df   :  { %v5618_v19 = vmax.f32 %v1311_v0, 0.0  ;;  %v1218_v12 = vpop.f32.mrb[56].mxu1  ;;  %4282 = vrot.lane.b32.xlu0 %v5616_v29, %s4405_s30  ;;  %v971_v10 = vpop.f32.mrb[56].mxu0  ;;  %v6701_v0 = vmov 0.0  }
 0x1e0   :  { %v1265_v17 = vmax.f32 %v971_v10, %v1218_v12  ;;  %v973_v53 = vpop.f32.mrb[57].mxu0  ;;  %v1220_v24 = vpop.f32.mrb[57].mxu1  ;;  %v4311_v12 = vpack.i.bf16 %v6701_v0, %v5671_v21  ;;  %v4341_v10 = vpack.i.bf16 %v5622_v23, %v5411_v9 }
 0x1e1   :  { %v4286_v13 = vpack.i.bf16 %v5618_v19, %v5598_v15  ;;  %v1284_v53 = vadd.f32 %v5354_v43, %v5334_v56 }
 0x1e2   :  { %v1304_v11 = vmax.f32 %v1257_v52, %v1265_v17 }
 0x1e3   :  { %v1223_v5 = vpop.f32.mrb[58].mxu1  ;;  %1418 = vrot.lane.b32.xlu0 %v5622_v23, %s4403_s15  ;;  %4287 = vrot.lane.b32.xlu1 %v4286_v13, %s4404_s28  ;;  %v976_v16 = vpop.f32.mrb[58].mxu0  ;;  %v1644_v13 = vld [vmem:[%s6693_s3 + $0x210] sm:$0xff]  ;;  %v1292_v27 = vmax.f32 %v1284_v53, 0.0 }
 0x1e4   :  { %v1312_v26 = vadd.f32 %v5354_v43, %v1304_v11  ;;  %v1266_v55 = vmax.f32 %v976_v16, %v1223_v5  ;;  %v978_v8 = vpop.f32.mrb[59].mxu0  ;;  %v1225_v48 = vpop.f32.mrb[59].mxu1 }
 0x1e5   :  { %v3869_v8 = vpack.c.bf16 %v1645_v28, %v1644_v13  ;;  %v3094_v48 = vld [vmem:[%s6693_s3 + $0x258] sm:$0xff]  ;;  %v3099_v28 = vld [vmem:[%s6693_s3 + $0x280] sm:$0xff] }
 0x1e6   :  { %v5646_v34 = vmax.f32 %v1312_v26, 0.0  ;;  %v1305_v52 = vmax.f32 %v1258_v25, %v1266_v55  ;;  %v3098_v13 = vld [vmem:[%s6693_s3 + $0x278] sm:$0xff] }
 0x1e7   :  { %4297 = vrot.lane.b32.xlu0 %v4296_v30, %s4400_s13  ;;  %v3095_v30 = vld [vmem:[%s6693_s3 + $0x260] sm:$0xff] }
 0x1e8   :  { %v1313_v7 = vadd.f32 %v5354_v43, %v1305_v52  ;;  %v981_v59 = vpop.f32.mrb[60].mxu0  ;;  %v1228_v49 = vpop.f32.mrb[60].mxu1  ;;  %v4291_v2 = vpack.i.bf16 %v5646_v34, %v5618_v19  ;;  %v3887_v42 = vpack.c.bf16 %v3095_v30, %v3094_v48  ;;  %v1651_v48 = vld [vmem:[%s6693_s3 + $0x248] sm:$0xff] }
 0x1e9   :  { %v1267_v50 = vmax.f32 %v981_v59, %v1228_v49  ;;  %v983_v57 = vpop.f32.mrb[61].mxu0  ;;  %v1230_v58 = vpop.f32.mrb[61].mxu1  ;;  %v3112_v49 = vld [vmem:[%s6693_s3 + $0x2e8] sm:$0xff] }
 0x1ea   :  { %v5655_v61 = vmax.f32 %v1313_v7, 0.0  ;;  %4292 = vrot.lane.b32.xlu1 %v4291_v2, %s4405_s30  ;;  %v1646_v58 = vld [vmem:[%s6693_s3 + $0x220] sm:$0xff] }
 0x1eb   :  { %v1306_v40 = vmax.f32 %v1259_v18, %v1267_v50 }
 0x1ec   :  { %v4301_v25 = vpack.i.bf16 %v5655_v61, %v5646_v34 }
 0x1ed   :  { %v1314_v63 = vadd.f32 %v5354_v43, %v1306_v40  ;;  %v986_v54 = vpop.f32.mrb[62].mxu0  ;;  %v1233_v3 = vpop.f32.mrb[62].mxu1  ;;  %v1647_v40 = vld [vmem:[%s6693_s3 + $0x228] sm:$0xff] }
 0x1ee   :  { %v1268_v37 = vmax.f32 %v986_v54, %v1233_v3  ;;  %v1235_v4 = vpop.f32.mrb[63].mxu1  ;;  %1420 = vrot.lane.b32.xlu1 %v5624_v20, %s4403_s15  ;;  %4302 = vrot.lane.b32.xlu0 %v4301_v25, %s4404_s28  ;;  %v988_v62 = vpop.f32.mrb[63].mxu0  ;;  %v3096_v3 = vld [vmem:[%s6693_s3 + $0x268] sm:$0xff] }
 0x1ef   :  { %v5669_v33 = vmax.f32 %v1314_v63, 0.0  ;;  %v3115_v4 = vld [vmem:[%s6693_s3 + $0x300] sm:$0xff]  ;;  %v3873_v62 = vpack.c.bf16 %v1647_v40, %v1646_v58 }
 0x1f0   :  { %v1307_v46 = vmax.f32 %v1260_v44, %v1268_v37  ;;  %v3097_v37 = vld [vmem:[%s6693_s3 + $0x270] sm:$0xff] }
 0x1f1   :  { %v4306_v18 = vpack.i.bf16 %v5669_v33, %v5655_v61 }
 0x1f2   :  { %v1315_v39 = vadd.f32 %v5354_v43, %v1307_v46  ;;  %1422 = vrot.lane.b32.xlu1 %v5671_v21, %s4403_s15 }
 0x1f3   :  { %4307 = vrot.lane.b32.xlu0 %v4306_v18, %s4405_s30 }
 0x1f4   :  { %v5682_v60 = vmax.f32 %v1315_v39, 0.0 }
 0x1f6   :  { %4312 = vrot.lane.b32.xlu1 %v4311_v12, %s4400_s13  ;;  %v4316_v47 = vpack.i.bf16 %v6701_v0, %v5682_v60  ;;  %v4336_v44 = vpack.i.bf16 %v5682_v60, %v5669_v33 }
 0x1f7   :  { %1424 = vrot.lane.b32.xlu0 %v6701_v0, %s4403_s15 }
 0x1fa   :  { %4317 = vrot.lane.b32.xlu1 %v4316_v47, %s4405_s30 }
 0x1fb   :  { %1531 = vrot.lane.b32.xlu0 %v5598_v15, %s4403_s15 }
 0x1fe   :  { %4322 = vrot.lane.b32.xlu1 %v4321_v22, %s4405_s30  ;;  %v1648_v22 = vld [vmem:[%s6693_s3 + $0x230] sm:$0xff] }
 0x1ff   :  { %1533 = vrot.lane.b32.xlu0 %v5618_v19, %s4403_s15 }
 0x202   :  { %4327 = vrot.lane.b32.xlu1 %v5616_v29, %s4400_s13  ;;  %v4356_v29 = vpack.i.bf16 %v5671_v21, %v5624_v20 }
 0x203   :  { %4337 = vrot.lane.b32.xlu0 %v4336_v44, %s4404_s28  ;;  %v1649_v44 = vld [vmem:[%s6693_s3 + $0x238] sm:$0xff] }
 0x206   :  { %4332 = vrot.lane.b32.xlu1 %v5381_v51, %s4404_s28  ;;  %v5737_v51 = vpop.permute.xlu0 %4267 }
 0x207   :  { %4342 = vrot.lane.b32.xlu0 %v4341_v10, %s4405_s30  ;;  %v4269_v11 = vunpack.i.l.bf16 %v5737_v51  ;;  %v4270_v55 = vunpack.i.h.bf16 %v5737_v51  ;;  %v3891_v10 = vpack.c.bf16 %v3097_v37, %v3096_v3 }
 0x20a   :  { %1535 = vrot.lane.b32.xlu1 %v5646_v34, %s4403_s15  ;;  %v5741_v17 = vpop.permute.xlu0 %1416 }
 0x20b   :  { %4347 = vrot.lane.b32.xlu0 %v4291_v2, %s4400_s13  ;;  %v3113_v2 = vld [vmem:[%s6693_s3 + $0x2f0] sm:$0xff] }
 0x20c   :  { %v3889_v54 = vpack.c.bf16 %v3113_v2, %v3112_v49  ;;  %v3100_v2 = vld [vmem:[%s6693_s3 + $0x288] sm:$0xff] }
 0x20e   :  { %1537 = vrot.lane.b32.xlu1 %v5655_v61, %s4403_s15 }
 0x20f   :  { %4352 = vrot.lane.b32.xlu0 %v5422_v31, %s4404_s28  ;;  %v5739_v31 = vpop.permute.xlu1 %1412 }
 0x212   :  { %4357 = vrot.lane.b32.xlu1 %v4356_v29, %s4405_s30 }
 0x213   :  { %1539 = vrot.lane.b32.xlu0 %v5669_v33, %s4403_s15  ;;  %v5752_v5 = vpop.permute.xlu1 %1414 }
 0x216   :  { %1500 = vrot.lane.b32.xlu1 %v5655_v61, %s4400_s13 }
 0x217   :  { %1541 = vrot.lane.b32.xlu0 %v5682_v60, %s4403_s15  ;;  %v5768_v52 = vpop.permute.xlu1 %4272 }
 0x218   :  { %v4274_v46 = vunpack.i.l.bf16 %v5768_v52  ;;  %v4275_v29 = vunpack.i.h.bf16 %v5768_v52 }
 0x21a   :  { %1476 = vrot.lane.b32.xlu1 %v5622_v23, %s4404_s28 }
 0x21b   :  { %1502 = vrot.lane.b32.xlu0 %v5669_v33, %s4400_s13 }
 0x21e   :  { %1478 = vrot.lane.b32.xlu1 %v5624_v20, %s4404_s28 }
 0x21f   :  { %1504 = vrot.lane.b32.xlu0 %v5682_v60, %s4400_s13 }
 0x222   :  { %1480 = vrot.lane.b32.xlu1 %v5671_v21, %s4404_s28 }
 0x223   :  { %1482 = vrot.lane.b32.xlu0 %v6701_v0, %s4404_s28 }
 0x24c   :  { %v4278_v24 = vpop.permute.xlu0 %4277 }
 0x24d   :  { %v4280_v16 = vunpack.i.h.bf16 %v4278_v24  ;;  %v4279_v26 = vunpack.i.l.bf16 %v4278_v24 }
 0x24f   :  { %v5756_v56 = vsel %vm234_vm7, %v4279_v26, %v4269_v11  ;;  %v5759_v43 = vsel %vm1433_vm8, %v1292_v27, %v4279_v26  ;;  %v5772_v59 = vsel %vm234_vm7, %v4280_v16, %v4270_v55  ;;  %v5791_v25 = vsel %vm1433_vm8, %v1293_v35, %v4280_v16  ;;  %v3114_v35 = vld [vmem:[%s6693_s3 + $0x2f8] sm:$0xff] }
 0x250   :  { %1744 = vmatprep.mubr.f32.mxu0 %v5756_v56  ;;  %v3893_v24 = vpack.c.bf16 %v3115_v4, %v3114_v35  ;;  %v3877_v16 = vpack.c.bf16 %v1649_v44, %v1648_v22 }
 0x251   :  { %1745 = vmatmul.mubr.f32.vlgmr.msra.gmra.mrb[64].mxu0 %v5759_v43  ;;  %v4283_v7 = vpop.permute.xlu0 %4282 }
 0x252   :  { %v4285_v50 = vunpack.i.h.bf16 %v4283_v7  ;;  %v4284_v57 = vunpack.i.l.bf16 %v4283_v7  ;;  %1749 = vmatprep.mubr.f32.mxu0 %v5772_v59  ;;  %3868 = vmatpush3.bf16.msra.mxu0 %v5637_v1 }
 0x253   :  { %3870 = vmatprep.subr.bf16.mxu0 %v3869_v8 }
 0x254   :  { %v5795_v63 = vsel %vm1459_vm9, %v4284_v57, %v5739_v31  ;;  %v5798_v1 = vsel %vm1450_vm10, %v4269_v11, %v4284_v57  ;;  %v5820_v47 = vsel %vm1459_vm9, %v4285_v50, %v5752_v5  ;;  %v5845_v27 = vsel %vm1450_vm10, %v4270_v55, %v4285_v50  ;;  %v3117_v11 = vld [vmem:[%s6693_s3 + $0x310] sm:$0xff] }
 0x255   :  { %1750 = vmatmul.mubr.f32.gmra.mrb[66].mxu0 %v5791_v25  ;;  %1881 = vmatprep.mubr.f32.mxu1 %v5795_v63  ;;  %v4288_v41 = vpop.permute.xlu1 %4287  ;;  %v5815_v18 = vpop.permute.xlu0 %1418  ;;  %v3895_v55 = vpack.c.bf16 %v3099_v28, %v3098_v13  ;;  %v3101_v50 = vld [vmem:[%s6693_s3 + $0x290] sm:$0xff] }
 0x256   :  { %v4290_v39 = vunpack.i.h.bf16 %v4288_v41  ;;  %v4289_v12 = vunpack.i.l.bf16 %v4288_v41  ;;  %1882 = vmatmul.mubr.f32.vlgmr.msra.gmra.mrb[64].mxu1 %v5798_v1  ;;  %3872 = vmatpush3.bf16.msra.mxu0 %v3869_v8  ;;  %v1650_v8 = vld [vmem:[%s6693_s3 + $0x240] sm:$0xff]  ;;  %v3121_v13 = vld [vmem:[%s6693_s3 + $0x330] sm:$0xff] }
 0x257   :  { %1886 = vmatprep.mubr.f32.mxu1 %v5820_v47  ;;  %3888 = vmatpush3.bf16.msra.mxu1 %v3887_v42  ;;  %v3118_v42 = vld [vmem:[%s6693_s3 + $0x318] sm:$0xff]  ;;  %v3881_v3 = vpack.c.bf16 %v1651_v48, %v1650_v8  ;;  %v3105_v8 = vld [vmem:[%s6693_s3 + $0x2b0] sm:$0xff] }
 0x258   :  { %v5831_v51 = vsel %vm234_vm7, %v4289_v12, %v4274_v46  ;;  %v5835_v53 = vsel %vm1433_vm8, %v5364_v36, %v4289_v12  ;;  %3890 = vmatprep.subr.bf16.mxu1 %v3889_v54  ;;  %v3116_v36 = vld [vmem:[%s6693_s3 + $0x308] sm:$0xff]  ;;  %3874 = vmatprep.subr.bf16.mxu0 %v3873_v62  ;;  %v5858_v26 = vsel %vm234_vm7, %v4290_v39, %v4275_v29  ;;  %v3119_v54 = vld [vmem:[%s6693_s3 + $0x320] sm:$0xff] }
 0x259   :  { %1754 = vmatprep.mubr.f32.mxu0 %v5831_v51  ;;  %v5867_v30 = vpop.permute.xlu0 %4297  ;;  %v3897_v49 = vpack.c.bf16 %v3117_v11, %v3116_v36  ;;  %v5877_v40 = vsel %vm1433_vm8, %v5389_v38, %v4290_v39  ;;  %v3899_v38 = vpack.c.bf16 %v3101_v50, %v3100_v2  ;;  %v3102_v39 = vld [vmem:[%s6693_s3 + $0x298] sm:$0xff]  ;;  %v3103_v12 = vld [vmem:[%s6693_s3 + $0x2a0] sm:$0xff]  ;;  %v1652_v2 = vld [vmem:[%s6693_s3 + $0x250] sm:$0xff] }
 0x25a   :  { %1755 = vmatmul.mubr.f32.gmra.mrb[68].mxu0 %v5835_v53  ;;  %1887 = vmatmul.mubr.f32.gmra.mrb[66].mxu1 %v5845_v27  ;;  %v4300_v28 = vunpack.i.h.bf16 %v5867_v30  ;;  %v3142_v50 = vld [vmem:[%s6693_s3 + $0x3d8] sm:$0xff] }
 0x25b   :  { %1759 = vmatprep.mubr.f32.mxu0 %v5858_v26  ;;  %3892 = vmatpush3.bf16.msra.mxu1 %v3891_v10 }
 0x25c   :  { %v4293_v7 = vpop.permute.xlu1 %4292  ;;  %3894 = vmatprep.subr.bf16.mxu1 %v3893_v24  ;;  %3876 = vmatpush3.bf16.msra.mxu0 %v3873_v62  ;;  %v3901_v62 = vpack.c.bf16 %v3119_v54, %v3118_v42  ;;  %v3120_v24 = vld [vmem:[%s6693_s3 + $0x328] sm:$0xff] }
 0x25d   :  { %v4295_v57 = vunpack.i.h.bf16 %v4293_v7  ;;  %v4294_v58 = vunpack.i.l.bf16 %v4293_v7  ;;  %3878 = vmatprep.subr.bf16.mxu0 %v3877_v16  ;;  %v3122_v7 = vld [vmem:[%s6693_s3 + $0x338] sm:$0xff] }
 0x25e   :  { %1760 = vmatmul.mubr.f32.gmra.mrb[70].mxu0 %v5877_v40 }
 0x25f   :  { %v5888_v37 = vsel %vm1459_vm9, %v4294_v58, %v5741_v17  ;;  %v5891_v41 = vsel %vm1450_vm10, %v4274_v46, %v4294_v58  ;;  %3896 = vmatpush3.bf16.msra.mxu1 %v3895_v55  ;;  %v4299_v46 = vunpack.i.l.bf16 %v5867_v30  ;;  %v5906_v10 = vsel %vm1459_vm9, %v4295_v57, %v5815_v18  ;;  %v3104_v55 = vld [vmem:[%s6693_s3 + $0x2a8] sm:$0xff] }
 0x260   :  { %v5893_v35 = vpop.permute.xlu1 %1420  ;;  %1891 = vmatprep.mubr.f32.mxu1 %v5888_v37  ;;  %v4303_v4 = vpop.permute.xlu0 %4302  ;;  %3898 = vmatprep.subr.bf16.mxu1 %v3897_v49  ;;  %v5935_v30 = vsel %vm1450_vm10, %v4275_v29, %v4295_v57  ;;  %v3123_v49 = vld [vmem:[%s6693_s3 + $0x340] sm:$0xff]  ;;  %v3907_v54 = vpack.c.bf16 %v3105_v8, %v3104_v55 }
 0x261   :  { %v4305_v22 = vunpack.i.h.bf16 %v4303_v4  ;;  %v4304_v44 = vunpack.i.l.bf16 %v4303_v4  ;;  %1892 = vmatmul.mubr.f32.gmra.mrb[68].mxu1 %v5891_v41  ;;  %3880 = vmatpush3.bf16.msra.mxu0 %v3877_v16  ;;  %v3903_v16 = vpack.c.bf16 %v3103_v12, %v3102_v39  ;;  %6726 = vst [vmem:[#allocation5_spill] sm:$0xff] %v5935_v30  ;;  %v3143_v57 = vld [vmem:[%s6693_s3 + $0x3e0] sm:$0xff] }
 0x262   :  { %1896 = vmatprep.mubr.f32.mxu1 %v5906_v10  ;;  %3882 = vmatprep.subr.bf16.mxu0 %v3881_v3 }
 0x263   :  { %v5917_v36 = vsel %vm234_vm7, %v4304_v44, %v4299_v46  ;;  %v5921_v11 = vsel %vm1433_vm8, %v5411_v9, %v4304_v44  ;;  %3900 = vmatpush3.bf16.msra.mxu1 %v3899_v38  ;;  %v3905_v9 = vpack.c.bf16 %v3121_v13, %v3120_v24  ;;  %v5949_v29 = vsel %vm234_vm7, %v4305_v22, %v4300_v28  ;;  %v3107_v44 = vld [vmem:[%s6693_s3 + $0x2c0] sm:$0xff] }
 0x264   :  { %v5929_v48 = vpop.permute.xlu1 %1422  ;;  %1764 = vmatprep.mubr.f32.mxu0 %v5917_v36  ;;  %3902 = vmatprep.subr.bf16.mxu1 %v3901_v62  ;;  %v3909_v38 = vpack.c.bf16 %v3123_v49, %v3122_v7  ;;  %v5960_v62 = vsel %vm1433_vm8, %v5622_v23, %v4305_v22  ;;  %v3917_v24 = vpack.c.bf16 %v3143_v57, %v3142_v50  ;;  %v3125_v22 = vld [vmem:[%s6693_s3 + $0x350] sm:$0xff]  ;;  %v3158_v50 = vld [vmem:[%s6693_s3 + $0x458] sm:$0xff]  ;;  %v3159_v57 = vld [vmem:[%s6693_s3 + $0x460] sm:$0xff] }
 0x265   :  { %1765 = vmatmul.mubr.f32.gmra.mrb[72].mxu0 %v5921_v11  ;;  %1897 = vmatmul.mubr.f32.gmra.mrb[70].mxu1 %v5935_v30  ;;  %v4308_v52 = vpop.permute.xlu0 %4307  ;;  %v3109_v7 = vld [vmem:[%s6693_s3 + $0x2d0] sm:$0xff] }
 0x266   :  { %v4310_v58 = vunpack.i.h.bf16 %v4308_v52  ;;  %v4309_v42 = vunpack.i.l.bf16 %v4308_v52  ;;  %1768 = vmatprep.mubr.f32.mxu0 %v5949_v29  ;;  %3884 = vmatpush3.bf16.msra.mxu0 %v3881_v3  ;;  %v3106_v3 = vld [vmem:[%s6693_s3 + $0x2b8] sm:$0xff] }
 0x267   :  { %3904 = vmatpush3.bf16.msra.mxu1 %v3903_v16  ;;  %3637 = vmatprep.subr.mxu0 %v1652_v2  ;;  %v3911_v16 = vpack.c.bf16 %v3107_v44, %v3106_v3  ;;  %v6016_v3 = vpack.c.bf16 %v3159_v57, %v3158_v50 }
 0x268   :  { %v4313_v4 = vpop.permute.xlu1 %4312  ;;  %v5964_v39 = vsel %vm1459_vm9, %v4309_v42, %v5893_v35  ;;  %v5967_v12 = vsel %vm1450_vm10, %v4299_v46, %v4309_v42  ;;  %3906 = vmatprep.subr.bf16.mxu1 %v3905_v9  ;;  %v3124_v46 = vld [vmem:[%s6693_s3 + $0x348] sm:$0xff]  ;;  %v5988_v13 = vsel %vm1459_vm9, %v4310_v58, %v5929_v48 }
 0x269   :  { %6727 = vst [vmem:[#allocation6_spill] sm:$0xff] %v5964_v39  ;;  %6728 = vst [vmem:[#allocation7_spill] sm:$0xff] %v5967_v12  ;;  %1769 = vmatmul.mubr.f32.gmra.mrb[74].mxu0 %v5960_v62  ;;  %v5976_v23 = vpop.permute.xlu0 %1424  ;;  %1901 = vmatprep.mubr.f32.mxu1 %v5964_v39  ;;  %v3913_v8 = vpack.c.bf16 %v3125_v22, %v3124_v46  ;;  %v3108_v9 = vld [vmem:[%s6693_s3 + $0x2c8] sm:$0xff]  ;;  %v6739_v39 = vmax.f32 %v5584_v32, 0.0 }
 0x26a   :  { %1902 = vmatmul.mubr.f32.gmra.mrb[72].mxu1 %v5967_v12  ;;  %6729 = vst [vmem:[#allocation8_spill] sm:$0xff] %v5988_v13  ;;  %3638 = vmatpush3.msra.mxu0 %v1652_v2  ;;  %v6000_v2 = vsel %vm1450_vm10, %v4300_v28, %v4310_v58  ;;  %v3915_v28 = vpack.c.bf16 %v3109_v7, %v3108_v9 }
 0x26b   :  { %1905 = vmatprep.mubr.f32.mxu1 %v5988_v13  ;;  %3908 = vmatpush3.bf16.msra.mxu1 %v3907_v54  ;;  %6730 = vst [vmem:[#allocation9_spill] sm:$0xff] %v6000_v2  ;;  %v4314_v54 = vunpack.i.l.bf16 %v4313_v4 }
 0x26c   :  { %v4318_v55 = vpop.permute.xlu1 %4317  ;;  %3910 = vmatprep.subr.bf16.mxu1 %v3909_v38  ;;  %3918 = vmatprep.subr.bf16.mxu0 %v3917_v24 }
 0x26d   :  { %v4319_v49 = vunpack.i.l.bf16 %v4318_v55  ;;  %v5997_v52 = vpop.permute.xlu0 %1531  ;;  %v6008_v42 = vunpack.i.h.bf16 %v4318_v55 }
 0x26e   :  { %1906 = vmatmul.mubr.f32.gmra.mrb[74].mxu1 %v6000_v2 }
 0x26f   :  { %v6013_v38 = vsel %vm1459_vm9, %v4319_v49, %v5976_v23  ;;  %3912 = vmatpush3.bf16.msra.mxu1 %v3911_v16  ;;  %v6021_v24 = vsel %vm1450_vm10, %v4314_v54, %v4319_v49  ;;  %v6026_v46 = vsel %vm1459_vm9, %v6008_v42, %v5976_v23  ;;  %v6029_v16 = vunpack.i.h.bf16 %v4313_v4 }
 0x270   :  { %6731 = vst [vmem:[#allocation10_spill] sm:$0xff] %v6013_v38  ;;  %v4323_v58 = vpop.permute.xlu1 %4322  ;;  %1909 = vmatprep.mubr.f32.mxu1 %v6013_v38  ;;  %3914 = vmatprep.subr.bf16.mxu1 %v3913_v8  ;;  %6732 = vst [vmem:[#allocation11_spill] sm:$0xff] %v6021_v24 }
 0x271   :  { %v6018_v44 = vpop.permute.xlu0 %1533  ;;  %v4324_v22 = vunpack.i.l.bf16 %v4323_v58  ;;  %v6036_v7 = vsel %vm1450_vm10, %v6029_v16, %v6008_v42  ;;  %v4325_v49 = vunpack.i.h.bf16 %v4323_v58 }
 0x272   :  { %1910 = vmatmul.mubr.f32.gmra.mrb[76].mxu1 %v6021_v24 }
 0x273   :  { %1913 = vmatprep.mubr.f32.mxu1 %v6026_v46  ;;  %3916 = vmatpush3.bf16.msra.mxu1 %v3915_v28  ;;  %v6041_v4 = vsel %vm1459_vm9, %v4324_v22, %v5997_v52 }
 0x274   :  { %v4328_v55 = vpop.permute.xlu1 %4327  ;;  %3950 = vmatprep.subr.bf16.mxu1 %v6016_v3  ;;  %6733 = vst [vmem:[#allocation12_spill] sm:$0xff] %v6041_v4 }
 0x275   :  { %v4329_v8 = vunpack.i.l.bf16 %v4328_v55  ;;  %v4338_v9 = vpop.permute.xlu0 %4337  ;;  %v4330_v14 = vunpack.i.h.bf16 %v4328_v55 }
 0x276   :  { %v4340_v50 = vunpack.i.h.bf16 %v4338_v9  ;;  %v4339_v57 = vunpack.i.l.bf16 %v4338_v9  ;;  %1914 = vmatmul.mubr.f32.gmra.mrb[78].mxu1 %v6036_v7 }
 0x277   :  { %1917 = vmatprep.mubr.f32.mxu1 %v6041_v4  ;;  %v6053_v9 = vsel %vm1450_vm10, %v4329_v8, %v4324_v22 }
 0x278   :  { %v4333_v28 = vpop.permute.xlu1 %4332  ;;  %v6045_v0 = vsel %vm234_vm7, %v4339_v57, %v4314_v54  ;;  %v6049_v6 = vsel %vm1433_vm8, %v5624_v20, %v4339_v57  ;;  %6734 = vst [vmem:[#allocation13_spill] sm:$0xff] %v6053_v9  ;;  %v6059_v54 = vsel %vm234_vm7, %v4340_v50, %v6029_v16  ;;  %v6063_v20 = vsel %vm1459_vm9, %v4325_v49, %v6018_v44 }
 0x279   :  { %v4343_v58 = vpop.permute.xlu0 %4342  ;;  %1772 = vmatprep.mubr.f32.mxu0 %v6045_v0  ;;  %v4334_v24 = vunpack.i.l.bf16 %v4333_v28  ;;  %6735 = vst [vmem:[#allocation14_spill] sm:$0xff] %v6063_v20  ;;  %v6071_v57 = vsel %vm1433_vm8, %v5671_v21, %v4340_v50  ;;  %v4335_v2 = vunpack.i.h.bf16 %v4333_v28 }
 0x27a   :  { %v4344_v38 = vunpack.i.l.bf16 %v4343_v58  ;;  %1773 = vmatmul.mubr.f32.gmra.mrb[76].mxu0 %v6049_v6  ;;  %1918 = vmatmul.mubr.f32.gmra.mrb[80].mxu1 %v6053_v9  ;;  %v6074_v9 = vsel %vm1450_vm10, %v4330_v14, %v4325_v49  ;;  %v4345_v12 = vunpack.i.h.bf16 %v4343_v58 }
 0x27b   :  { %1776 = vmatprep.mubr.f32.mxu0 %v6059_v54  ;;  %1922 = vmatprep.mubr.f32.mxu1 %v6063_v20  ;;  %6736 = vst [vmem:[#allocation15_spill] sm:$0xff] %v6074_v9  ;;  %v6083_v20 = vsel %vm234_vm7, %v4334_v24, %v4329_v8  ;;  %v6095_v30 = vsel %vm1433_vm8, %v6739_v39, %v4334_v24 }
 0x27c   :  { %v6067_v22 = vpop.permute.xlu1 %1535  ;;  %v6112_v24 = vsel %vm1433_vm8, %v5591_v45, %v4335_v2 }
 0x27d   :  { %v4348_v55 = vpop.permute.xlu0 %4347  ;;  %v6078_v4 = vsel %vm1459_vm9, %v4344_v38, %v6067_v22 }
 0x27e   :  { %6737 = vst [vmem:[#allocation16_spill] sm:$0xff] %v6078_v4  ;;  %v4349_v13 = vunpack.i.l.bf16 %v4348_v55  ;;  %1777 = vmatmul.mubr.f32.gmra.mrb[78].mxu0 %v6071_v57  ;;  %1923 = vmatmul.mubr.f32.gmra.mrb[82].mxu1 %v6074_v9  ;;  %v4350_v50 = vunpack.i.h.bf16 %v4348_v55 }
 0x27f   :  { %1780 = vmatprep.mubr.f32.mxu0 %v6083_v20  ;;  %1927 = vmatprep.mubr.f32.mxu1 %v6078_v4  ;;  %v6104_v4 = vsel %vm234_vm7, %v4335_v2, %v4330_v14 }
 0x280   :  { %v6087_v21 = vpop.permute.xlu1 %1537  ;;  %v6090_v49 = vsel %vm1450_vm10, %v4349_v13, %v4344_v38  ;;  %v6115_v55 = vsel %vm1450_vm10, %v4350_v50, %v4345_v12 }
 0x281   :  { %6738 = vst [vmem:[#allocation17_spill] sm:$0xff] %v6090_v49  ;;  %v4353_v28 = vpop.permute.xlu0 %4352  ;;  %v6099_v8 = vsel %vm1459_vm9, %v4345_v12, %v6087_v21  ;;  %6741 = vst [vmem:[#allocation19_spill] sm:$0xff] %v6115_v55 }
 0x282   :  { %6740 = vst [vmem:[#allocation18_spill] sm:$0xff] %v6099_v8  ;;  %v4354_v58 = vunpack.i.l.bf16 %v4353_v28  ;;  %1781 = vmatmul.mubr.f32.gmra.mrb[80].mxu0 %v6095_v30  ;;  %1928 = vmatmul.mubr.f32.gmra.mrb[84].mxu1 %v6090_v49  ;;  %v4355_v9 = vunpack.i.h.bf16 %v4353_v28 }
 0x283   :  { %1785 = vmatprep.mubr.f32.mxu0 %v6104_v4  ;;  %1932 = vmatprep.mubr.f32.mxu1 %v6099_v8 }
 0x284   :  { %v4358_v32 = vpop.permute.xlu1 %4357  ;;  %v6120_v14 = vsel %vm234_vm7, %v4354_v58, %v4349_v13  ;;  %v6132_v2 = vsel %vm1433_vm8, %v5598_v15, %v4354_v58  ;;  %v6140_v13 = vsel %vm234_vm7, %v4355_v9, %v4350_v50 }
 0x285   :  { %v4359_v38 = vunpack.i.l.bf16 %v4358_v32  ;;  %v6108_v39 = vpop.permute.xlu0 %1539  ;;  %v4360_v49 = vunpack.i.h.bf16 %v4358_v32 }
 0x286   :  { %1786 = vmatmul.mubr.f32.gmra.mrb[82].mxu0 %v6112_v24  ;;  %1933 = vmatmul.mubr.f32.gmra.mrb[86].mxu1 %v6115_v55  ;;  %v3163_v55 = vld [vmem:[%s6693_s3 + $0x480] sm:$0xff] }
 0x287   :  { %1790 = vmatprep.mubr.f32.mxu0 %v6120_v14  ;;  %v6125_v8 = vsel %vm1459_vm9, %v4359_v38, %v6108_v39 }
 0x288   :  { %6742 = vst [vmem:[#allocation20_spill] sm:$0xff] %v6125_v8  ;;  %v1501_v45 = vpop.permute.xlu1 %1500  ;;  %1937 = vmatprep.mubr.f32.mxu1 %v6125_v8 }
 0x289   :  { %v6128_v12 = vpop.permute.xlu0 %1541  ;;  %v6135_v28 = vsel %vm1450_vm10, %v1501_v45, %v4359_v38  ;;  %v6150_v38 = vsel %vm1433_vm8, %v5618_v19, %v4355_v9 }
 0x28a   :  { %6743 = vst [vmem:[#allocation21_spill] sm:$0xff] %v6135_v28  ;;  %1791 = vmatmul.mubr.f32.gmra.mrb[84].mxu0 %v6132_v2  ;;  %1938 = vmatmul.mubr.f32.gmra.mrb[88].mxu1 %v6135_v28  ;;  %v6144_v32 = vsel %vm1459_vm9, %v4360_v49, %v6128_v12 }
 0x28b   :  { %6744 = vst [vmem:[#allocation22_spill] sm:$0xff] %v6144_v32  ;;  %1795 = vmatprep.mubr.f32.mxu0 %v6140_v13  ;;  %1941 = vmatprep.mubr.f32.mxu1 %v6144_v32 }
 0x28c   :  { %v1477_v15 = vpop.permute.xlu1 %1476 }
 0x28d   :  { %v1503_v58 = vpop.permute.xlu0 %1502  ;;  %v6153_v8 = vsel %vm234_vm7, %v1477_v15, %v1501_v45  ;;  %v6164_v19 = vsel %vm1433_vm8, %v5646_v34, %v1477_v15 }
 0x28e   :  { %1796 = vmatmul.mubr.f32.gmra.mrb[86].mxu0 %v6150_v38  ;;  %v6157_v50 = vsel %vm1450_vm10, %v1503_v58, %v4360_v49 }
 0x28f   :  { %6745 = vst [vmem:[#allocation23_spill] sm:$0xff] %v6157_v50  ;;  %1800 = vmatprep.mubr.f32.mxu0 %v6153_v8  ;;  %1942 = vmatmul.mubr.f32.gmra.mrb[90].mxu1 %v6157_v50  ;;  %v3162_v50 = vld [vmem:[%s6693_s3 + $0x478] sm:$0xff] }
 0x290   :  { %v1479_v28 = vpop.permute.xlu1 %1478  ;;  %1945 = vmatprep.mubr.f32.mxu1 %v6026_v46 }
 0x291   :  { %v1505_v32 = vpop.permute.xlu0 %1504  ;;  %v6167_v9 = vsel %vm234_vm7, %v1479_v28, %v1503_v58  ;;  %v6179_v34 = vsel %vm1433_vm8, %v5655_v61, %v1479_v28  ;;  %v3161_v58 = vld [vmem:[%s6693_s3 + $0x470] sm:$0xff] }
 0x292   :  { %1801 = vmatmul.mubr.f32.gmra.mrb[88].mxu0 %v6164_v19  ;;  %v6172_v49 = vsel %vm1450_vm10, %v1505_v32, %v6008_v42  ;;  %v3160_v42 = vld [vmem:[%s6693_s3 + $0x468] sm:$0xff] }
 0x293   :  { %6746 = vst [vmem:[#allocation24_spill] sm:$0xff] %v6172_v49  ;;  %1804 = vmatprep.mubr.f32.mxu0 %v6167_v9  ;;  %1946 = vmatmul.mubr.f32.gmra.mrb[92].mxu1 %v6172_v49  ;;  %v3953_v28 = vpack.c.bf16 %v3161_v58, %v3160_v42  ;;  %v3147_v58 = vld [vmem:[%s6693_s3 + $0x400] sm:$0xff] }
 0x294   :  { %v1481_v45 = vpop.permute.xlu1 %1480  ;;  %1949 = vmatprep.mubr.f32.mxu1 %v6026_v46 }
 0x295   :  { %v6182_v15 = vsel %vm234_vm7, %v1481_v45, %v1505_v32  ;;  %v1483_v49 = vpop.permute.xlu0 %1482  ;;  %v6196_v61 = vsel %vm1433_vm8, %v5669_v33, %v1481_v45  ;;  %v3126_v33 = vld [vmem:[%s6693_s3 + $0x358] sm:$0xff] }
 0x296   :  { %1805 = vmatmul.mubr.f32.gmra.mrb[90].mxu0 %v6179_v34  ;;  %v6201_v32 = vsel %vm234_vm7, %v1483_v49, %v6029_v16  ;;  %v6221_v16 = vsel %vm1433_vm8, %v5682_v60, %v1483_v49  ;;  %v3164_v60 = vld [vmem:[%s6693_s3 + $0x488] sm:$0xff]  ;;  %v3165_v49 = vld [vmem:[%s6693_s3 + $0x490] sm:$0xff] }
 0x297   :  { %1808 = vmatprep.mubr.f32.mxu0 %v6182_v15  ;;  %1950 = vmatmul.mubr.f32.gmra.mrb[94].mxu1 %v6036_v7 }
 0x298   :  { %2231 = vmatprep.mubr.f32.mxu1 %v5756_v56  ;;  %v3127_v56 = vld [vmem:[%s6693_s3 + $0x360] sm:$0xff] }
 0x299   :  { %v3919_v45 = vpack.c.bf16 %v3127_v56, %v3126_v33  ;;  %v3167_v56 = vld [vmem:[%s6693_s3 + $0x4a0] sm:$0xff] }
 0x29a   :  { %1809 = vmatmul.mubr.f32.gmra.mrb[92].mxu0 %v6196_v61 }
 0x29b   :  { %1812 = vmatprep.mubr.f32.mxu0 %v6201_v32  ;;  %2232 = vmatmul.mubr.f32.vlgmr.msra.gmra.mrb[96].mxu1 %v5759_v43  ;;  %v3144_v43 = vld [vmem:[%s6693_s3 + $0x3e8] sm:$0xff] }
 0x29c   :  { %2236 = vmatprep.mubr.f32.mxu1 %v5772_v59  ;;  %3952 = vmatpush3.bf16.msra.mxu1 %v6016_v3  ;;  %v3145_v59 = vld [vmem:[%s6693_s3 + $0x3f0] sm:$0xff]  ;;  %v3957_v3 = vpack.c.bf16 %v3163_v55, %v3162_v50  ;;  %v3128_v55 = vld [vmem:[%s6693_s3 + $0x368] sm:$0xff]  ;;  %v3146_v50 = vld [vmem:[%s6693_s3 + $0x3f8] sm:$0xff] }
 0x29d   :  { %3954 = vmatprep.subr.bf16.mxu1 %v3953_v28  ;;  %v3921_v42 = vpack.c.bf16 %v3145_v59, %v3144_v43  ;;  %v3925_v43 = vpack.c.bf16 %v3147_v58, %v3146_v50  ;;  %v3130_v59 = vld [vmem:[%s6693_s3 + $0x378] sm:$0xff] }
 0x29e   :  { %1813 = vmatmul.mubr.f32.gmra.mrb[94].mxu0 %v6221_v16 }
 0x29f   :  { %3639 = vmatprep.mubr.msk.f32.mxu0 %vm1653_vm11, %v5739_v31  ;;  %2237 = vmatmul.mubr.f32.gmra.mrb[98].mxu1 %v5791_v25  ;;  %v3129_v25 = vld [vmem:[%s6693_s3 + $0x370] sm:$0xff] }
 0x2a0   :  { %2241 = vmatprep.mubr.f32.mxu1 %v5831_v51  ;;  %3956 = vmatpush3.bf16.msra.mxu1 %v3953_v28  ;;  %v3961_v51 = vpack.c.bf16 %v3165_v49, %v3164_v60  ;;  %v3923_v33 = vpack.c.bf16 %v3129_v25, %v3128_v55  ;;  %v3166_v28 = vld [vmem:[%s6693_s3 + $0x498] sm:$0xff]  ;;  %v3148_v60 = vld [vmem:[%s6693_s3 + $0x408] sm:$0xff] }
 0x2a1   :  { %3958 = vmatprep.subr.bf16.mxu1 %v3957_v3  ;;  %v3965_v49 = vpack.c.bf16 %v3167_v56, %v3166_v28  ;;  %v3132_v55 = vld [vmem:[%s6693_s3 + $0x388] sm:$0xff]  ;;  %v3150_v25 = vld [vmem:[%s6693_s3 + $0x418] sm:$0xff] }
 0x2a2   :  { %3640 = vmatmul.mubr.msk.f32.vlgmr.msra.gmra.mrb[96].mxu0 %vm1653_vm11, %v5752_v5  ;;  %v3152_v28 = vld [vmem:[%s6693_s3 + $0x428] sm:$0xff] }
 0x2a3   :  { %3920 = vmatpush3.bf16.msra.mxu0 %v3919_v45  ;;  %3642 = vmatprep.mubr.msk.f32.mxu0 %vm1653_vm11, %v5741_v17  ;;  %v3131_v45 = vld [vmem:[%s6693_s3 + $0x380] sm:$0xff] }
 0x2a4   :  { %2242 = vmatmul.mubr.f32.gmra.mrb[100].mxu1 %v5835_v53  ;;  %3922 = vmatprep.subr.bf16.mxu0 %v3921_v42  ;;  %v3149_v53 = vld [vmem:[%s6693_s3 + $0x410] sm:$0xff]  ;;  %v3927_v42 = vpack.c.bf16 %v3131_v45, %v3130_v59  ;;  %v3154_v45 = vld [vmem:[%s6693_s3 + $0x438] sm:$0xff] }
 0x2a5   :  { %2246 = vmatprep.mubr.f32.mxu1 %v5858_v26  ;;  %3960 = vmatpush3.bf16.msra.mxu1 %v3957_v3  ;;  %v3929_v26 = vpack.c.bf16 %v3149_v53, %v3148_v60  ;;  %v3133_v3 = vld [vmem:[%s6693_s3 + $0x390] sm:$0xff]  ;;  %v6747_v60 = vmov 0.0|0.0  }
 0x2a6   :  { %3643 = vmatmul.mubr.msk.f32.gmra.mrb[98].mxu0 %vm1653_vm11, %v5815_v18  ;;  %3962 = vmatprep.subr.bf16.mxu1 %v3961_v51  ;;  %v3931_v50 = vpack.c.bf16 %v3133_v3, %v3132_v55  ;;  %v3137_v59 = vld [vmem:[%s6693_s3 + $0x3b0] sm:$0xff]  ;;  %v3140_v3 = vld [vmem:[%s6693_s3 + $0x3c8] sm:$0xff] }
 0x2a7   :  { %3924 = vmatpush3.bf16.msra.mxu0 %v3923_v33  ;;  %3645 = vmatprep.mubr.msk.f32.mxu0 %vm1653_vm11, %v5893_v35  ;;  %v3135_v33 = vld [vmem:[%s6693_s3 + $0x3a0] sm:$0xff] }
 0x2a8   :  { %2247 = vmatmul.mubr.f32.gmra.mrb[102].mxu1 %v5877_v40  ;;  %3926 = vmatprep.subr.bf16.mxu0 %v3925_v43  ;;  %v3151_v40 = vld [vmem:[%s6693_s3 + $0x420] sm:$0xff]  ;;  %v3136_v43 = vld [vmem:[%s6693_s3 + $0x3a8] sm:$0xff] }
 0x2a9   :  { %2251 = vmatprep.mubr.f32.mxu1 %v5917_v36  ;;  %3964 = vmatpush3.bf16.msra.mxu1 %v3961_v51  ;;  %v3168_v36 = vld [vmem:[%s6693_s3 + $0x4a8] sm:$0xff]  ;;  %v3933_v58 = vpack.c.bf16 %v3151_v40, %v3150_v25  ;;  %v3134_v51 = vld [vmem:[%s6693_s3 + $0x398] sm:$0xff]  ;;  %v3939_v53 = vpack.c.bf16 %v3137_v59, %v3136_v43  ;;  %v3141_v25 = vld [vmem:[%s6693_s3 + $0x3d0] sm:$0xff] }
 0x2aa   :  { %3646 = vmatmul.mubr.msk.f32.gmra.mrb[100].mxu0 %vm1653_vm11, %v5929_v48  ;;  %3966 = vmatprep.subr.bf16.mxu1 %v3965_v49  ;;  %v3935_v56 = vpack.c.bf16 %v3135_v33, %v3134_v51 }
 0x2ab   :  { %3928 = vmatpush3.bf16.msra.mxu0 %v3927_v42  ;;  %3648 = vmatprep.mubr.msk.f32.mxu0 %vm1653_vm11, %v5976_v23  ;;  %v3139_v42 = vld [vmem:[%s6693_s3 + $0x3c0] sm:$0xff] }
 0x2ac   :  { %2252 = vmatmul.mubr.f32.gmra.mrb[104].mxu1 %v5921_v11  ;;  %3930 = vmatprep.subr.bf16.mxu0 %v3929_v26  ;;  %v3153_v11 = vld [vmem:[%s6693_s3 + $0x430] sm:$0xff]  ;;  %v3156_v26 = vld [vmem:[%s6693_s3 + $0x448] sm:$0xff] }
 0x2ad   :  { %2255 = vmatprep.mubr.f32.mxu1 %v5949_v29  ;;  %3968 = vmatpush3.bf16.msra.mxu1 %v3965_v49  ;;  %v3937_v29 = vpack.c.bf16 %v3153_v11, %v3152_v28  ;;  %v3138_v49 = vld [vmem:[%s6693_s3 + $0x3b8] sm:$0xff] }
 0x2ae   :  { %3649 = vmatmul.mubr.msk.f32.gmra.mrb[102].mxu0 %vm1653_vm11, %v5976_v23  ;;  %3683 = vmatprep.subr.mxu1 %v3168_v36  ;;  %v3943_v55 = vpack.c.bf16 %v3139_v42, %v3138_v49 }
 0x2af   :  { %3932 = vmatpush3.bf16.msra.mxu0 %v3931_v50  ;;  %3651 = vmatprep.mubr.msk.f32.mxu0 %vm1653_vm11, %v5997_v52 }
 0x2b0   :  { %2256 = vmatmul.mubr.f32.gmra.mrb[106].mxu1 %v5960_v62  ;;  %3934 = vmatprep.subr.bf16.mxu0 %v3933_v58  ;;  %v3155_v62 = vld [vmem:[%s6693_s3 + $0x440] sm:$0xff] }
 0x2b1   :  { %2259 = vmatprep.mubr.f32.mxu1 %v6045_v0  ;;  %3684 = vmatpush3.msra.mxu1 %v3168_v36  ;;  %v3941_v0 = vpack.c.bf16 %v3155_v62, %v3154_v45 }
 0x2b2   :  { %3652 = vmatmul.mubr.msk.f32.gmra.mrb[104].mxu0 %vm1653_vm11, %v6018_v44  ;;  %4001 = vmatprep.subr.bf16.mxu1 %v6747_v60 }
 0x2b3   :  { %3936 = vmatpush3.bf16.msra.mxu0 %v3935_v56  ;;  %3654 = vmatprep.mubr.msk.f32.mxu0 %vm1653_vm11, %v6067_v22 }
 0x2b4   :  { %2260 = vmatmul.mubr.f32.gmra.mrb[108].mxu1 %v6049_v6  ;;  %3938 = vmatprep.subr.bf16.mxu0 %v3937_v29  ;;  %v3157_v6 = vld [vmem:[%s6693_s3 + $0x450] sm:$0xff] }
 0x2b5   :  { %2263 = vmatprep.mubr.f32.mxu1 %v6059_v54  ;;  %v3945_v54 = vpack.c.bf16 %v3157_v6, %v3156_v26 }
 0x2b6   :  { %3655 = vmatmul.mubr.msk.f32.gmra.mrb[106].mxu0 %vm1653_vm11, %v6087_v21 }
 0x2b7   :  { %3940 = vmatpush3.bf16.msra.mxu0 %v3939_v53  ;;  %3657 = vmatprep.mubr.msk.f32.mxu0 %vm1653_vm11, %v6108_v39 }
 0x2b8   :  { %2264 = vmatmul.mubr.f32.gmra.mrb[110].mxu1 %v6071_v57  ;;  %3942 = vmatprep.subr.bf16.mxu0 %v3941_v0  ;;  %v3947_v57 = vpack.c.bf16 %v3141_v25, %v3140_v3 }
 0x2b9   :  { %2267 = vmatprep.mubr.f32.mxu1 %v6083_v20  ;;  %v6763_v20 = vld [vmem:[#allocation20_spill] sm:$0xff] }
 0x2ba   :  { %3658 = vmatmul.mubr.msk.f32.gmra.mrb[108].mxu0 %vm1653_vm11, %v6128_v12 }
 0x2bb   :  { %3944 = vmatpush3.bf16.msra.mxu0 %v3943_v55  ;;  %3660 = vmatprep.mubr.msk.f32.mxu0 %vm1653_vm11, %v5976_v23 }
 0x2bc   :  { %2268 = vmatmul.mubr.f32.gmra.mrb[112].mxu1 %v6095_v30  ;;  %3946 = vmatprep.subr.bf16.mxu0 %v3945_v54  ;;  %v6755_v30 = vld [vmem:[#allocation12_spill] sm:$0xff] }
 0x2bd   :  { %2272 = vmatprep.mubr.f32.mxu1 %v6104_v4  ;;  %v6757_v4 = vld [vmem:[#allocation14_spill] sm:$0xff] }
 0x2be   :  { %3661 = vmatmul.mubr.msk.f32.gmra.mrb[110].mxu0 %vm1653_vm11, %v5976_v23 }
 0x2bf   :  { %3948 = vmatpush3.bf16.msra.mxu0 %v3947_v57  ;;  %2368 = vmatprep.mubr.f32.mxu0 %v5795_v63  ;;  %v6748_v63 = vld [vmem:[#allocation5_spill] sm:$0xff] }
 0x2c0   :  { %2273 = vmatmul.mubr.f32.gmra.mrb[114].mxu1 %v6112_v24 }
 0x2c1   :  { %2277 = vmatprep.mubr.f32.mxu1 %v6120_v14 }
 0x2c2   :  { %2369 = vmatmul.mubr.f32.vlgmr.msra.gmra.mrb[112].mxu0 %v5798_v1  ;;  %v6749_v1 = vld [vmem:[#allocation6_spill] sm:$0xff] }
 0x2c3   :  { %2373 = vmatprep.mubr.f32.mxu0 %v5820_v47  ;;  %v6750_v47 = vld [vmem:[#allocation7_spill] sm:$0xff] }
 0x2c4   :  { %2278 = vmatmul.mubr.f32.gmra.mrb[116].mxu1 %v6132_v2 }
 0x2c5   :  { %2282 = vmatprep.mubr.f32.mxu1 %v6140_v13 }
 0x2c6   :  { %2374 = vmatmul.mubr.f32.gmra.mrb[114].mxu0 %v5845_v27  ;;  %v6751_v27 = vld [vmem:[#allocation8_spill] sm:$0xff] }
 0x2c7   :  { %2378 = vmatprep.mubr.f32.mxu0 %v5888_v37  ;;  %v6752_v37 = vld [vmem:[#allocation9_spill] sm:$0xff] }
 0x2c8   :  { %2283 = vmatmul.mubr.f32.gmra.mrb[118].mxu1 %v6150_v38 }
 0x2c9   :  { %2287 = vmatprep.mubr.f32.mxu1 %v6153_v8  ;;  %v6765_v8 = vld [vmem:[#allocation22_spill] sm:$0xff] }
 0x2ca   :  { %2379 = vmatmul.mubr.f32.gmra.mrb[116].mxu0 %v5891_v41  ;;  %v6753_v41 = vld [vmem:[#allocation10_spill] sm:$0xff] }
 0x2cb   :  { %2383 = vmatprep.mubr.f32.mxu0 %v5906_v10  ;;  %v6754_v10 = vld [vmem:[#allocation11_spill] sm:$0xff] }
 0x2cc   :  { %2288 = vmatmul.mubr.f32.gmra.mrb[120].mxu1 %v6164_v19 }
 0x2cd   :  { %2291 = vmatprep.mubr.f32.mxu1 %v6167_v9 }
 0x2ce   :  { %2384 = vmatmul.mubr.f32.gmra.mrb[118].mxu0 %v6748_v63 }
 0x2cf   :  { %2388 = vmatprep.mubr.f32.mxu0 %v6749_v1 }
 0x2d0   :  { %2292 = vmatmul.mubr.f32.gmra.mrb[122].mxu1 %v6179_v34 }
 0x2d1   :  { %2295 = vmatprep.mubr.f32.mxu1 %v6182_v15 }
 0x2d2   :  { %2389 = vmatmul.mubr.f32.gmra.mrb[120].mxu0 %v6750_v47 }
 0x2d3   :  { %2392 = vmatprep.mubr.f32.mxu0 %v6751_v27 }
 0x2d4   :  { %2296 = vmatmul.mubr.f32.gmra.mrb[124].mxu1 %v6196_v61 }
 0x2d5   :  { %2299 = vmatprep.mubr.f32.mxu1 %v6201_v32 }
 0x2d6   :  { %2393 = vmatmul.mubr.f32.gmra.mrb[122].mxu0 %v6752_v37 }
 0x2d7   :  { %2396 = vmatprep.mubr.f32.mxu0 %v6753_v41 }
 0x2d8   :  { %2300 = vmatmul.mubr.f32.gmra.mrb[126].mxu1 %v6221_v16 }
 0x2d9   :  { %3685 = vmatprep.mubr.msk.f32.mxu1 %vm1653_vm11, %v5739_v31  ;;  %v6756_v31 = vld [vmem:[#allocation13_spill] sm:$0xff] }
 0x2da   :  { %2397 = vmatmul.mubr.f32.gmra.mrb[124].mxu0 %v6754_v10  ;;  %v2638_v10 = vld [vmem:[%s6695_s5 + $0x80] sm:$0xff] }
 0x2db   :  { %2400 = vmatprep.mubr.f32.mxu0 %v6026_v46 }
 0x2dc   :  { %3686 = vmatmul.mubr.msk.f32.vlgmr.msra.gmra.mrb[128].mxu1 %vm1653_vm11, %v5752_v5  ;;  %v6759_v5 = vld [vmem:[#allocation16_spill] sm:$0xff] }
 0x2dd   :  { %3688 = vmatprep.mubr.msk.f32.mxu1 %vm1653_vm11, %v5741_v17  ;;  %v6758_v17 = vld [vmem:[#allocation15_spill] sm:$0xff] }
 0x2de   :  { %2401 = vmatmul.mubr.f32.gmra.mrb[126].mxu0 %v6036_v7 }
 0x2df   :  { %2404 = vmatprep.mubr.f32.mxu0 %v6755_v30  ;;  %v2639_v30 = vld [vmem:[%s6695_s5 + $0x88] sm:$0xff] }
 0x2e0   :  { %3689 = vmatmul.mubr.msk.f32.gmra.mrb[130].mxu1 %vm1653_vm11, %v5815_v18  ;;  %v6760_v18 = vld [vmem:[#allocation17_spill] sm:$0xff] }
 0x2e1   :  { %3691 = vmatprep.mubr.msk.f32.mxu1 %vm1653_vm11, %v5893_v35  ;;  %v6761_v35 = vld [vmem:[#allocation18_spill] sm:$0xff] }
 0x2e2   :  { %2405 = vmatmul.mubr.f32.gmra.mrb[128].mxu0 %v6756_v31  ;;  %v2622_v31 = vld [vmem:[%s6695_s5] sm:$0xff] }
 0x2e3   :  { %2409 = vmatprep.mubr.f32.mxu0 %v6757_v4 }
 0x2e4   :  { %3692 = vmatmul.mubr.msk.f32.gmra.mrb[132].mxu1 %vm1653_vm11, %v5929_v48  ;;  %v6762_v48 = vld [vmem:[#allocation19_spill] sm:$0xff] }
 0x2e5   :  { %3694 = vmatprep.mubr.msk.f32.mxu1 %vm1653_vm11, %v5976_v23 }
 0x2e6   :  { %2410 = vmatmul.mubr.f32.gmra.mrb[130].mxu0 %v6758_v17  ;;  %v3969_v17 = vpack.c.bf16 %v2639_v30, %v2638_v10 }
 0x2e7   :  { %2414 = vmatprep.mubr.f32.mxu0 %v6759_v5  ;;  %v2623_v5 = vld [vmem:[%s6695_s5 + $0x8] sm:$0xff] }
 0x2e8   :  { %3695 = vmatmul.mubr.msk.f32.gmra.mrb[134].mxu1 %vm1653_vm11, %v5976_v23  ;;  %3970 = vmatprep.subr.bf16.mxu0 %v3969_v17 }
 0x2e9   :  { %3697 = vmatprep.mubr.msk.f32.mxu1 %vm1653_vm11, %v5997_v52  ;;  %v6764_v52 = vld [vmem:[#allocation21_spill] sm:$0xff] }
 0x2ea   :  { %2415 = vmatmul.mubr.f32.gmra.mrb[132].mxu0 %v6760_v18  ;;  %v2640_v18 = vld [vmem:[%s6695_s5 + $0x90] sm:$0xff] }
 0x2eb   :  { %2419 = vmatprep.mubr.f32.mxu0 %v6761_v35  ;;  %v2641_v35 = vld [vmem:[%s6695_s5 + $0x98] sm:$0xff] }
 0x2ec   :  { %3698 = vmatmul.mubr.msk.f32.gmra.mrb[136].mxu1 %vm1653_vm11, %v6018_v44  ;;  %v6766_v44 = vld [vmem:[#allocation23_spill] sm:$0xff] }
 0x2ed   :  { %3700 = vmatprep.mubr.msk.f32.mxu1 %vm1653_vm11, %v6067_v22  ;;  %v6767_v22 = vld [vmem:[#allocation24_spill] sm:$0xff] }
 0x2ee   :  { %2420 = vmatmul.mubr.f32.gmra.mrb[134].mxu0 %v6762_v48  ;;  %v3971_v48 = vpack.c.bf16 %v2623_v5, %v2622_v31 }
 0x2ef   :  { %2424 = vmatprep.mubr.f32.mxu0 %v6763_v20  ;;  %v3973_v20 = vpack.c.bf16 %v2641_v35, %v2640_v18 }
 0x2f0   :  { %3701 = vmatmul.mubr.msk.f32.gmra.mrb[138].mxu1 %vm1653_vm11, %v6087_v21  ;;  %3972 = vmatpush3.bf16.msra.mxu0 %v3971_v48 }
 0x2f1   :  { %3703 = vmatprep.mubr.msk.f32.mxu1 %vm1653_vm11, %v6108_v39  ;;  %3974 = vmatprep.subr.bf16.mxu0 %v3973_v20  ;;  %v2632_v20 = vld [vmem:[%s6695_s5 + $0x50] sm:$0xff] }
 0x2f2   :  { %2425 = vmatmul.mubr.f32.gmra.mrb[136].mxu0 %v6764_v52  ;;  %v2624_v52 = vld [vmem:[%s6695_s5 + $0x10] sm:$0xff] }
 0x2f3   :  { %2428 = vmatprep.mubr.f32.mxu0 %v6765_v8  ;;  %v2625_v8 = vld [vmem:[%s6695_s5 + $0x18] sm:$0xff] }
 0x2f4   :  { %3704 = vmatmul.mubr.msk.f32.gmra.mrb[140].mxu1 %vm1653_vm11, %v6128_v12 }
 0x2f5   :  { %3706 = vmatprep.mubr.msk.f32.mxu1 %vm1653_vm11, %v5976_v23 }
 0x2f6   :  { %2429 = vmatmul.mubr.f32.gmra.mrb[138].mxu0 %v6766_v44  ;;  %v2642_v44 = vld [vmem:[%s6695_s5 + $0xa0] sm:$0xff] }
 0x2f7   :  { %2432 = vmatprep.mubr.f32.mxu0 %v6026_v46 }
 0x2f8   :  { %3707 = vmatmul.mubr.msk.f32.gmra.mrb[142].mxu1 %vm1653_vm11, %v5976_v23 }
 0x2fa   :  { %2433 = vmatmul.mubr.f32.gmra.mrb[140].mxu0 %v6767_v22 }
 0x2fb   :  { %2436 = vmatprep.mubr.f32.mxu0 %v6026_v46 }
 0x2fe   :  { %2437 = vmatmul.mubr.f32.gmra.mrb[142].mxu0 %v6036_v7 }
 0x324   :  { %v3223_v21 = vpop.f32.mrb[64].mxu0 }
 0x325   :  { %v3224_v39 = vpop.f32.mrb[65].mxu0 }
 0x326   :  { %v3225_v24 = vadd.f32 %v3224_v39, %v3223_v21  ;;  %v2643_v39 = vld [vmem:[%s6695_s5 + $0xa8] sm:$0xff] }
 0x328   :  { %v3226_v14 = vpop.f32.mrb[66].mxu0 }
 0x329   :  { %v3227_v12 = vpop.f32.mrb[67].mxu0  ;;  %v3303_v2 = vpop.f32.mrb[64].mxu1 }
 0x32a   :  { %v3228_v13 = vadd.f32 %v3227_v12, %v3226_v14  ;;  %v3304_v38 = vpop.f32.mrb[65].mxu1  ;;  %v3975_v12 = vpack.c.bf16 %v2625_v8, %v2624_v52  ;;  %v2633_v52 = vld [vmem:[%s6695_s5 + $0x58] sm:$0xff]  ;;  %v2650_v8 = vld [vmem:[%s6695_s5 + $0xe0] sm:$0xff] }
 0x32b   :  { %v3305_v19 = vadd.f32 %v3304_v38, %v3303_v2  ;;  %v3977_v38 = vpack.c.bf16 %v2643_v39, %v2642_v44  ;;  %v2651_v44 = vld [vmem:[%s6695_s5 + $0xe8] sm:$0xff] }
 0x32c   :  { %3976 = vmatpush3.bf16.msra.mxu0 %v3975_v12 }
 0x32d   :  { %v3229_v9 = vpop.f32.mrb[68].mxu0  ;;  %v3306_v34 = vpop.f32.mrb[66].mxu1  ;;  %v6449_v15 = vadd.f32 %v3305_v19, %v3225_v24  ;;  %v2626_v19 = vld [vmem:[%s6695_s5 + $0x20] sm:$0xff]  ;;  %3978 = vmatprep.subr.bf16.mxu0 %v3977_v38  ;;  %v2635_v38 = vld [vmem:[%s6695_s5 + $0x68] sm:$0xff] }
 0x32e   :  { %v3230_v23 = vpop.f32.mrb[69].mxu0  ;;  %v3307_v61 = vpop.f32.mrb[67].mxu1 }
 0x32f   :  { %v3231_v32 = vadd.f32 %v3230_v23, %v3229_v9  ;;  %v3308_v16 = vadd.f32 %v3307_v61, %v3306_v34  ;;  %v2627_v9 = vld [vmem:[%s6695_s5 + $0x28] sm:$0xff]  ;;  %v2644_v34 = vld [vmem:[%s6695_s5 + $0xb0] sm:$0xff]  ;;  %v2645_v23 = vld [vmem:[%s6695_s5 + $0xb8] sm:$0xff] }
 0x330   :  { %v2654_v61 = vld [vmem:[%s6695_s5 + $0x100] sm:$0xff] }
 0x331   :  { %v3232_v46 = vpop.f32.mrb[70].mxu0  ;;  %v6451_v40 = vadd.f32 %v3308_v16, %v3228_v13 }
 0x332   :  { %v3233_v7 = vpop.f32.mrb[71].mxu0 }
 0x333   :  { %v3234_v50 = vadd.f32 %v3233_v7, %v3232_v46  ;;  %v2655_v7 = vld [vmem:[%s6695_s5 + $0x108] sm:$0xff] }
 0x334   :  { %v3309_v36 = vpop.f32.mrb[68].mxu1 }
 0x335   :  { %v3310_v58 = vpop.f32.mrb[69].mxu1 }
 0x336   :  { %v3311_v51 = vadd.f32 %v3310_v58, %v3309_v36  ;;  %v3979_v58 = vpack.c.bf16 %v2627_v9, %v2626_v19 }
 0x338   :  { %v3235_v33 = vpop.f32.mrb[72].mxu0  ;;  %v3312_v28 = vpop.f32.mrb[70].mxu1  ;;  %v6453_v11 = vadd.f32 %v3311_v51, %v3231_v32  ;;  %v4002_v51 = vpack.c.bf16 %v2655_v7, %v2654_v61  ;;  %3980 = vmatpush3.bf16.msra.mxu0 %v3979_v58 }
 0x339   :  { %v3236_v56 = vpop.f32.mrb[73].mxu0  ;;  %v3313_v29 = vpop.f32.mrb[71].mxu1  ;;  %v2656_v33 = vld [vmem:[%s6695_s5 + $0x110] sm:$0xff] }
 0x33a   :  { %v3314_v43 = vadd.f32 %v3313_v29, %v3312_v28  ;;  %v3981_v29 = vpack.c.bf16 %v2645_v23, %v2644_v34  ;;  %4003 = vmatpush3.bf16.msra.mxu1 %v4002_v51 }
 0x33b   :  { %4004 = vmatprep.subr.bf16.mxu1 %v6747_v60 }
 0x33c   :  { %v3238_v59 = vpop.f32.mrb[74].mxu0  ;;  %v6455_v45 = vadd.f32 %v3314_v43, %v3234_v50  ;;  %v2628_v43 = vld [vmem:[%s6695_s5 + $0x30] sm:$0xff]  ;;  %3982 = vmatprep.subr.bf16.mxu0 %v3981_v29 }
 0x33d   :  { %v3239_v62 = vpop.f32.mrb[75].mxu0  ;;  %v3315_v53 = vpop.f32.mrb[72].mxu1  ;;  %v2629_v59 = vld [vmem:[%s6695_s5 + $0x38] sm:$0xff] }
 0x33e   :  { %v3316_v0 = vpop.f32.mrb[73].mxu1  ;;  %v2657_v62 = vld [vmem:[%s6695_s5 + $0x118] sm:$0xff]  ;;  %v2646_v53 = vld [vmem:[%s6695_s5 + $0xc0] sm:$0xff] }
 0x33f   :  { %v2647_v0 = vld [vmem:[%s6695_s5 + $0xc8] sm:$0xff] }
 0x341   :  { %v3318_v49 = vpop.f32.mrb[74].mxu1 }
 0x342   :  { %v3319_v42 = vpop.f32.mrb[75].mxu1  ;;  %v4005_v49 = vpack.c.bf16 %v2657_v62, %v2656_v33 }
 0x344   :  { %4006 = vmatpush3.bf16.msra.mxu1 %v4005_v49 }
 0x345   :  { %v3321_v26 = vpop.f32.mrb[76].mxu1  ;;  %4007 = vmatprep.subr.bf16.mxu1 %v6747_v60 }
 0x346   :  { %v3322_v6 = vpop.f32.mrb[77].mxu1 }
 0x349   :  { %v3324_v55 = vpop.f32.mrb[78].mxu1 }
 0x34a   :  { %v3325_v54 = vpop.f32.mrb[79].mxu1  ;;  %v2658_v55 = vld [vmem:[%s6695_s5 + $0x120] sm:$0xff] }
 0x34b   :  { %v2659_v54 = vld [vmem:[%s6695_s5 + $0x128] sm:$0xff] }
 0x34c   :  { %v4008_v10 = vpack.c.bf16 %v2659_v54, %v2658_v55 }
 0x34d   :  { %v3241_v3 = vpop.f32.mrb[76].mxu0  ;;  %v3327_v25 = vpop.f32.mrb[80].mxu1 }
 0x34e   :  { %v3242_v57 = vpop.f32.mrb[77].mxu0  ;;  %v3328_v63 = vpop.f32.mrb[81].mxu1  ;;  %4009 = vmatpush3.bf16.msra.mxu1 %v4008_v10 }
 0x34f   :  { %v3329_v1 = vadd.f32 %v3328_v63, %v3327_v25  ;;  %v3983_v57 = vpack.c.bf16 %v2629_v59, %v2628_v43  ;;  %4010 = vmatprep.subr.bf16.mxu1 %v6747_v60 }
 0x351   :  { %v3244_v47 = vpop.f32.mrb[78].mxu0  ;;  %v3330_v27 = vpop.f32.mrb[82].mxu1  ;;  %3984 = vmatpush3.bf16.msra.mxu0 %v3983_v57 }
 0x352   :  { %v3245_v37 = vpop.f32.mrb[79].mxu0  ;;  %v3331_v41 = vpop.f32.mrb[83].mxu1  ;;  %v2630_v47 = vld [vmem:[%s6695_s5 + $0x40] sm:$0xff] }
 0x353   :  { %v3332_v4 = vadd.f32 %v3331_v41, %v3330_v27  ;;  %v2631_v27 = vld [vmem:[%s6695_s5 + $0x48] sm:$0xff]  ;;  %v2648_v37 = vld [vmem:[%s6695_s5 + $0xd0] sm:$0xff]  ;;  %v2649_v41 = vld [vmem:[%s6695_s5 + $0xd8] sm:$0xff] }
 0x354   :  { %v3987_v5 = vpack.c.bf16 %v2631_v27, %v2630_v47  ;;  %v3989_v48 = vpack.c.bf16 %v2649_v41, %v2648_v37 }
 0x355   :  { %v3247_v22 = vpop.f32.mrb[80].mxu0  ;;  %v3333_v21 = vpop.f32.mrb[84].mxu1 }
 0x356   :  { %v3248_v24 = vpop.f32.mrb[81].mxu0  ;;  %v3334_v14 = vpop.f32.mrb[85].mxu1 }
 0x357   :  { %v3249_v2 = vadd.f32 %v3248_v24, %v3247_v22  ;;  %v3335_v13 = vadd.f32 %v3334_v14, %v3333_v21  ;;  %v3991_v14 = vpack.c.bf16 %v2633_v52, %v2632_v20 }
 0x359   :  { %v3250_v32 = vpop.f32.mrb[82].mxu0  ;;  %v3336_v16 = vpop.f32.mrb[86].mxu1  ;;  %v6502_v46 = vadd.f32 %v3329_v1, %v3249_v2  ;;  %v3985_v1 = vpack.c.bf16 %v2647_v0, %v2646_v53  ;;  %v3993_v2 = vpack.c.bf16 %v2651_v44, %v2650_v8 }
 0x35a   :  { %v3251_v50 = vpop.f32.mrb[83].mxu0  ;;  %v3337_v36 = vpop.f32.mrb[87].mxu1 }
 0x35b   :  { %v3252_v28 = vadd.f32 %v3251_v50, %v3250_v32  ;;  %v3338_v56 = vadd.f32 %v3337_v36, %v3336_v16  ;;  %3986 = vmatprep.subr.bf16.mxu0 %v3985_v1 }
 0x35c   :  { %3988 = vmatpush3.bf16.msra.mxu0 %v3987_v5 }
 0x35d   :  { %v3253_v42 = vpop.f32.mrb[84].mxu0  ;;  %v3339_v26 = vpop.f32.mrb[88].mxu1  ;;  %v6525_v6 = vadd.f32 %v3332_v4, %v3252_v28  ;;  %3990 = vmatprep.subr.bf16.mxu0 %v3989_v48 }
 0x35e   :  { %v3254_v3 = vpop.f32.mrb[85].mxu0  ;;  %v3340_v25 = vpop.f32.mrb[89].mxu1 }
 0x35f   :  { %v3255_v63 = vadd.f32 %v3254_v3, %v3253_v42 }
 0x360   :  { %3992 = vmatpush3.bf16.msra.mxu0 %v3991_v14 }
 0x361   :  { %v3256_v30 = vpop.f32.mrb[86].mxu0  ;;  %v6546_v31 = vadd.f32 %v3335_v13, %v3255_v63  ;;  %v2634_v13 = vld [vmem:[%s6695_s5 + $0x60] sm:$0xff]  ;;  %3994 = vmatprep.subr.bf16.mxu0 %v3993_v2 }
 0x362   :  { %v3257_v4 = vpop.f32.mrb[87].mxu0  ;;  %v3342_v17 = vpop.f32.mrb[90].mxu1  ;;  %v3995_v23 = vpack.c.bf16 %v2635_v38, %v2634_v13 }
 0x363   :  { %v3258_v18 = vadd.f32 %v3257_v4, %v3256_v30  ;;  %v3343_v35 = vpop.f32.mrb[91].mxu1 }
 0x364   :  { %3996 = vmatpush3.bf16.msra.mxu0 %v3995_v23 }
 0x365   :  { %v3259_v22 = vpop.f32.mrb[88].mxu0  ;;  %v1935_v21 = vadd.f32 %v3338_v56, %v3258_v18 }
 0x366   :  { %v3260_v39 = vpop.f32.mrb[89].mxu0  ;;  %v3345_v24 = vpop.f32.mrb[92].mxu1 }
 0x367   :  { %v3346_v12 = vpop.f32.mrb[93].mxu1 }
 0x369   :  { %v3262_v19 = vpop.f32.mrb[90].mxu0 }
 0x36a   :  { %v3263_v9 = vpop.f32.mrb[91].mxu0  ;;  %v3348_v34 = vpop.f32.mrb[94].mxu1 }
 0x36b   :  { %v3349_v61 = vpop.f32.mrb[95].mxu1 }
 0x36d   :  { %v3265_v32 = vpop.f32.mrb[92].mxu0 }
 0x36e   :  { %v3266_v16 = vpop.f32.mrb[93].mxu0  ;;  %v3410_v7 = vpop.f32.mrb[96].mxu1 }
 0x36f   :  { %v3411_v50 = vpop.f32.mrb[97].mxu1 }
 0x370   :  { %v3412_v36 = vadd.f32 %v3411_v50, %v3410_v7 }
 0x371   :  { %v3268_v58 = vpop.f32.mrb[94].mxu0 }
 0x372   :  { %v3269_v51 = vpop.f32.mrb[95].mxu0  ;;  %v3413_v33 = vpop.f32.mrb[98].mxu1 }
 0x373   :  { %v3414_v28 = vpop.f32.mrb[99].mxu1 }
 0x374   :  { %v3415_v56 = vadd.f32 %v3414_v28, %v3413_v33 }
 0x375   :  { %v3641_v29 = vpop.f32.mrb[96].mxu0 }
 0x376   :  { %v6569_v43 = vadd.f32 %v3641_v29, %v6451_v40  ;;  %v2020_v59 = vpop.f32.mrb[97].mxu0 }
 0x377   :  { %v6572_v62 = vadd.f32 %v2020_v59, %v6449_v15  ;;  %v3416_v53 = vpop.f32.mrb[100].mxu1 }
 0x378   :  { %v3417_v0 = vpop.f32.mrb[101].mxu1 }
 0x379   :  { %v3418_v49 = vadd.f32 %v3417_v0, %v3416_v53  ;;  %v3644_v42 = vpop.f32.mrb[98].mxu0 }
 0x37a   :  { %v6575_v26 = vadd.f32 %v3644_v42, %v6455_v45  ;;  %v2030_v55 = vpop.f32.mrb[99].mxu0 }
 0x37b   :  { %v6578_v54 = vadd.f32 %v2030_v55, %v6453_v11  ;;  %v3419_v3 = vpop.f32.mrb[102].mxu1 }
 0x37c   :  { %v3420_v25 = vpop.f32.mrb[103].mxu1 }
 0x37d   :  { %v3421_v57 = vadd.f32 %v3420_v25, %v3419_v3  ;;  %v3647_v40 = vpop.f32.mrb[100].mxu0 }
 0x37e   :  { %v2040_v63 = vpop.f32.mrb[101].mxu0 }
 0x37f   :  { %v3422_v1 = vpop.f32.mrb[104].mxu1 }
 0x380   :  { %v3423_v47 = vpop.f32.mrb[105].mxu1 }
 0x381   :  { %v3650_v15 = vpop.f32.mrb[102].mxu0 }
 0x382   :  { %v2048_v27 = vpop.f32.mrb[103].mxu0 }
 0x383   :  { %v3425_v37 = vpop.f32.mrb[106].mxu1 }
 0x384   :  { %v3426_v41 = vpop.f32.mrb[107].mxu1 }
 0x385   :  { %v3653_v10 = vpop.f32.mrb[104].mxu0 }
 0x386   :  { %v6581_v30 = vadd.f32 %v3653_v10, %v6525_v6  ;;  %v2056_v45 = vpop.f32.mrb[105].mxu0 }
 0x387   :  { %v6584_v4 = vadd.f32 %v2056_v45, %v6502_v46  ;;  %v3428_v11 = vpop.f32.mrb[108].mxu1 }
 0x388   :  { %v3429_v17 = vpop.f32.mrb[109].mxu1 }
 0x389   :  { %v3656_v5 = vpop.f32.mrb[106].mxu0 }
 0x38a   :  { %v6586_v18 = vadd.f32 %v3656_v5, %v1935_v21  ;;  %v2066_v35 = vpop.f32.mrb[107].mxu0 }
 0x38b   :  { %v6589_v48 = vadd.f32 %v2066_v35, %v6546_v31  ;;  %v3431_v20 = vpop.f32.mrb[110].mxu1 }
 0x38c   :  { %v3432_v52 = vpop.f32.mrb[111].mxu1 }
 0x38d   :  { %v3659_v8 = vpop.f32.mrb[108].mxu0 }
 0x38e   :  { %v2076_v44 = vpop.f32.mrb[109].mxu0 }
 0x38f   :  { %v3434_v22 = vpop.f32.mrb[112].mxu1 }
 0x390   :  { %v3435_v6 = vpop.f32.mrb[113].mxu1 }
 0x391   :  { %v3436_v39 = vadd.f32 %v3435_v6, %v3434_v22  ;;  %v3662_v24 = vpop.f32.mrb[110].mxu0 }
 0x392   :  { %v2084_v14 = vpop.f32.mrb[111].mxu0 }
 0x393   :  { %v3437_v46 = vpop.f32.mrb[114].mxu1 }
 0x394   :  { %v3438_v12 = vpop.f32.mrb[115].mxu1 }
 0x395   :  { %v6591_v2 = vadd.f32 %v3438_v12, %v3437_v46  ;;  %v3490_v13 = vpop.f32.mrb[112].mxu0 }
 0x396   :  { %v3491_v21 = vpop.f32.mrb[113].mxu0 }
 0x397   :  { %v3440_v38 = vpop.f32.mrb[116].mxu1  ;;  %v3492_v19 = vadd.f32 %v3491_v21, %v3490_v13 }
 0x398   :  { %v3441_v9 = vpop.f32.mrb[117].mxu1 }
 0x399   :  { %v6593_v31 = vadd.f32 %v3441_v9, %v3440_v38  ;;  %v3493_v34 = vpop.f32.mrb[114].mxu0  ;;  %v2371_v23 = vadd.f32 %v3492_v19, %v3412_v36 }
 0x39a   :  { %v3494_v61 = vpop.f32.mrb[115].mxu0 }
 0x39b   :  { %v3443_v32 = vpop.f32.mrb[118].mxu1  ;;  %v3495_v16 = vadd.f32 %v3494_v61, %v3493_v34 }
 0x39c   :  { %v3444_v7 = vpop.f32.mrb[119].mxu1 }
 0x39d   :  { %v6595_v50 = vadd.f32 %v3444_v7, %v3443_v32  ;;  %v3496_v58 = vpop.f32.mrb[116].mxu0  ;;  %v2376_v51 = vadd.f32 %v3495_v16, %v3415_v56  ;;  %v2652_v32 = vld [vmem:[%s6695_s5 + $0xf0] sm:$0xff] }
 0x39e   :  { %v3497_v33 = vpop.f32.mrb[117].mxu0  ;;  %v2636_v16 = vld [vmem:[%s6695_s5 + $0x70] sm:$0xff] }
 0x39f   :  { %v3446_v28 = vpop.f32.mrb[120].mxu1  ;;  %v3498_v29 = vadd.f32 %v3497_v33, %v3496_v58  ;;  %v2637_v58 = vld [vmem:[%s6695_s5 + $0x78] sm:$0xff] }
 0x3a0   :  { %v3447_v59 = vpop.f32.mrb[121].mxu1  ;;  %v3999_v33 = vpack.c.bf16 %v2637_v58, %v2636_v16  ;;  %v2660_v28 = vld [vmem:[%s6695_s5 + $0x130] sm:$0xff] }
 0x3a1   :  { %v3499_v53 = vpop.f32.mrb[118].mxu0  ;;  %v2381_v0 = vadd.f32 %v3498_v29, %v3418_v49  ;;  %v2661_v29 = vld [vmem:[%s6695_s5 + $0x138] sm:$0xff] }
 0x3a2   :  { %v3500_v42 = vpop.f32.mrb[119].mxu0 }
 0x3a3   :  { %v3449_v55 = vpop.f32.mrb[122].mxu1  ;;  %v3501_v3 = vadd.f32 %v3500_v42, %v3499_v53 }
 0x3a4   :  { %v3450_v25 = vpop.f32.mrb[123].mxu1 }
 0x3a5   :  { %v3502_v40 = vpop.f32.mrb[120].mxu0  ;;  %v2386_v36 = vadd.f32 %v3501_v3, %v3421_v57 }
 0x3a6   :  { %v3503_v63 = vpop.f32.mrb[121].mxu0 }
 0x3a7   :  { %v3452_v1 = vpop.f32.mrb[124].mxu1 }
 0x3a8   :  { %v3453_v47 = vpop.f32.mrb[125].mxu1 }
 0x3a9   :  { %v3505_v15 = vpop.f32.mrb[122].mxu0 }
 0x3aa   :  { %v3506_v27 = vpop.f32.mrb[123].mxu0  ;;  %v6768_v15 = vmov 0.0  }
 0x3ab   :  { %v3455_v37 = vpop.f32.mrb[126].mxu1  ;;  %3725 = vmatprep.mubr.msk.f32.mxu1 %vm4407_vm12, %v6768_v15 }
 0x3ac   :  { %v3456_v41 = vpop.f32.mrb[127].mxu1 }
 0x3ad   :  { %v3508_v56 = vpop.f32.mrb[124].mxu0 }
 0x3ae   :  { %v3509_v10 = vpop.f32.mrb[125].mxu0 }
 0x3af   :  { %v3687_v45 = vpop.f32.mrb[128].mxu1 }
 0x3b0   :  { %v2513_v11 = vadd.f32 %v3687_v45, %v2376_v51  ;;  %v2507_v17 = vpop.f32.mrb[129].mxu1 }
 0x3b1   :  { %v2508_v5 = vadd.f32 %v2507_v17, %v2371_v23  ;;  %v3511_v49 = vpop.f32.mrb[126].mxu0 }
 0x3b2   :  { %v2579_v35 = vmax.f32 %v6569_v43, %v2513_v11  ;;  %v3512_v20 = vpop.f32.mrb[127].mxu0 }
 0x3b3   :  { %v2578_v52 = vmax.f32 %v6572_v62, %v2508_v5  ;;  %v3690_v57 = vpop.f32.mrb[130].mxu1 }
 0x3b4   :  { %v6599_v8 = vadd.f32 %v3690_v57, %v2386_v36  ;;  %v2517_v44 = vpop.f32.mrb[131].mxu1  ;;  %v3185_v36 = vld [vmem:[%s6694_s4] ss:$0 sm:$0xff]  ;;  %s4408_s4 = smov 80  }
 0x3b5   :  { %v2518_v22 = vadd.f32 %v2517_v44, %v2381_v0  ;;  %v3514_v6 = vpop.f32.mrb[128].mxu0  ;;  %v4011_v0 = vpack.c.bf16 %v2661_v29, %v2660_v28  ;;  %v3186_v28 = vld [vmem:[%s6696_s6] ss:$0 sm:$0xff]  ;;  %s4410_s6 = smov [#allocation2]  }
 0x3b6   :  { %v2581_v24 = vmax.f32 %v6575_v26, %v6599_v8  ;;  %v3515_v14 = vpop.f32.mrb[129].mxu0  ;;  %v2815_v26 = vld [vmem:[%s6697_s7] sm:$0xff]  ;;  %v2816_v8 = vld [vmem:[%s6697_s7 + $0x8] sm:$0xff] }
 0x3b7   :  { %v2580_v46 = vmax.f32 %v6578_v54, %v2518_v22  ;;  %v3516_v12 = vadd.f32 %v3515_v14, %v3514_v6  ;;  %v3693_v13 = vpop.f32.mrb[132].mxu1  ;;  %v2653_v54 = vld [vmem:[%s6695_s5 + $0xf8] sm:$0xff]  ;;  %4012 = vmatpush3.bf16.msra.mxu1 %v4011_v0  ;;  %s4409_s5 = smov 32  }
 0x3b8   :  { %v2527_v21 = vpop.f32.mrb[133].mxu1  ;;  %v3997_v7 = vpack.c.bf16 %v2653_v54, %v2652_v32  ;;  %v2817_v32 = vld [vmem:[%s6697_s7 + $0x10] sm:$0xff]  ;;  %v2818_v54 = vld [vmem:[%s6697_s7 + $0x18] sm:$0xff] }
 0x3b9   :  { %v3517_v38 = vpop.f32.mrb[130].mxu0  ;;  %v2407_v43 = vadd.f32 %v3516_v12, %v3436_v39  ;;  %v4017_v16 = vpack.c.bf16 %v2818_v54, %v2817_v32 }
 0x3ba   :  { %v3518_v19 = vpop.f32.mrb[131].mxu0  ;;  %3998 = vmatprep.subr.bf16.mxu0 %v3997_v7  ;;  %v2820_v7 = vld [vmem:[%s6697_s7 + $0x28] sm:$0xff] }
 0x3bb   :  { %v3519_v9 = vadd.f32 %v3518_v19, %v3517_v38  ;;  %v3696_v62 = vpop.f32.mrb[134].mxu1  ;;  %4000 = vmatpush3.bf16.msra.mxu0 %v3999_v33 }
 0x3bc   :  { %v2535_v34 = vpop.f32.mrb[135].mxu1  ;;  %4013 = vmatprep.subr.bf16.mxu0 %v6747_v60 }
 0x3bd   :  { %v3520_v23 = vpop.f32.mrb[132].mxu0  ;;  %v2412_v61 = vadd.f32 %v3519_v9, %v6591_v2  ;;  %v4014_v34 = vpack.c.bf16 %v2816_v8, %v2815_v26 }
 0x3be   :  { %v3521_v39 = vpop.f32.mrb[133].mxu0 }
 0x3bf   :  { %v3522_v51 = vadd.f32 %v3521_v39, %v3520_v23  ;;  %v3699_v2 = vpop.f32.mrb[136].mxu1  ;;  %v2819_v39 = vld [vmem:[%s6697_s7 + $0x20] sm:$0xff] }
 0x3c0   :  { %v2549_v59 = vadd.f32 %v3699_v2, %v2412_v61  ;;  %v2543_v53 = vpop.f32.mrb[137].mxu1  ;;  %v4020_v58 = vpack.c.bf16 %v2820_v7, %v2819_v39 }
 0x3c1   :  { %v2544_v42 = vadd.f32 %v2543_v53, %v2407_v43  ;;  %v3523_v55 = vpop.f32.mrb[134].mxu0  ;;  %v2417_v3 = vadd.f32 %v3522_v51, %v6593_v31  ;;  %v2821_v51 = vld [vmem:[%s6697_s7 + $0x30] sm:$0x3]  ;;  %s2927_s7 = sshll.u32 %s4410_s6, 4  ;;  %s2928_s7 = int_to_ptr.vmem [resolvable:$true] %s2927_s7 }
 0x3c2   :  { %v2583_v25 = vmax.f32 %v6581_v30, %v2549_v59  ;;  %v3524_v40 = vpop.f32.mrb[135].mxu0  ;;  %s4373_s2 = scalar_lea.vmem %s2928_s7, 128  ;;  %p4378_p1 = scmp.lt.s32.totalorder %s2928_s7, %s2928_s7 }
 0x3c3   :  { %v2582_v63 = vmax.f32 %v6584_v4, %v2544_v42  ;;  %v3525_v1 = vadd.f32 %v3524_v40, %v3523_v55  ;;  %v3702_v47 = vpop.f32.mrb[138].mxu1  ;;  %v3188_v55 = vld [vmem:[%s6698_s8] ss:$0 sm:$0xff]  ;;  %p4374_p0 = scmp.ne.s32.totalorder %s2928_s7, %s4373_s2  ;;  %p4379_p2 = scmp.lt.s32.totalorder %s4373_s2, %s4373_s2 }
 0x3c4   :  { %v2587_v31 = vmax.f32 %v2579_v35, %v2583_v25  ;;  %v2553_v27 = vpop.f32.mrb[139].mxu1 }
 0x3c5   :  { %v2586_v37 = vmax.f32 %v2578_v52, %v2582_v63  ;;  %v2422_v30 = vadd.f32 %v3525_v1, %v6595_v50  ;;  %v2554_v41 = vadd.f32 %v2553_v27, %v2417_v3  ;;  %v3526_v56 = vpop.f32.mrb[136].mxu0  ;;  %p4380_p3 = por %p4379_p2, %p4378_p1 }
 0x3c6   :  { %v2598_v10 = vadd.f32 %v3185_v36, %v2587_v31  ;;  %v3527_v45 = vpop.f32.mrb[137].mxu0 }
 0x3c7   :  { %v2597_v11 = vadd.f32 %v3185_v36, %v2586_v37  ;;  %v2559_v17 = vadd.f32 %v3702_v47, %v2422_v30  ;;  %v2584_v5 = vmax.f32 %v6589_v48, %v2554_v41  ;;  %v3705_v4 = vpop.f32.mrb[140].mxu1  ;;  %p4381_p4 = pnand %p4380_p3, %p4374_p0 }
 0x3c8   :  { %v2602_v49 = vmax.f32 %v2598_v10, 0.0  ;;  %v2563_v20 = vpop.f32.mrb[141].mxu1 }
 0x3c9   :  { %v2585_v57 = vmax.f32 %v6586_v18, %v2559_v17  ;;  %v2588_v44 = vmax.f32 %v2580_v46, %v2584_v5  ;;  %v3529_v22 = vpop.f32.mrb[138].mxu0  ;;  %v2601_v19 = vmax.f32 %v2597_v11, 0.0 }
 0x3ca   :  { %2606 = vrot.lane.b32.xlu1 %v2602_v49, %s4408_s4  ;;  %v3530_v35 = vpop.f32.mrb[139].mxu0 }
 0x3cb   :  { %v2589_v50 = vmax.f32 %v2581_v24, %v2585_v57  ;;  %v2599_v52 = vadd.f32 %v3185_v36, %v2588_v44  ;;  %v3708_v6 = vpop.f32.mrb[142].mxu1 }
 0x3cc   :  { %v2571_v14 = vpop.f32.mrb[143].mxu1 }
 0x3cd   :  { %v2600_v12 = vadd.f32 %v3185_v36, %v2589_v50  ;;  %v2603_v13 = vmax.f32 %v2599_v52, 0.0  ;;  %v3532_v48 = vpop.f32.mrb[140].mxu0 }
 0x3ce   :  { %v3533_v21 = vpop.f32.mrb[141].mxu0 }
 0x3cf   :  { %v2604_v38 = vmax.f32 %v2600_v12, 0.0  ;;  %2610 = vrot.lane.b32.xlu0 %v2603_v13, %s4409_s5 }
 0x3d1   :  { %v3535_v18 = vpop.f32.mrb[142].mxu0  ;;  %2614 = vrot.lane.b32.xlu1 %v2604_v38, %s4400_s13 }
 0x3d2   :  { %v3536_v46 = vpop.f32.mrb[143].mxu0 }
 0x43c   :  { %v2607_v43 = vpop.permute.xlu1 %2606 }
 0x43d   :  { %v2618_v61 = vsel %vm2617_vm15, %v2601_v19, %v2607_v43 }
 0x441   :  { %v2611_v24 = vpop.permute.xlu0 %2610 }
 0x442   :  { %v2620_v9 = vsel %vm2619_vm13, %v2607_v43, %v2611_v24 }
 0x443   :  { %v2615_v62 = vpop.permute.xlu1 %2614 }
 0x444   :  { %3726 = vmatmul.mubr.msk.f32.vlgmr.msra.gmra.mrb[144].mxu1 %vm2669_vm14, %v2615_v62  ;;  %v2621_v23 = vsel %vm234_vm7, %v2620_v9, %v2615_v62 }
 0x445   :  { %2736 = vmatprep.mubr.f32.mxu0 %v2621_v23 }
 0x446   :  { %2737 = vmatmul.mubr.f32.vlgmr.msra.gmra.mrb[144].mxu0 %v2618_v61 }
 0x447   :  { %4015 = vmatpush3.bf16.msra.mxu0 %v4014_v34  ;;  %3742 = vmatprep.mubr.msk.f32.mxu0 %vm4407_vm12, %v6768_v15 }
 0x448   :  { %4016 = vmatprep.subr.bf16.mxu0 %v6747_v60 }
 0x44b   :  { %4018 = vmatpush3.bf16.msra.mxu0 %v4017_v16 }
 0x44c   :  { %4019 = vmatprep.subr.bf16.mxu0 %v6747_v60 }
 0x44f   :  { %4021 = vmatpush3.bf16.msra.mxu0 %v4020_v58 }
 0x450   :  { %3740 = vmatprep.subr.mxu0 %v6768_v15 }
 0x453   :  { %3741 = vmatpush3.msk.msra.mxu0 %vm2832_vm0, %v2821_v51 }
 0x517   :  { %v2808_v2 = vpop.f32.mrb[144].mxu1 }
 0x518   :  { %v3727_v60 = vpop.f32.mrb[145].mxu1 }
 0x519   :  { %v3597_v33 = vpop.f32.mrb[144].mxu0 }
 0x51a   :  { %v3598_v29 = vpop.f32.mrb[145].mxu0 }
 0x51b   :  { %v3599_v59 = vadd.f32 %v3598_v29, %v3597_v33 }
 0x51d   :  { %v2739_v53 = vadd.f32 %v3599_v59, %v3186_v28 }
 0x51f   :  { %v2809_v0 = vadd.f32 %v2808_v2, %v2739_v53 }
 0x521   :  { %v2812_v42 = vmax.f32 %v2809_v0, 0.0 }
 0x523   :  { %3743 = vmatmul.mubr.msk.f32.vlgmr.msra.gmra.mrb[146].mxu0 %vm2813_vm1, %v2812_v42  ;;  %2814 = vst.msk [vmem:[#allocation2] sm:$0xff] %vm2813_vm1, %v2812_v42 }
 0x5f6   :  { %v2902_v3 = vpop.f32.mrb[146].mxu0 }
 0x5f7   :  { %v2903_v25 = vadd.f32 %v3188_v55, %v2902_v3  ;;  %v3744_v40 = vpop.f32.mrb[147].mxu0 }
 0x5f9   :  { %v2907_v36 = vsel %vm2906_vm2, %v2903_v25, -inf }
 0x5fa   :  { %2908 = vmax.xlane.f32.xlu0 %v2907_v36 }
 0x687   :  { %v2909_v63 = vpop.xlane.xlu0 %2908 }
 0x688   :  { %v2910_v1 = vsub.f32 %v2903_v25, %v2909_v63 }
 0x68a   :  { %v2911_v47 = vmul.f32 1.442695, %v2910_v1 }
 0x68c   :  { %4361 = vpow2.f32 %v2911_v47 }
 0x696   :  { %v4362_v15 = vpop.eup %4361 }
 0x697   :  { %v2913_v31 = vsel %vm2906_vm2, %v4362_v15, 0.0 }
 0x698   :  { %2914 = vadd.xlane.f32.xlu1 %v2913_v31 }
 0x699   :  { %4384 = shalt.err (!%p4381_p4)
}
 0x69a   :  { %s4385_s11 = scalar_lea.hbm %s6700_s10, 128 }
 0x69b   :  { %p4386_p5 = scmp.ne.s32.totalorder %s6700_s10, %s4385_s11  ;;  %p4389_p6 = scmp.lt.u32.totalorder %s4385_s11, %s6700_s10 }
 0x69d   :  { %p4391_p7 = pnand %p4389_p6, %p4386_p5 }
 0x69f   :  { %4394 = shalt.err (!%p4391_p7)
}
 0x6a0   :  { %2930 = dma.vmem_to_hbm [thread:$0]  %s2928_s7, 128, %s6700_s10, [#allocation3]  }
 0x725   :  { %v2915_v27 = vpop.xlane.xlu1 %2914 }
 0x726   :  { %4363 = vrcp.f32 %v2915_v27 }
 0x730   :  { %v4364_v37 = vpop.eup %4363 }
 0x731   :  { %v2917_v30 = vmul.f32 %v4364_v37, %v4362_v15 }
 0x733   :  { %2918 = vst.msk [vmem:[%s6699_s9] sm:$0xff] %vm2906_vm2, %v2917_v30 }
 0x734   :  { %4395 = dma.done.wait [#allocation3], 128  }
 0x735   :  { %4396 = vsyncadd [#allocation3], 4294967168 }
 0x736   :  { %2936 = vsyncpa [#allocation3], 1 }

</bundles_post_ra>
